<compile_context>
chip_gen: v7x
topology: tpu7x:2x2x1
jax: 0.10.0
libtpu: 0.0.40
codegen_flags: <defaults>
</compile_context>

<pallas_src>
import functools
import math

import jax
import jax.numpy as jnp
from jax.experimental import pallas as pl
from jax.experimental.pallas import tpu as pltpu

KSIZE = 5
NEG_SLOPE = 0.01  # torch.nn.LeakyReLU default


def _leaky(v):
    return jnp.where(v > 0, v, NEG_SLOPE * v)


def _round_up(x, m):
    return (x + m - 1) // m * m


# ------------------------------ fused kernel ---------------------------------
def _fused_actor_kernel(x_ref, w1_ref, w2_ref, w3_ref, wfc_ref, wh_ref, bias_ref,
                        eps_ref, out_ref, a1_scr, a2_scr, a3_scr, *,
                        row_stride, span2, span3, h3, w3, action_dim, hidden,
                        conv1_tiles):
    """One sample's full forward.  Row index r = h*row_stride + w keeps the conv1
    output's spatial stride at every later layer, so a 5x5 valid conv is 25
    accumulated (rows, Cin) @ (Cin, Cout) dots over statically shifted ref slices.
    Only sublane-aligned valid row spans (span2 / span3) are ever computed; the few
    padded rows are finite and never reach a valid output."""
    f32 = jnp.float32
    k = KSIZE
    cd = w1_ref.dtype  # MXU operand dtype (f32 or bf16); accumulation stays f32.

    # ---- conv1: taps folded into K. One (rows, 25*Cin) @ (25*Cin, 64) per tile. ----
    c1 = w1_ref.shape[1]
    w1 = w1_ref[...]
    b1 = bias_ref[0:1, :c1]
    for start, size in conv1_tiles:                 # static row tiles (<=80 rows)
        acc = jnp.dot(x_ref[start:start + size, :], w1, preferred_element_type=f32)
        a1_scr[start:start + size, :] = acc + b1

    # ---- conv2: 25 tap dots, tight f32 accumulation (MRB-friendly on v7x). ----
    c2 = w2_ref.shape[-1]
    acc2 = jnp.zeros((span2, c2), f32)
    for kh in range(k):
        for kw in range(k):
            s = kh * row_stride + kw
            acc2 = acc2 + jnp.dot(a1_scr[s:s + span2, :].astype(cd),
                                  w2_ref[kh * k + kw], preferred_element_type=f32)
    a2_scr[...] = acc2 + bias_ref[1:2, :c2]

    # ---- conv3 ----
    c3 = w3_ref.shape[-1]
    acc3 = jnp.zeros((span3, c3), f32)
    for kh in range(k):
        for kw in range(k):
            s = kh * row_stride + kw
            acc3 = acc3 + jnp.dot(a2_scr[s:s + span3, :].astype(cd),
                                  w3_ref[kh * k + kw], preferred_element_type=f32)
    a3_scr[...] = acc3 + bias_ref[2:3, :c3]

    # ---- Flatten + Linear(flatten,128) + LeakyReLU.
    #      torch's NCHW flatten order is folded into wfc's (h,w) taps at pack time. ----
    n_feat = wfc_ref.shape[-1]
    facc = jnp.zeros((1, n_feat), f32)
    for hh in range(h3):
        for ww in range(w3):
            r = hh * row_stride + ww
            facc = facc + jnp.dot(a3_scr[r:r + 1, :].astype(cd),
                                  wfc_ref[hh * w3 + ww], preferred_element_type=f32)
    feat = _leaky(facc + bias_ref[3:4, :n_feat])          # (1, 128)

    # ---- merged mu/sigma heads: one (128,128) dot + one block-diag (128,2A) dot. ----
    wh1 = wh_ref[:, :2 * hidden]
    wh2 = wh_ref[:, 2 * hidden:2 * hidden + 2 * action_dim]
    h = _leaky(jnp.dot(feat.astype(cd), wh1, preferred_element_type=f32)
               + bias_ref[4:5, :2 * hidden])
    pre = (jnp.dot(h.astype(cd), wh2, preferred_element_type=f32)
           + bias_ref[5:6, :2 * action_dim])
    mu = jnp.tanh(pre[:, :action_dim])
    logits = pre[:, action_dim:]
    e = jnp.exp(logits - jnp.max(logits, axis=-1, keepdims=True))
    sigma = e / jnp.sum(e, axis=-1, keepdims=True)        # exact softmax (parity)
    # Normal(mu, sigma).sample(), reparameterized with host-drawn eps.
    out_ref[...] = (mu + sigma * eps_ref[...]).astype(out_ref.dtype)


# ------------------------------- wrapper --------------------------------------
@functools.partial(jax.jit, static_argnames=("action_dim", "hidden"))
def ppo_image_actor_forward(packed, x_nchw, sample_key, *, action_dim, hidden):
    """actions = Normal(mu(x), sigma(x)).sample() -- PPOImageActor.forward."""
    N, C, H, W = x_nchw.shape
    k = KSIZE
    h1, w1d = H - (k - 1), W - (k - 1)
    h2, w2d = h1 - (k - 1), w1d - (k - 1)
    h3, w3d = h2 - (k - 1), w2d - (k - 1)
    cdtype = packed["w1"].dtype

    # --- static row geometry (all Python ints at trace time), sublane-aligned ---
    maxshift = (k - 1) * w1d + (k - 1)
    span3 = _round_up((h3 - 1) * w1d + w3d, 8)                 # conv3 output row span
    span2 = _round_up(max((h2 - 1) * w1d + w2d, maxshift + span3), 8)
    rows1 = h1 * w1d
    rows1_p = _round_up(max(rows1, maxshift + span2), 8)       # conv1 rows (padded)
    tile = 80
    conv1_tiles, st = [], 0
    while st < rows1_p:
        conv1_tiles.append((st, min(tile, rows1_p - st)))
        st += tile
    conv1_tiles = tuple(conv1_tiles)

    # --- tiny XLA-side prep: NCHW -> channels-last im2col panel for conv1 ---
    xh = jnp.transpose(x_nchw, (0, 2, 3, 1)).astype(jnp.float32)
    cols = [xh[:, kh:kh + h1, kw:kw + w1d, :] for kh in range(k) for kw in range(k)]
    panel = jnp.concatenate(cols, axis=-1).reshape(N, rows1, k * k * C)
    panel = jnp.pad(panel, ((0, 0), (0, rows1_p - rows1), (0, 0))).astype(cdtype)

    eps = jax.random.normal(sample_key, (N, action_dim), jnp.float32)
    eps = eps.reshape(N, 1, action_dim)

    kernel = functools.partial(
        _fused_actor_kernel, row_stride=w1d, span2=span2, span3=span3,
        h3=h3, w3=w3d, action_dim=action_dim, hidden=hidden, conv1_tiles=conv1_tiles)

    out = pl.pallas_call(
        kernel,
        out_shape=jax.ShapeDtypeStruct((N, 1, action_dim), jnp.float32),
        grid=(N,),                                            # one sample per step
        in_specs=[
            pl.BlockSpec((None, rows1_p, k * k * C), lambda n: (n, 0, 0)),
            pl.BlockSpec(packed["w1"].shape, lambda n: (0, 0)),
            pl.BlockSpec(packed["w2"].shape, lambda n: (0, 0, 0)),
            pl.BlockSpec(packed["w3"].shape, lambda n: (0, 0, 0)),
            pl.BlockSpec(packed["wfc"].shape, lambda n: (0, 0, 0)),
            pl.BlockSpec(packed["wh"].shape, lambda n: (0, 0)),
            pl.BlockSpec(packed["bias"].shape, lambda n: (0, 0)),
            pl.BlockSpec((None, 1, action_dim), lambda n: (n, 0, 0)),
        ],
        out_specs=pl.BlockSpec((None, 1, action_dim), lambda n: (n, 0, 0)),
        scratch_shapes=[
            pltpu.VMEM((rows1_p, packed["w1"].shape[1]), jnp.float32),   # conv1 out
            pltpu.VMEM((span2, packed["w2"].shape[-1]), jnp.float32),    # conv2 out
            pltpu.VMEM((span3, packed["w3"].shape[-1]), jnp.float32),    # conv3 out
        ],
        compiler_params=pltpu.CompilerParams(
            dimension_semantics=("parallel",)),               # megacore split on v7x
    )(panel, packed["w1"], packed["w2"], packed["w3"], packed["wfc"],
      packed["wh"], packed["bias"], eps)
    return out.reshape(N, action_dim)


# ----------------------- parameters (torch layout) + packing ------------------
def calculate_conv2d_output_shape(h, w, k):
    return (h - (k - 1), w - (k - 1))


def init_torch_layout_params(key, in_ch, action_dim, flatten_size):
    ks = jax.random.split(key, 16)

    def conv(kw_, kb_, cout, cin):
        fan_in = cin * KSIZE * KSIZE
        w = jax.random.normal(kw_, (cout, cin, KSIZE, KSIZE), jnp.float32) / math.sqrt(fan_in)
        b = jax.random.normal(kb_, (cout,), jnp.float32) * 0.01
        return w, b

    def lin(kw_, kb_, out_f, in_f):
        w = jax.random.normal(kw_, (out_f, in_f), jnp.float32) / math.sqrt(in_f)
        b = jax.random.normal(kb_, (out_f,), jnp.float32) * 0.01
        return w, b

    p = {}
    p["c1_w"], p["c1_b"] = conv(ks[0], ks[1], 64, in_ch)
    p["c2_w"], p["c2_b"] = conv(ks[2], ks[3], 32, 64)
    p["c3_w"], p["c3_b"] = conv(ks[4], ks[5], 16, 32)
    p["fc_w"], p["fc_b"] = lin(ks[6], ks[7], 128, flatten_size)
    p["mu1_w"], p["mu1_b"] = lin(ks[8], ks[9], 64, 128)
    p["mu2_w"], p["mu2_b"] = lin(ks[10], ks[11], action_dim, 64)
    p["sg1_w"], p["sg1_b"] = lin(ks[12], ks[13], 64, 128)
    p["sg2_w"], p["sg2_b"] = lin(ks[14], ks[15], action_dim, 64)
    return p


def pack_params(p, conv_out_hw, compute_dtype=jnp.float32):
    """One-time weight re-layout for the fused kernel.  compute_dtype = f32 or bf16
    (bf16 halves weight DMA bytes and hits the MXU-native operand path on v6e/v7x)."""
    h3, w3 = conv_out_hw
    k = KSIZE

    def conv_taps(w):  # torch (Cout, Cin, k, k) -> (k*k, Cin, Cout), tap = kh*k+kw
        cout, cin, kh, kw = w.shape
        return jnp.transpose(w, (2, 3, 1, 0)).reshape(kh * kw, cin, cout)

    # conv1: fold taps into the contraction dim (matches the wrapper's im2col panel)
    cout1, cin1 = p["c1_w"].shape[0], p["c1_w"].shape[1]
    w1 = jnp.transpose(p["c1_w"], (2, 3, 1, 0)).reshape(k * k * cin1, cout1)
    w2 = conv_taps(p["c2_w"])
    w3t = conv_taps(p["c3_w"])

    # fc: torch flatten order (c, h, w) folded into per-(h,w) taps of shape (C3, 128)
    c3 = p["c3_w"].shape[0]
    n_fc = p["fc_w"].shape[0]
    wfc = p["fc_w"].reshape(n_fc, c3, h3, w3)
    wfc = jnp.transpose(wfc, (2, 3, 1, 0)).reshape(h3 * w3, c3, n_fc)

    # merged mu/sigma heads, packed side-by-side into one array (fewer DMAs)
    hid = p["mu1_w"].shape[0]
    A = p["mu2_w"].shape[0]
    assert n_fc == 2 * hid, "packing assumes fc width == 2*head hidden"
    wh1 = jnp.concatenate([p["mu1_w"].T, p["sg1_w"].T], axis=1)          # (128, 128)
    wh2 = jnp.zeros((2 * hid, 2 * A), jnp.float32)                       # block diag
    wh2 = wh2.at[:hid, :A].set(p["mu2_w"].T).at[hid:, A:].set(p["sg2_w"].T)
    wh = jnp.concatenate([wh1, wh2], axis=1)                             # (128, 136)

    def pad128(v):
        return jnp.pad(v, (0, 128 - v.shape[0]))

    bias = jnp.stack([
        pad128(p["c1_b"]), pad128(p["c2_b"]), pad128(p["c3_b"]), pad128(p["fc_b"]),
        pad128(jnp.concatenate([p["mu1_b"], p["sg1_b"]])),
        pad128(jnp.concatenate([p["mu2_b"], p["sg2_b"]])),
    ], axis=0)                                                           # (6, 128) f32

    cd = compute_dtype
    return {"w1": w1.astype(cd), "w2": w2.astype(cd), "w3": w3t.astype(cd),
            "wfc": wfc.astype(cd), "wh": wh.astype(cd),
            "bias": bias.astype(jnp.float32)}


# ---------------------- plain-JAX reference (for self-check) ------------------
def _reference_forward(p, x_nchw, eps):
    def conv(x, w, b):
        n, c, hgt, wid = x.shape
        k = w.shape[-1]
        ho, wo = hgt - k + 1, wid - k + 1
        cols = [x[:, :, kh:kh + ho, kw:kw + wo] for kh in range(k) for kw in range(k)]
        pch = jnp.stack(cols, axis=2)                                # (n, c, k*k, ho, wo)
        pch = jnp.transpose(pch, (0, 3, 4, 1, 2)).reshape(n * ho * wo, c * k * k)
        y = pch @ w.reshape(w.shape[0], -1).T + b
        return y.reshape(n, ho, wo, -1).transpose(0, 3, 1, 2)

    h = conv(x_nchw, p["c1_w"], p["c1_b"])
    h = conv(h, p["c2_w"], p["c2_b"])
    h = conv(h, p["c3_w"], p["c3_b"])
    flat = h.reshape(h.shape[0], -1)                                 # NCHW flatten
    feat = _leaky(flat @ p["fc_w"].T + p["fc_b"])
    mu = jnp.tanh(_leaky(feat @ p["mu1_w"].T + p["mu1_b"]) @ p["mu2_w"].T + p["mu2_b"])
    sg_logits = _leaky(feat @ p["sg1_w"].T + p["sg1_b"]) @ p["sg2_w"].T + p["sg2_b"]
    sigma = jax.nn.softmax(sg_logits, axis=-1)
    return mu + sigma * eps


if __name__ == "__main__":
    key = jax.random.PRNGKey(0)
    k_inp, k_par, k_samp = jax.random.split(key, 3)

    img_size = (16, 16)
    images_per_input = 4
    control_type = "ee"
    action_dim = 4 if control_type == "ee" else 8
    in_ch = images_per_input * 3                     # 12
    batch = 2

    c1 = calculate_conv2d_output_shape(img_size[1], img_size[0], KSIZE)
    c2 = calculate_conv2d_output_shape(c1[1], c1[0], KSIZE)
    c3 = calculate_conv2d_output_shape(c2[1], c2[0], KSIZE)
    flatten_size = 16 * c3[0] * c3[1]                # 16 * 4 * 4 = 256

    x = jax.random.normal(k_inp, (batch, in_ch, img_size[0], img_size[1]), jnp.float32)
    params = init_torch_layout_params(k_par, in_ch, action_dim, flatten_size)
    hidden = params["mu1_w"].shape[0]

    # Reference (same eps as the kernel draws from k_samp).
    eps = jax.random.normal(k_samp, (batch, action_dim), jnp.float32)
    ref = jax.block_until_ready(_reference_forward(params, x, eps))

    # f32 path checked tightly (per the correctness feedback); bf16 MXU-operand
    # path (v6e/v7x recommendation) checked at loose tolerance.
    for cdtype, tol in ((jnp.float32, 1e-3), (jnp.bfloat16, 1e-1)):
        packed = pack_params(params, (c3[0], c3[1]), compute_dtype=cdtype)
        actions = ppo_image_actor_forward(packed, x, k_samp,
                                          action_dim=action_dim, hidden=hidden)
        actions = jax.block_until_ready(actions)
        assert actions.shape == (batch, action_dim)
        assert bool(jnp.all(jnp.isfinite(actions)))
        assert bool(jnp.allclose(actions, ref, rtol=tol, atol=tol)), (str(cdtype), tol)

    print("KERNEL_OK")
</pallas_src>

<mosaic_0001>
module attributes {stable_mosaic.version = 11 : i64} {
  func.func @_fused_actor_kernel(%arg0: i32, %arg1: memref<1x152x300xf32, #tpu.memory_space<vmem>>, %arg2: memref<300x64xf32, #tpu.memory_space<vmem>>, %arg3: memref<25x64x32xf32, #tpu.memory_space<vmem>>, %arg4: memref<25x32x16xf32, #tpu.memory_space<vmem>>, %arg5: memref<16x16x128xf32, #tpu.memory_space<vmem>>, %arg6: memref<128x136xf32, #tpu.memory_space<vmem>>, %arg7: memref<6x128xf32, #tpu.memory_space<vmem>>, %arg8: memref<1x1x4xf32, #tpu.memory_space<vmem>>, %arg9: memref<1x1x4xf32, #tpu.memory_space<vmem>>, %arg10: memref<152x64xf32, #tpu.memory_space<vmem>>, %arg11: memref<96x32xf32, #tpu.memory_space<vmem>>, %arg12: memref<40x16xf32, #tpu.memory_space<vmem>>) attributes {dimension_semantics = [#tpu.dimension_semantics<parallel>], iteration_bounds = array<i64: 2>, scalar_prefetch = 0 : i64, scratch_operands = 3 : i64, tpu.core_type = #tpu.core_type<tc>, window_params = [{transform_indices = @transform_0, window_bounds = array<i64: 1, 152, 300>}, {pipeline_mode = #tpu.pipeline_mode<synchronous>, transform_indices = @transform_1, window_bounds = array<i64: 300, 64>}, {pipeline_mode = #tpu.pipeline_mode<synchronous>, transform_indices = @transform_2, window_bounds = array<i64: 25, 64, 32>}, {pipeline_mode = #tpu.pipeline_mode<synchronous>, transform_indices = @transform_3, window_bounds = array<i64: 25, 32, 16>}, {pipeline_mode = #tpu.pipeline_mode<synchronous>, transform_indices = @transform_4, window_bounds = array<i64: 16, 16, 128>}, {pipeline_mode = #tpu.pipeline_mode<synchronous>, transform_indices = @transform_5, window_bounds = array<i64: 128, 136>}, {pipeline_mode = #tpu.pipeline_mode<synchronous>, transform_indices = @transform_6, window_bounds = array<i64: 6, 128>}, {transform_indices = @transform_7, window_bounds = array<i64: 1, 1, 4>}, {transform_indices = @transform_8, window_bounds = array<i64: 1, 1, 4>}]} {
    %c0 = arith.constant 0 : index
    %c0_0 = arith.constant 0 : index
    %0 = vector.load %arg2[%c0, %c0_0] : memref<300x64xf32, #tpu.memory_space<vmem>>, vector<300x64xf32>
    %c0_1 = arith.constant 0 : index
    %c0_2 = arith.constant 0 : index
    %1 = vector.load %arg7[%c0_1, %c0_2] : memref<6x128xf32, #tpu.memory_space<vmem>>, vector<1x64xf32>
    %c0_3 = arith.constant 0 : index
    %c0_4 = arith.constant 0 : index
    %c0_5 = arith.constant 0 : index
    %2 = vector.load %arg1[%c0_3, %c0_4, %c0_5] : memref<1x152x300xf32, #tpu.memory_space<vmem>>, vector<1x80x300xf32>
    %3 = vector.shape_cast %2 : vector<1x80x300xf32> to vector<80x300xf32>
    %cst = arith.constant dense<0.000000e+00> : vector<80x64xf32>
    %4 = tpu.matmul %3, %0, %cst {dimension_numbers = #tpu.dot_dimension_numbers<[1], [0], [0], [1], [0, 0, 1, 1], [], []>} : vector<80x300xf32>, vector<300x64xf32>, vector<80x64xf32> -> vector<80x64xf32>
    %5 = vector.broadcast %1 : vector<1x64xf32> to vector<80x64xf32>
    %6 = arith.addf %4, %5 : vector<80x64xf32>
    %c0_6 = arith.constant 0 : index
    %c0_7 = arith.constant 0 : index
    %7 = vector.load %arg10[%c0_6, %c0_7] : memref<152x64xf32, #tpu.memory_space<vmem>>, vector<80x64xf32>
    tpu.vector_store %arg10[%c0_6, %c0_7], %6 {strides = array<i32>} : memref<152x64xf32, #tpu.memory_space<vmem>>, vector<80x64xf32>,
    %c0_8 = arith.constant 0 : index
    %c80 = arith.constant 80 : index
    %c0_9 = arith.constant 0 : index
    %8 = vector.load %arg1[%c0_8, %c80, %c0_9] : memref<1x152x300xf32, #tpu.memory_space<vmem>>, vector<1x72x300xf32>
    %9 = vector.shape_cast %8 : vector<1x72x300xf32> to vector<72x300xf32>
    %cst_10 = arith.constant dense<0.000000e+00> : vector<72x64xf32>
    %10 = tpu.matmul %9, %0, %cst_10 {dimension_numbers = #tpu.dot_dimension_numbers<[1], [0], [0], [1], [0, 0, 1, 1], [], []>} : vector<72x300xf32>, vector<300x64xf32>, vector<72x64xf32> -> vector<72x64xf32>
    %11 = vector.broadcast %1 : vector<1x64xf32> to vector<72x64xf32>
    %12 = arith.addf %10, %11 : vector<72x64xf32>
    %c80_11 = arith.constant 80 : index
    %c0_12 = arith.constant 0 : index
    %13 = vector.load %arg10[%c80_11, %c0_12] : memref<152x64xf32, #tpu.memory_space<vmem>>, vector<72x64xf32>
    tpu.vector_store %arg10[%c80_11, %c0_12], %12 {strides = array<i32>} : memref<152x64xf32, #tpu.memory_space<vmem>>, vector<72x64xf32>,
    %cst_13 = arith.constant 0.000000e+00 : f32
    %14 = vector.broadcast %cst_13 : f32 to vector<96x32xf32>
    %c0_14 = arith.constant 0 : index
    %c0_15 = arith.constant 0 : index
    %15 = vector.load %arg10[%c0_14, %c0_15] : memref<152x64xf32, #tpu.memory_space<vmem>>, vector<96x64xf32>
    %c0_16 = arith.constant 0 : index
    %c0_17 = arith.constant 0 : index
    %c0_18 = arith.constant 0 : index
    %16 = vector.load %arg3[%c0_16, %c0_17, %c0_18] : memref<25x64x32xf32, #tpu.memory_space<vmem>>, vector<1x64x32xf32>
    %17 = vector.shape_cast %16 : vector<1x64x32xf32> to vector<64x32xf32>
    %cst_19 = arith.constant dense<0.000000e+00> : vector<96x32xf32>
    %18 = tpu.matmul %15, %17, %cst_19 {dimension_numbers = #tpu.dot_dimension_numbers<[1], [0], [0], [1], [0, 0, 1, 1], [], []>} : vector<96x64xf32>, vector<64x32xf32>, vector<96x32xf32> -> vector<96x32xf32>
    %19 = arith.addf %14, %18 : vector<96x32xf32>
    %c1 = arith.constant 1 : index
    %c0_20 = arith.constant 0 : index
    %20 = vector.load %arg10[%c1, %c0_20] : memref<152x64xf32, #tpu.memory_space<vmem>>, vector<96x64xf32>
    %c1_21 = arith.constant 1 : index
    %c0_22 = arith.constant 0 : index
    %c0_23 = arith.constant 0 : index
    %21 = vector.load %arg3[%c1_21, %c0_22, %c0_23] : memref<25x64x32xf32, #tpu.memory_space<vmem>>, vector<1x64x32xf32>
    %22 = vector.shape_cast %21 : vector<1x64x32xf32> to vector<64x32xf32>
    %cst_24 = arith.constant dense<0.000000e+00> : vector<96x32xf32>
    %23 = tpu.matmul %20, %22, %cst_24 {dimension_numbers = #tpu.dot_dimension_numbers<[1], [0], [0], [1], [0, 0, 1, 1], [], []>} : vector<96x64xf32>, vector<64x32xf32>, vector<96x32xf32> -> vector<96x32xf32>
    %24 = arith.addf %19, %23 : vector<96x32xf32>
    %c2 = arith.constant 2 : index
    %c0_25 = arith.constant 0 : index
    %25 = vector.load %arg10[%c2, %c0_25] : memref<152x64xf32, #tpu.memory_space<vmem>>, vector<96x64xf32>
    %c2_26 = arith.constant 2 : index
    %c0_27 = arith.constant 0 : index
    %c0_28 = arith.constant 0 : index
    %26 = vector.load %arg3[%c2_26, %c0_27, %c0_28] : memref<25x64x32xf32, #tpu.memory_space<vmem>>, vector<1x64x32xf32>
    %27 = vector.shape_cast %26 : vector<1x64x32xf32> to vector<64x32xf32>
    %cst_29 = arith.constant dense<0.000000e+00> : vector<96x32xf32>
    %28 = tpu.matmul %25, %27, %cst_29 {dimension_numbers = #tpu.dot_dimension_numbers<[1], [0], [0], [1], [0, 0, 1, 1], [], []>} : vector<96x64xf32>, vector<64x32xf32>, vector<96x32xf32> -> vector<96x32xf32>
    %29 = arith.addf %24, %28 : vector<96x32xf32>
    %c3 = arith.constant 3 : index
    %c0_30 = arith.constant 0 : index
    %30 = vector.load %arg10[%c3, %c0_30] : memref<152x64xf32, #tpu.memory_space<vmem>>, vector<96x64xf32>
    %c3_31 = arith.constant 3 : index
    %c0_32 = arith.constant 0 : index
    %c0_33 = arith.constant 0 : index
    %31 = vector.load %arg3[%c3_31, %c0_32, %c0_33] : memref<25x64x32xf32, #tpu.memory_space<vmem>>, vector<1x64x32xf32>
    %32 = vector.shape_cast %31 : vector<1x64x32xf32> to vector<64x32xf32>
    %cst_34 = arith.constant dense<0.000000e+00> : vector<96x32xf32>
    %33 = tpu.matmul %30, %32, %cst_34 {dimension_numbers = #tpu.dot_dimension_numbers<[1], [0], [0], [1], [0, 0, 1, 1], [], []>} : vector<96x64xf32>, vector<64x32xf32>, vector<96x32xf32> -> vector<96x32xf32>
    %34 = arith.addf %29, %33 : vector<96x32xf32>
    %c4 = arith.constant 4 : index
    %c0_35 = arith.constant 0 : index
    %35 = vector.load %arg10[%c4, %c0_35] : memref<152x64xf32, #tpu.memory_space<vmem>>, vector<96x64xf32>
    %c4_36 = arith.constant 4 : index
    %c0_37 = arith.constant 0 : index
    %c0_38 = arith.constant 0 : index
    %36 = vector.load %arg3[%c4_36, %c0_37, %c0_38] : memref<25x64x32xf32, #tpu.memory_space<vmem>>, vector<1x64x32xf32>
    %37 = vector.shape_cast %36 : vector<1x64x32xf32> to vector<64x32xf32>
    %cst_39 = arith.constant dense<0.000000e+00> : vector<96x32xf32>
    %38 = tpu.matmul %35, %37, %cst_39 {dimension_numbers = #tpu.dot_dimension_numbers<[1], [0], [0], [1], [0, 0, 1, 1], [], []>} : vector<96x64xf32>, vector<64x32xf32>, vector<96x32xf32> -> vector<96x32xf32>
    %39 = arith.addf %34, %38 : vector<96x32xf32>
    %c12 = arith.constant 12 : index
    %c0_40 = arith.constant 0 : index
    %40 = vector.load %arg10[%c12, %c0_40] : memref<152x64xf32, #tpu.memory_space<vmem>>, vector<96x64xf32>
    %c5 = arith.constant 5 : index
    %c0_41 = arith.constant 0 : index
    %c0_42 = arith.constant 0 : index
    %41 = vector.load %arg3[%c5, %c0_41, %c0_42] : memref<25x64x32xf32, #tpu.memory_space<vmem>>, vector<1x64x32xf32>
    %42 = vector.shape_cast %41 : vector<1x64x32xf32> to vector<64x32xf32>
    %cst_43 = arith.constant dense<0.000000e+00> : vector<96x32xf32>
    %43 = tpu.matmul %40, %42, %cst_43 {dimension_numbers = #tpu.dot_dimension_numbers<[1], [0], [0], [1], [0, 0, 1, 1], [], []>} : vector<96x64xf32>, vector<64x32xf32>, vector<96x32xf32> -> vector<96x32xf32>
    %44 = arith.addf %39, %43 : vector<96x32xf32>
    %c13 = arith.constant 13 : index
    %c0_44 = arith.constant 0 : index
    %45 = vector.load %arg10[%c13, %c0_44] : memref<152x64xf32, #tpu.memory_space<vmem>>, vector<96x64xf32>
    %c6 = arith.constant 6 : index
    %c0_45 = arith.constant 0 : index
    %c0_46 = arith.constant 0 : index
    %46 = vector.load %arg3[%c6, %c0_45, %c0_46] : memref<25x64x32xf32, #tpu.memory_space<vmem>>, vector<1x64x32xf32>
    %47 = vector.shape_cast %46 : vector<1x64x32xf32> to vector<64x32xf32>
    %cst_47 = arith.constant dense<0.000000e+00> : vector<96x32xf32>
    %48 = tpu.matmul %45, %47, %cst_47 {dimension_numbers = #tpu.dot_dimension_numbers<[1], [0], [0], [1], [0, 0, 1, 1], [], []>} : vector<96x64xf32>, vector<64x32xf32>, vector<96x32xf32> -> vector<96x32xf32>
    %49 = arith.addf %44, %48 : vector<96x32xf32>
    %c14 = arith.constant 14 : index
    %c0_48 = arith.constant 0 : index
    %50 = vector.load %arg10[%c14, %c0_48] : memref<152x64xf32, #tpu.memory_space<vmem>>, vector<96x64xf32>
    %c7 = arith.constant 7 : index
    %c0_49 = arith.constant 0 : index
    %c0_50 = arith.constant 0 : index
    %51 = vector.load %arg3[%c7, %c0_49, %c0_50] : memref<25x64x32xf32, #tpu.memory_space<vmem>>, vector<1x64x32xf32>
    %52 = vector.shape_cast %51 : vector<1x64x32xf32> to vector<64x32xf32>
    %cst_51 = arith.constant dense<0.000000e+00> : vector<96x32xf32>
    %53 = tpu.matmul %50, %52, %cst_51 {dimension_numbers = #tpu.dot_dimension_numbers<[1], [0], [0], [1], [0, 0, 1, 1], [], []>} : vector<96x64xf32>, vector<64x32xf32>, vector<96x32xf32> -> vector<96x32xf32>
    %54 = arith.addf %49, %53 : vector<96x32xf32>
    %c15 = arith.constant 15 : index
    %c0_52 = arith.constant 0 : index
    %55 = vector.load %arg10[%c15, %c0_52] : memref<152x64xf32, #tpu.memory_space<vmem>>, vector<96x64xf32>
    %c8 = arith.constant 8 : index
    %c0_53 = arith.constant 0 : index
    %c0_54 = arith.constant 0 : index
    %56 = vector.load %arg3[%c8, %c0_53, %c0_54] : memref<25x64x32xf32, #tpu.memory_space<vmem>>, vector<1x64x32xf32>
    %57 = vector.shape_cast %56 : vector<1x64x32xf32> to vector<64x32xf32>
    %cst_55 = arith.constant dense<0.000000e+00> : vector<96x32xf32>
    %58 = tpu.matmul %55, %57, %cst_55 {dimension_numbers = #tpu.dot_dimension_numbers<[1], [0], [0], [1], [0, 0, 1, 1], [], []>} : vector<96x64xf32>, vector<64x32xf32>, vector<96x32xf32> -> vector<96x32xf32>
    %59 = arith.addf %54, %58 : vector<96x32xf32>
    %c16 = arith.constant 16 : index
    %c0_56 = arith.constant 0 : index
    %60 = vector.load %arg10[%c16, %c0_56] : memref<152x64xf32, #tpu.memory_space<vmem>>, vector<96x64xf32>
    %c9 = arith.constant 9 : index
    %c0_57 = arith.constant 0 : index
    %c0_58 = arith.constant 0 : index
    %61 = vector.load %arg3[%c9, %c0_57, %c0_58] : memref<25x64x32xf32, #tpu.memory_space<vmem>>, vector<1x64x32xf32>
    %62 = vector.shape_cast %61 : vector<1x64x32xf32> to vector<64x32xf32>
    %cst_59 = arith.constant dense<0.000000e+00> : vector<96x32xf32>
    %63 = tpu.matmul %60, %62, %cst_59 {dimension_numbers = #tpu.dot_dimension_numbers<[1], [0], [0], [1], [0, 0, 1, 1], [], []>} : vector<96x64xf32>, vector<64x32xf32>, vector<96x32xf32> -> vector<96x32xf32>
    %64 = arith.addf %59, %63 : vector<96x32xf32>
    %c24 = arith.constant 24 : index
    %c0_60 = arith.constant 0 : index
    %65 = vector.load %arg10[%c24, %c0_60] : memref<152x64xf32, #tpu.memory_space<vmem>>, vector<96x64xf32>
    %c10 = arith.constant 10 : index
    %c0_61 = arith.constant 0 : index
    %c0_62 = arith.constant 0 : index
    %66 = vector.load %arg3[%c10, %c0_61, %c0_62] : memref<25x64x32xf32, #tpu.memory_space<vmem>>, vector<1x64x32xf32>
    %67 = vector.shape_cast %66 : vector<1x64x32xf32> to vector<64x32xf32>
    %cst_63 = arith.constant dense<0.000000e+00> : vector<96x32xf32>
    %68 = tpu.matmul %65, %67, %cst_63 {dimension_numbers = #tpu.dot_dimension_numbers<[1], [0], [0], [1], [0, 0, 1, 1], [], []>} : vector<96x64xf32>, vector<64x32xf32>, vector<96x32xf32> -> vector<96x32xf32>
    %69 = arith.addf %64, %68 : vector<96x32xf32>
    %c25 = arith.constant 25 : index
    %c0_64 = arith.constant 0 : index
    %70 = vector.load %arg10[%c25, %c0_64] : memref<152x64xf32, #tpu.memory_space<vmem>>, vector<96x64xf32>
    %c11 = arith.constant 11 : index
    %c0_65 = arith.constant 0 : index
    %c0_66 = arith.constant 0 : index
    %71 = vector.load %arg3[%c11, %c0_65, %c0_66] : memref<25x64x32xf32, #tpu.memory_space<vmem>>, vector<1x64x32xf32>
    %72 = vector.shape_cast %71 : vector<1x64x32xf32> to vector<64x32xf32>
    %cst_67 = arith.constant dense<0.000000e+00> : vector<96x32xf32>
    %73 = tpu.matmul %70, %72, %cst_67 {dimension_numbers = #tpu.dot_dimension_numbers<[1], [0], [0], [1], [0, 0, 1, 1], [], []>} : vector<96x64xf32>, vector<64x32xf32>, vector<96x32xf32> -> vector<96x32xf32>
    %74 = arith.addf %69, %73 : vector<96x32xf32>
    %c26 = arith.constant 26 : index
    %c0_68 = arith.constant 0 : index
    %75 = vector.load %arg10[%c26, %c0_68] : memref<152x64xf32, #tpu.memory_space<vmem>>, vector<96x64xf32>
    %c12_69 = arith.constant 12 : index
    %c0_70 = arith.constant 0 : index
    %c0_71 = arith.constant 0 : index
    %76 = vector.load %arg3[%c12_69, %c0_70, %c0_71] : memref<25x64x32xf32, #tpu.memory_space<vmem>>, vector<1x64x32xf32>
    %77 = vector.shape_cast %76 : vector<1x64x32xf32> to vector<64x32xf32>
    %cst_72 = arith.constant dense<0.000000e+00> : vector<96x32xf32>
    %78 = tpu.matmul %75, %77, %cst_72 {dimension_numbers = #tpu.dot_dimension_numbers<[1], [0], [0], [1], [0, 0, 1, 1], [], []>} : vector<96x64xf32>, vector<64x32xf32>, vector<96x32xf32> -> vector<96x32xf32>
    %79 = arith.addf %74, %78 : vector<96x32xf32>
    %c27 = arith.constant 27 : index
    %c0_73 = arith.constant 0 : index
    %80 = vector.load %arg10[%c27, %c0_73] : memref<152x64xf32, #tpu.memory_space<vmem>>, vector<96x64xf32>
    %c13_74 = arith.constant 13 : index
    %c0_75 = arith.constant 0 : index
    %c0_76 = arith.constant 0 : index
    %81 = vector.load %arg3[%c13_74, %c0_75, %c0_76] : memref<25x64x32xf32, #tpu.memory_space<vmem>>, vector<1x64x32xf32>
    %82 = vector.shape_cast %81 : vector<1x64x32xf32> to vector<64x32xf32>
    %cst_77 = arith.constant dense<0.000000e+00> : vector<96x32xf32>
    %83 = tpu.matmul %80, %82, %cst_77 {dimension_numbers = #tpu.dot_dimension_numbers<[1], [0], [0], [1], [0, 0, 1, 1], [], []>} : vector<96x64xf32>, vector<64x32xf32>, vector<96x32xf32> -> vector<96x32xf32>
    %84 = arith.addf %79, %83 : vector<96x32xf32>
    %c28 = arith.constant 28 : index
    %c0_78 = arith.constant 0 : index
    %85 = vector.load %arg10[%c28, %c0_78] : memref<152x64xf32, #tpu.memory_space<vmem>>, vector<96x64xf32>
    %c14_79 = arith.constant 14 : index
    %c0_80 = arith.constant 0 : index
    %c0_81 = arith.constant 0 : index
    %86 = vector.load %arg3[%c14_79, %c0_80, %c0_81] : memref<25x64x32xf32, #tpu.memory_space<vmem>>, vector<1x64x32xf32>
    %87 = vector.shape_cast %86 : vector<1x64x32xf32> to vector<64x32xf32>
    %cst_82 = arith.constant dense<0.000000e+00> : vector<96x32xf32>
    %88 = tpu.matmul %85, %87, %cst_82 {dimension_numbers = #tpu.dot_dimension_numbers<[1], [0], [0], [1], [0, 0, 1, 1], [], []>} : vector<96x64xf32>, vector<64x32xf32>, vector<96x32xf32> -> vector<96x32xf32>
    %89 = arith.addf %84, %88 : vector<96x32xf32>
    %c36 = arith.constant 36 : index
    %c0_83 = arith.constant 0 : index
    %90 = vector.load %arg10[%c36, %c0_83] : memref<152x64xf32, #tpu.memory_space<vmem>>, vector<96x64xf32>
    %c15_84 = arith.constant 15 : index
    %c0_85 = arith.constant 0 : index
    %c0_86 = arith.constant 0 : index
    %91 = vector.load %arg3[%c15_84, %c0_85, %c0_86] : memref<25x64x32xf32, #tpu.memory_space<vmem>>, vector<1x64x32xf32>
    %92 = vector.shape_cast %91 : vector<1x64x32xf32> to vector<64x32xf32>
    %cst_87 = arith.constant dense<0.000000e+00> : vector<96x32xf32>
    %93 = tpu.matmul %90, %92, %cst_87 {dimension_numbers = #tpu.dot_dimension_numbers<[1], [0], [0], [1], [0, 0, 1, 1], [], []>} : vector<96x64xf32>, vector<64x32xf32>, vector<96x32xf32> -> vector<96x32xf32>
    %94 = arith.addf %89, %93 : vector<96x32xf32>
    %c37 = arith.constant 37 : index
    %c0_88 = arith.constant 0 : index
    %95 = vector.load %arg10[%c37, %c0_88] : memref<152x64xf32, #tpu.memory_space<vmem>>, vector<96x64xf32>
    %c16_89 = arith.constant 16 : index
    %c0_90 = arith.constant 0 : index
    %c0_91 = arith.constant 0 : index
    %96 = vector.load %arg3[%c16_89, %c0_90, %c0_91] : memref<25x64x32xf32, #tpu.memory_space<vmem>>, vector<1x64x32xf32>
    %97 = vector.shape_cast %96 : vector<1x64x32xf32> to vector<64x32xf32>
    %cst_92 = arith.constant dense<0.000000e+00> : vector<96x32xf32>
    %98 = tpu.matmul %95, %97, %cst_92 {dimension_numbers = #tpu.dot_dimension_numbers<[1], [0], [0], [1], [0, 0, 1, 1], [], []>} : vector<96x64xf32>, vector<64x32xf32>, vector<96x32xf32> -> vector<96x32xf32>
    %99 = arith.addf %94, %98 : vector<96x32xf32>
    %c38 = arith.constant 38 : index
    %c0_93 = arith.constant 0 : index
    %100 = vector.load %arg10[%c38, %c0_93] : memref<152x64xf32, #tpu.memory_space<vmem>>, vector<96x64xf32>
    %c17 = arith.constant 17 : index
    %c0_94 = arith.constant 0 : index
    %c0_95 = arith.constant 0 : index
    %101 = vector.load %arg3[%c17, %c0_94, %c0_95] : memref<25x64x32xf32, #tpu.memory_space<vmem>>, vector<1x64x32xf32>
    %102 = vector.shape_cast %101 : vector<1x64x32xf32> to vector<64x32xf32>
    %cst_96 = arith.constant dense<0.000000e+00> : vector<96x32xf32>
    %103 = tpu.matmul %100, %102, %cst_96 {dimension_numbers = #tpu.dot_dimension_numbers<[1], [0], [0], [1], [0, 0, 1, 1], [], []>} : vector<96x64xf32>, vector<64x32xf32>, vector<96x32xf32> -> vector<96x32xf32>
    %104 = arith.addf %99, %103 : vector<96x32xf32>
    %c39 = arith.constant 39 : index
    %c0_97 = arith.constant 0 : index
    %105 = vector.load %arg10[%c39, %c0_97] : memref<152x64xf32, #tpu.memory_space<vmem>>, vector<96x64xf32>
    %c18 = arith.constant 18 : index
    %c0_98 = arith.constant 0 : index
    %c0_99 = arith.constant 0 : index
    %106 = vector.load %arg3[%c18, %c0_98, %c0_99] : memref<25x64x32xf32, #tpu.memory_space<vmem>>, vector<1x64x32xf32>
    %107 = vector.shape_cast %106 : vector<1x64x32xf32> to vector<64x32xf32>
    %cst_100 = arith.constant dense<0.000000e+00> : vector<96x32xf32>
    %108 = tpu.matmul %105, %107, %cst_100 {dimension_numbers = #tpu.dot_dimension_numbers<[1], [0], [0], [1], [0, 0, 1, 1], [], []>} : vector<96x64xf32>, vector<64x32xf32>, vector<96x32xf32> -> vector<96x32xf32>
    %109 = arith.addf %104, %108 : vector<96x32xf32>
    %c40 = arith.constant 40 : index
    %c0_101 = arith.constant 0 : index
    %110 = vector.load %arg10[%c40, %c0_101] : memref<152x64xf32, #tpu.memory_space<vmem>>, vector<96x64xf32>
    %c19 = arith.constant 19 : index
    %c0_102 = arith.constant 0 : index
    %c0_103 = arith.constant 0 : index
    %111 = vector.load %arg3[%c19, %c0_102, %c0_103] : memref<25x64x32xf32, #tpu.memory_space<vmem>>, vector<1x64x32xf32>
    %112 = vector.shape_cast %111 : vector<1x64x32xf32> to vector<64x32xf32>
    %cst_104 = arith.constant dense<0.000000e+00> : vector<96x32xf32>
    %113 = tpu.matmul %110, %112, %cst_104 {dimension_numbers = #tpu.dot_dimension_numbers<[1], [0], [0], [1], [0, 0, 1, 1], [], []>} : vector<96x64xf32>, vector<64x32xf32>, vector<96x32xf32> -> vector<96x32xf32>
    %114 = arith.addf %109, %113 : vector<96x32xf32>
    %c48 = arith.constant 48 : index
    %c0_105 = arith.constant 0 : index
    %115 = vector.load %arg10[%c48, %c0_105] : memref<152x64xf32, #tpu.memory_space<vmem>>, vector<96x64xf32>
    %c20 = arith.constant 20 : index
    %c0_106 = arith.constant 0 : index
    %c0_107 = arith.constant 0 : index
    %116 = vector.load %arg3[%c20, %c0_106, %c0_107] : memref<25x64x32xf32, #tpu.memory_space<vmem>>, vector<1x64x32xf32>
    %117 = vector.shape_cast %116 : vector<1x64x32xf32> to vector<64x32xf32>
    %cst_108 = arith.constant dense<0.000000e+00> : vector<96x32xf32>
    %118 = tpu.matmul %115, %117, %cst_108 {dimension_numbers = #tpu.dot_dimension_numbers<[1], [0], [0], [1], [0, 0, 1, 1], [], []>} : vector<96x64xf32>, vector<64x32xf32>, vector<96x32xf32> -> vector<96x32xf32>
    %119 = arith.addf %114, %118 : vector<96x32xf32>
    %c49 = arith.constant 49 : index
    %c0_109 = arith.constant 0 : index
    %120 = vector.load %arg10[%c49, %c0_109] : memref<152x64xf32, #tpu.memory_space<vmem>>, vector<96x64xf32>
    %c21 = arith.constant 21 : index
    %c0_110 = arith.constant 0 : index
    %c0_111 = arith.constant 0 : index
    %121 = vector.load %arg3[%c21, %c0_110, %c0_111] : memref<25x64x32xf32, #tpu.memory_space<vmem>>, vector<1x64x32xf32>
    %122 = vector.shape_cast %121 : vector<1x64x32xf32> to vector<64x32xf32>
    %cst_112 = arith.constant dense<0.000000e+00> : vector<96x32xf32>
    %123 = tpu.matmul %120, %122, %cst_112 {dimension_numbers = #tpu.dot_dimension_numbers<[1], [0], [0], [1], [0, 0, 1, 1], [], []>} : vector<96x64xf32>, vector<64x32xf32>, vector<96x32xf32> -> vector<96x32xf32>
    %124 = arith.addf %119, %123 : vector<96x32xf32>
    %c50 = arith.constant 50 : index
    %c0_113 = arith.constant 0 : index
    %125 = vector.load %arg10[%c50, %c0_113] : memref<152x64xf32, #tpu.memory_space<vmem>>, vector<96x64xf32>
    %c22 = arith.constant 22 : index
    %c0_114 = arith.constant 0 : index
    %c0_115 = arith.constant 0 : index
    %126 = vector.load %arg3[%c22, %c0_114, %c0_115] : memref<25x64x32xf32, #tpu.memory_space<vmem>>, vector<1x64x32xf32>
    %127 = vector.shape_cast %126 : vector<1x64x32xf32> to vector<64x32xf32>
    %cst_116 = arith.constant dense<0.000000e+00> : vector<96x32xf32>
    %128 = tpu.matmul %125, %127, %cst_116 {dimension_numbers = #tpu.dot_dimension_numbers<[1], [0], [0], [1], [0, 0, 1, 1], [], []>} : vector<96x64xf32>, vector<64x32xf32>, vector<96x32xf32> -> vector<96x32xf32>
    %129 = arith.addf %124, %128 : vector<96x32xf32>
    %c51 = arith.constant 51 : index
    %c0_117 = arith.constant 0 : index
    %130 = vector.load %arg10[%c51, %c0_117] : memref<152x64xf32, #tpu.memory_space<vmem>>, vector<96x64xf32>
    %c23 = arith.constant 23 : index
    %c0_118 = arith.constant 0 : index
    %c0_119 = arith.constant 0 : index
    %131 = vector.load %arg3[%c23, %c0_118, %c0_119] : memref<25x64x32xf32, #tpu.memory_space<vmem>>, vector<1x64x32xf32>
    %132 = vector.shape_cast %131 : vector<1x64x32xf32> to vector<64x32xf32>
    %cst_120 = arith.constant dense<0.000000e+00> : vector<96x32xf32>
    %133 = tpu.matmul %130, %132, %cst_120 {dimension_numbers = #tpu.dot_dimension_numbers<[1], [0], [0], [1], [0, 0, 1, 1], [], []>} : vector<96x64xf32>, vector<64x32xf32>, vector<96x32xf32> -> vector<96x32xf32>
    %134 = arith.addf %129, %133 : vector<96x32xf32>
    %c52 = arith.constant 52 : index
    %c0_121 = arith.constant 0 : index
    %135 = vector.load %arg10[%c52, %c0_121] : memref<152x64xf32, #tpu.memory_space<vmem>>, vector<96x64xf32>
    %c24_122 = arith.constant 24 : index
    %c0_123 = arith.constant 0 : index
    %c0_124 = arith.constant 0 : index
    %136 = vector.load %arg3[%c24_122, %c0_123, %c0_124] : memref<25x64x32xf32, #tpu.memory_space<vmem>>, vector<1x64x32xf32>
    %137 = vector.shape_cast %136 : vector<1x64x32xf32> to vector<64x32xf32>
    %cst_125 = arith.constant dense<0.000000e+00> : vector<96x32xf32>
    %138 = tpu.matmul %135, %137, %cst_125 {dimension_numbers = #tpu.dot_dimension_numbers<[1], [0], [0], [1], [0, 0, 1, 1], [], []>} : vector<96x64xf32>, vector<64x32xf32>, vector<96x32xf32> -> vector<96x32xf32>
    %139 = arith.addf %134, %138 : vector<96x32xf32>
    %c1_126 = arith.constant 1 : index
    %c0_127 = arith.constant 0 : index
    %140 = vector.load %arg7[%c1_126, %c0_127] : memref<6x128xf32, #tpu.memory_space<vmem>>, vector<1x32xf32>
    %141 = vector.broadcast %140 : vector<1x32xf32> to vector<96x32xf32>
    %142 = arith.addf %139, %141 : vector<96x32xf32>
    %c0_128 = arith.constant 0 : index
    %c0_129 = arith.constant 0 : index
    %143 = vector.load %arg11[%c0_128, %c0_129] : memref<96x32xf32, #tpu.memory_space<vmem>>, vector<96x32xf32>
    tpu.vector_store %arg11[%c0_128, %c0_129], %142 {strides = array<i32>} : memref<96x32xf32, #tpu.memory_space<vmem>>, vector<96x32xf32>,
    %cst_130 = arith.constant 0.000000e+00 : f32
    %144 = vector.broadcast %cst_130 : f32 to vector<40x16xf32>
    %c0_131 = arith.constant 0 : index
    %c0_132 = arith.constant 0 : index
    %145 = vector.load %arg11[%c0_131, %c0_132] : memref<96x32xf32, #tpu.memory_space<vmem>>, vector<40x32xf32>
    %c0_133 = arith.constant 0 : index
    %c0_134 = arith.constant 0 : index
    %c0_135 = arith.constant 0 : index
    %146 = vector.load %arg4[%c0_133, %c0_134, %c0_135] : memref<25x32x16xf32, #tpu.memory_space<vmem>>, vector<1x32x16xf32>
    %147 = vector.shape_cast %146 : vector<1x32x16xf32> to vector<32x16xf32>
    %cst_136 = arith.constant dense<0.000000e+00> : vector<40x16xf32>
    %148 = tpu.matmul %145, %147, %cst_136 {dimension_numbers = #tpu.dot_dimension_numbers<[1], [0], [0], [1], [0, 0, 1, 1], [], []>} : vector<40x32xf32>, vector<32x16xf32>, vector<40x16xf32> -> vector<40x16xf32>
    %149 = arith.addf %144, %148 : vector<40x16xf32>
    %c1_137 = arith.constant 1 : index
    %c0_138 = arith.constant 0 : index
    %150 = vector.load %arg11[%c1_137, %c0_138] : memref<96x32xf32, #tpu.memory_space<vmem>>, vector<40x32xf32>
    %c1_139 = arith.constant 1 : index
    %c0_140 = arith.constant 0 : index
    %c0_141 = arith.constant 0 : index
    %151 = vector.load %arg4[%c1_139, %c0_140, %c0_141] : memref<25x32x16xf32, #tpu.memory_space<vmem>>, vector<1x32x16xf32>
    %152 = vector.shape_cast %151 : vector<1x32x16xf32> to vector<32x16xf32>
    %cst_142 = arith.constant dense<0.000000e+00> : vector<40x16xf32>
    %153 = tpu.matmul %150, %152, %cst_142 {dimension_numbers = #tpu.dot_dimension_numbers<[1], [0], [0], [1], [0, 0, 1, 1], [], []>} : vector<40x32xf32>, vector<32x16xf32>, vector<40x16xf32> -> vector<40x16xf32>
    %154 = arith.addf %149, %153 : vector<40x16xf32>
    %c2_143 = arith.constant 2 : index
    %c0_144 = arith.constant 0 : index
    %155 = vector.load %arg11[%c2_143, %c0_144] : memref<96x32xf32, #tpu.memory_space<vmem>>, vector<40x32xf32>
    %c2_145 = arith.constant 2 : index
    %c0_146 = arith.constant 0 : index
    %c0_147 = arith.constant 0 : index
    %156 = vector.load %arg4[%c2_145, %c0_146, %c0_147] : memref<25x32x16xf32, #tpu.memory_space<vmem>>, vector<1x32x16xf32>
    %157 = vector.shape_cast %156 : vector<1x32x16xf32> to vector<32x16xf32>
    %cst_148 = arith.constant dense<0.000000e+00> : vector<40x16xf32>
    %158 = tpu.matmul %155, %157, %cst_148 {dimension_numbers = #tpu.dot_dimension_numbers<[1], [0], [0], [1], [0, 0, 1, 1], [], []>} : vector<40x32xf32>, vector<32x16xf32>, vector<40x16xf32> -> vector<40x16xf32>
    %159 = arith.addf %154, %158 : vector<40x16xf32>
    %c3_149 = arith.constant 3 : index
    %c0_150 = arith.constant 0 : index
    %160 = vector.load %arg11[%c3_149, %c0_150] : memref<96x32xf32, #tpu.memory_space<vmem>>, vector<40x32xf32>
    %c3_151 = arith.constant 3 : index
    %c0_152 = arith.constant 0 : index
    %c0_153 = arith.constant 0 : index
    %161 = vector.load %arg4[%c3_151, %c0_152, %c0_153] : memref<25x32x16xf32, #tpu.memory_space<vmem>>, vector<1x32x16xf32>
    %162 = vector.shape_cast %161 : vector<1x32x16xf32> to vector<32x16xf32>
    %cst_154 = arith.constant dense<0.000000e+00> : vector<40x16xf32>
    %163 = tpu.matmul %160, %162, %cst_154 {dimension_numbers = #tpu.dot_dimension_numbers<[1], [0], [0], [1], [0, 0, 1, 1], [], []>} : vector<40x32xf32>, vector<32x16xf32>, vector<40x16xf32> -> vector<40x16xf32>
    %164 = arith.addf %159, %163 : vector<40x16xf32>
    %c4_155 = arith.constant 4 : index
    %c0_156 = arith.constant 0 : index
    %165 = vector.load %arg11[%c4_155, %c0_156] : memref<96x32xf32, #tpu.memory_space<vmem>>, vector<40x32xf32>
    %c4_157 = arith.constant 4 : index
    %c0_158 = arith.constant 0 : index
    %c0_159 = arith.constant 0 : index
    %166 = vector.load %arg4[%c4_157, %c0_158, %c0_159] : memref<25x32x16xf32, #tpu.memory_space<vmem>>, vector<1x32x16xf32>
    %167 = vector.shape_cast %166 : vector<1x32x16xf32> to vector<32x16xf32>
    %cst_160 = arith.constant dense<0.000000e+00> : vector<40x16xf32>
    %168 = tpu.matmul %165, %167, %cst_160 {dimension_numbers = #tpu.dot_dimension_numbers<[1], [0], [0], [1], [0, 0, 1, 1], [], []>} : vector<40x32xf32>, vector<32x16xf32>, vector<40x16xf32> -> vector<40x16xf32>
    %169 = arith.addf %164, %168 : vector<40x16xf32>
    %c12_161 = arith.constant 12 : index
    %c0_162 = arith.constant 0 : index
    %170 = vector.load %arg11[%c12_161, %c0_162] : memref<96x32xf32, #tpu.memory_space<vmem>>, vector<40x32xf32>
    %c5_163 = arith.constant 5 : index
    %c0_164 = arith.constant 0 : index
    %c0_165 = arith.constant 0 : index
    %171 = vector.load %arg4[%c5_163, %c0_164, %c0_165] : memref<25x32x16xf32, #tpu.memory_space<vmem>>, vector<1x32x16xf32>
    %172 = vector.shape_cast %171 : vector<1x32x16xf32> to vector<32x16xf32>
    %cst_166 = arith.constant dense<0.000000e+00> : vector<40x16xf32>
    %173 = tpu.matmul %170, %172, %cst_166 {dimension_numbers = #tpu.dot_dimension_numbers<[1], [0], [0], [1], [0, 0, 1, 1], [], []>} : vector<40x32xf32>, vector<32x16xf32>, vector<40x16xf32> -> vector<40x16xf32>
    %174 = arith.addf %169, %173 : vector<40x16xf32>
    %c13_167 = arith.constant 13 : index
    %c0_168 = arith.constant 0 : index
    %175 = vector.load %arg11[%c13_167, %c0_168] : memref<96x32xf32, #tpu.memory_space<vmem>>, vector<40x32xf32>
    %c6_169 = arith.constant 6 : index
    %c0_170 = arith.constant 0 : index
    %c0_171 = arith.constant 0 : index
    %176 = vector.load %arg4[%c6_169, %c0_170, %c0_171] : memref<25x32x16xf32, #tpu.memory_space<vmem>>, vector<1x32x16xf32>
    %177 = vector.shape_cast %176 : vector<1x32x16xf32> to vector<32x16xf32>
    %cst_172 = arith.constant dense<0.000000e+00> : vector<40x16xf32>
    %178 = tpu.matmul %175, %177, %cst_172 {dimension_numbers = #tpu.dot_dimension_numbers<[1], [0], [0], [1], [0, 0, 1, 1], [], []>} : vector<40x32xf32>, vector<32x16xf32>, vector<40x16xf32> -> vector<40x16xf32>
    %179 = arith.addf %174, %178 : vector<40x16xf32>
    %c14_173 = arith.constant 14 : index
    %c0_174 = arith.constant 0 : index
    %180 = vector.load %arg11[%c14_173, %c0_174] : memref<96x32xf32, #tpu.memory_space<vmem>>, vector<40x32xf32>
    %c7_175 = arith.constant 7 : index
    %c0_176 = arith.constant 0 : index
    %c0_177 = arith.constant 0 : index
    %181 = vector.load %arg4[%c7_175, %c0_176, %c0_177] : memref<25x32x16xf32, #tpu.memory_space<vmem>>, vector<1x32x16xf32>
    %182 = vector.shape_cast %181 : vector<1x32x16xf32> to vector<32x16xf32>
    %cst_178 = arith.constant dense<0.000000e+00> : vector<40x16xf32>
    %183 = tpu.matmul %180, %182, %cst_178 {dimension_numbers = #tpu.dot_dimension_numbers<[1], [0], [0], [1], [0, 0, 1, 1], [], []>} : vector<40x32xf32>, vector<32x16xf32>, vector<40x16xf32> -> vector<40x16xf32>
    %184 = arith.addf %179, %183 : vector<40x16xf32>
    %c15_179 = arith.constant 15 : index
    %c0_180 = arith.constant 0 : index
    %185 = vector.load %arg11[%c15_179, %c0_180] : memref<96x32xf32, #tpu.memory_space<vmem>>, vector<40x32xf32>
    %c8_181 = arith.constant 8 : index
    %c0_182 = arith.constant 0 : index
    %c0_183 = arith.constant 0 : index
    %186 = vector.load %arg4[%c8_181, %c0_182, %c0_183] : memref<25x32x16xf32, #tpu.memory_space<vmem>>, vector<1x32x16xf32>
    %187 = vector.shape_cast %186 : vector<1x32x16xf32> to vector<32x16xf32>
    %cst_184 = arith.constant dense<0.000000e+00> : vector<40x16xf32>
    %188 = tpu.matmul %185, %187, %cst_184 {dimension_numbers = #tpu.dot_dimension_numbers<[1], [0], [0], [1], [0, 0, 1, 1], [], []>} : vector<40x32xf32>, vector<32x16xf32>, vector<40x16xf32> -> vector<40x16xf32>
    %189 = arith.addf %184, %188 : vector<40x16xf32>
    %c16_185 = arith.constant 16 : index
    %c0_186 = arith.constant 0 : index
    %190 = vector.load %arg11[%c16_185, %c0_186] : memref<96x32xf32, #tpu.memory_space<vmem>>, vector<40x32xf32>
    %c9_187 = arith.constant 9 : index
    %c0_188 = arith.constant 0 : index
    %c0_189 = arith.constant 0 : index
    %191 = vector.load %arg4[%c9_187, %c0_188, %c0_189] : memref<25x32x16xf32, #tpu.memory_space<vmem>>, vector<1x32x16xf32>
    %192 = vector.shape_cast %191 : vector<1x32x16xf32> to vector<32x16xf32>
    %cst_190 = arith.constant dense<0.000000e+00> : vector<40x16xf32>
    %193 = tpu.matmul %190, %192, %cst_190 {dimension_numbers = #tpu.dot_dimension_numbers<[1], [0], [0], [1], [0, 0, 1, 1], [], []>} : vector<40x32xf32>, vector<32x16xf32>, vector<40x16xf32> -> vector<40x16xf32>
    %194 = arith.addf %189, %193 : vector<40x16xf32>
    %c24_191 = arith.constant 24 : index
    %c0_192 = arith.constant 0 : index
    %195 = vector.load %arg11[%c24_191, %c0_192] : memref<96x32xf32, #tpu.memory_space<vmem>>, vector<40x32xf32>
    %c10_193 = arith.constant 10 : index
    %c0_194 = arith.constant 0 : index
    %c0_195 = arith.constant 0 : index
    %196 = vector.load %arg4[%c10_193, %c0_194, %c0_195] : memref<25x32x16xf32, #tpu.memory_space<vmem>>, vector<1x32x16xf32>
    %197 = vector.shape_cast %196 : vector<1x32x16xf32> to vector<32x16xf32>
    %cst_196 = arith.constant dense<0.000000e+00> : vector<40x16xf32>
    %198 = tpu.matmul %195, %197, %cst_196 {dimension_numbers = #tpu.dot_dimension_numbers<[1], [0], [0], [1], [0, 0, 1, 1], [], []>} : vector<40x32xf32>, vector<32x16xf32>, vector<40x16xf32> -> vector<40x16xf32>
    %199 = arith.addf %194, %198 : vector<40x16xf32>
    %c25_197 = arith.constant 25 : index
    %c0_198 = arith.constant 0 : index
    %200 = vector.load %arg11[%c25_197, %c0_198] : memref<96x32xf32, #tpu.memory_space<vmem>>, vector<40x32xf32>
    %c11_199 = arith.constant 11 : index
    %c0_200 = arith.constant 0 : index
    %c0_201 = arith.constant 0 : index
    %201 = vector.load %arg4[%c11_199, %c0_200, %c0_201] : memref<25x32x16xf32, #tpu.memory_space<vmem>>, vector<1x32x16xf32>
    %202 = vector.shape_cast %201 : vector<1x32x16xf32> to vector<32x16xf32>
    %cst_202 = arith.constant dense<0.000000e+00> : vector<40x16xf32>
    %203 = tpu.matmul %200, %202, %cst_202 {dimension_numbers = #tpu.dot_dimension_numbers<[1], [0], [0], [1], [0, 0, 1, 1], [], []>} : vector<40x32xf32>, vector<32x16xf32>, vector<40x16xf32> -> vector<40x16xf32>
    %204 = arith.addf %199, %203 : vector<40x16xf32>
    %c26_203 = arith.constant 26 : index
    %c0_204 = arith.constant 0 : index
    %205 = vector.load %arg11[%c26_203, %c0_204] : memref<96x32xf32, #tpu.memory_space<vmem>>, vector<40x32xf32>
    %c12_205 = arith.constant 12 : index
    %c0_206 = arith.constant 0 : index
    %c0_207 = arith.constant 0 : index
    %206 = vector.load %arg4[%c12_205, %c0_206, %c0_207] : memref<25x32x16xf32, #tpu.memory_space<vmem>>, vector<1x32x16xf32>
    %207 = vector.shape_cast %206 : vector<1x32x16xf32> to vector<32x16xf32>
    %cst_208 = arith.constant dense<0.000000e+00> : vector<40x16xf32>
    %208 = tpu.matmul %205, %207, %cst_208 {dimension_numbers = #tpu.dot_dimension_numbers<[1], [0], [0], [1], [0, 0, 1, 1], [], []>} : vector<40x32xf32>, vector<32x16xf32>, vector<40x16xf32> -> vector<40x16xf32>
    %209 = arith.addf %204, %208 : vector<40x16xf32>
    %c27_209 = arith.constant 27 : index
    %c0_210 = arith.constant 0 : index
    %210 = vector.load %arg11[%c27_209, %c0_210] : memref<96x32xf32, #tpu.memory_space<vmem>>, vector<40x32xf32>
    %c13_211 = arith.constant 13 : index
    %c0_212 = arith.constant 0 : index
    %c0_213 = arith.constant 0 : index
    %211 = vector.load %arg4[%c13_211, %c0_212, %c0_213] : memref<25x32x16xf32, #tpu.memory_space<vmem>>, vector<1x32x16xf32>
    %212 = vector.shape_cast %211 : vector<1x32x16xf32> to vector<32x16xf32>
    %cst_214 = arith.constant dense<0.000000e+00> : vector<40x16xf32>
    %213 = tpu.matmul %210, %212, %cst_214 {dimension_numbers = #tpu.dot_dimension_numbers<[1], [0], [0], [1], [0, 0, 1, 1], [], []>} : vector<40x32xf32>, vector<32x16xf32>, vector<40x16xf32> -> vector<40x16xf32>
    %214 = arith.addf %209, %213 : vector<40x16xf32>
    %c28_215 = arith.constant 28 : index
    %c0_216 = arith.constant 0 : index
    %215 = vector.load %arg11[%c28_215, %c0_216] : memref<96x32xf32, #tpu.memory_space<vmem>>, vector<40x32xf32>
    %c14_217 = arith.constant 14 : index
    %c0_218 = arith.constant 0 : index
    %c0_219 = arith.constant 0 : index
    %216 = vector.load %arg4[%c14_217, %c0_218, %c0_219] : memref<25x32x16xf32, #tpu.memory_space<vmem>>, vector<1x32x16xf32>
    %217 = vector.shape_cast %216 : vector<1x32x16xf32> to vector<32x16xf32>
    %cst_220 = arith.constant dense<0.000000e+00> : vector<40x16xf32>
    %218 = tpu.matmul %215, %217, %cst_220 {dimension_numbers = #tpu.dot_dimension_numbers<[1], [0], [0], [1], [0, 0, 1, 1], [], []>} : vector<40x32xf32>, vector<32x16xf32>, vector<40x16xf32> -> vector<40x16xf32>
    %219 = arith.addf %214, %218 : vector<40x16xf32>
    %c36_221 = arith.constant 36 : index
    %c0_222 = arith.constant 0 : index
    %220 = vector.load %arg11[%c36_221, %c0_222] : memref<96x32xf32, #tpu.memory_space<vmem>>, vector<40x32xf32>
    %c15_223 = arith.constant 15 : index
    %c0_224 = arith.constant 0 : index
    %c0_225 = arith.constant 0 : index
    %221 = vector.load %arg4[%c15_223, %c0_224, %c0_225] : memref<25x32x16xf32, #tpu.memory_space<vmem>>, vector<1x32x16xf32>
    %222 = vector.shape_cast %221 : vector<1x32x16xf32> to vector<32x16xf32>
    %cst_226 = arith.constant dense<0.000000e+00> : vector<40x16xf32>
    %223 = tpu.matmul %220, %222, %cst_226 {dimension_numbers = #tpu.dot_dimension_numbers<[1], [0], [0], [1], [0, 0, 1, 1], [], []>} : vector<40x32xf32>, vector<32x16xf32>, vector<40x16xf32> -> vector<40x16xf32>
    %224 = arith.addf %219, %223 : vector<40x16xf32>
    %c37_227 = arith.constant 37 : index
    %c0_228 = arith.constant 0 : index
    %225 = vector.load %arg11[%c37_227, %c0_228] : memref<96x32xf32, #tpu.memory_space<vmem>>, vector<40x32xf32>
    %c16_229 = arith.constant 16 : index
    %c0_230 = arith.constant 0 : index
    %c0_231 = arith.constant 0 : index
    %226 = vector.load %arg4[%c16_229, %c0_230, %c0_231] : memref<25x32x16xf32, #tpu.memory_space<vmem>>, vector<1x32x16xf32>
    %227 = vector.shape_cast %226 : vector<1x32x16xf32> to vector<32x16xf32>
    %cst_232 = arith.constant dense<0.000000e+00> : vector<40x16xf32>
    %228 = tpu.matmul %225, %227, %cst_232 {dimension_numbers = #tpu.dot_dimension_numbers<[1], [0], [0], [1], [0, 0, 1, 1], [], []>} : vector<40x32xf32>, vector<32x16xf32>, vector<40x16xf32> -> vector<40x16xf32>
    %229 = arith.addf %224, %228 : vector<40x16xf32>
    %c38_233 = arith.constant 38 : index
    %c0_234 = arith.constant 0 : index
    %230 = vector.load %arg11[%c38_233, %c0_234] : memref<96x32xf32, #tpu.memory_space<vmem>>, vector<40x32xf32>
    %c17_235 = arith.constant 17 : index
    %c0_236 = arith.constant 0 : index
    %c0_237 = arith.constant 0 : index
    %231 = vector.load %arg4[%c17_235, %c0_236, %c0_237] : memref<25x32x16xf32, #tpu.memory_space<vmem>>, vector<1x32x16xf32>
    %232 = vector.shape_cast %231 : vector<1x32x16xf32> to vector<32x16xf32>
    %cst_238 = arith.constant dense<0.000000e+00> : vector<40x16xf32>
    %233 = tpu.matmul %230, %232, %cst_238 {dimension_numbers = #tpu.dot_dimension_numbers<[1], [0], [0], [1], [0, 0, 1, 1], [], []>} : vector<40x32xf32>, vector<32x16xf32>, vector<40x16xf32> -> vector<40x16xf32>
    %234 = arith.addf %229, %233 : vector<40x16xf32>
    %c39_239 = arith.constant 39 : index
    %c0_240 = arith.constant 0 : index
    %235 = vector.load %arg11[%c39_239, %c0_240] : memref<96x32xf32, #tpu.memory_space<vmem>>, vector<40x32xf32>
    %c18_241 = arith.constant 18 : index
    %c0_242 = arith.constant 0 : index
    %c0_243 = arith.constant 0 : index
    %236 = vector.load %arg4[%c18_241, %c0_242, %c0_243] : memref<25x32x16xf32, #tpu.memory_space<vmem>>, vector<1x32x16xf32>
    %237 = vector.shape_cast %236 : vector<1x32x16xf32> to vector<32x16xf32>
    %cst_244 = arith.constant dense<0.000000e+00> : vector<40x16xf32>
    %238 = tpu.matmul %235, %237, %cst_244 {dimension_numbers = #tpu.dot_dimension_numbers<[1], [0], [0], [1], [0, 0, 1, 1], [], []>} : vector<40x32xf32>, vector<32x16xf32>, vector<40x16xf32> -> vector<40x16xf32>
    %239 = arith.addf %234, %238 : vector<40x16xf32>
    %c40_245 = arith.constant 40 : index
    %c0_246 = arith.constant 0 : index
    %240 = vector.load %arg11[%c40_245, %c0_246] : memref<96x32xf32, #tpu.memory_space<vmem>>, vector<40x32xf32>
    %c19_247 = arith.constant 19 : index
    %c0_248 = arith.constant 0 : index
    %c0_249 = arith.constant 0 : index
    %241 = vector.load %arg4[%c19_247, %c0_248, %c0_249] : memref<25x32x16xf32, #tpu.memory_space<vmem>>, vector<1x32x16xf32>
    %242 = vector.shape_cast %241 : vector<1x32x16xf32> to vector<32x16xf32>
    %cst_250 = arith.constant dense<0.000000e+00> : vector<40x16xf32>
    %243 = tpu.matmul %240, %242, %cst_250 {dimension_numbers = #tpu.dot_dimension_numbers<[1], [0], [0], [1], [0, 0, 1, 1], [], []>} : vector<40x32xf32>, vector<32x16xf32>, vector<40x16xf32> -> vector<40x16xf32>
    %244 = arith.addf %239, %243 : vector<40x16xf32>
    %c48_251 = arith.constant 48 : index
    %c0_252 = arith.constant 0 : index
    %245 = vector.load %arg11[%c48_251, %c0_252] : memref<96x32xf32, #tpu.memory_space<vmem>>, vector<40x32xf32>
    %c20_253 = arith.constant 20 : index
    %c0_254 = arith.constant 0 : index
    %c0_255 = arith.constant 0 : index
    %246 = vector.load %arg4[%c20_253, %c0_254, %c0_255] : memref<25x32x16xf32, #tpu.memory_space<vmem>>, vector<1x32x16xf32>
    %247 = vector.shape_cast %246 : vector<1x32x16xf32> to vector<32x16xf32>
    %cst_256 = arith.constant dense<0.000000e+00> : vector<40x16xf32>
    %248 = tpu.matmul %245, %247, %cst_256 {dimension_numbers = #tpu.dot_dimension_numbers<[1], [0], [0], [1], [0, 0, 1, 1], [], []>} : vector<40x32xf32>, vector<32x16xf32>, vector<40x16xf32> -> vector<40x16xf32>
    %249 = arith.addf %244, %248 : vector<40x16xf32>
    %c49_257 = arith.constant 49 : index
    %c0_258 = arith.constant 0 : index
    %250 = vector.load %arg11[%c49_257, %c0_258] : memref<96x32xf32, #tpu.memory_space<vmem>>, vector<40x32xf32>
    %c21_259 = arith.constant 21 : index
    %c0_260 = arith.constant 0 : index
    %c0_261 = arith.constant 0 : index
    %251 = vector.load %arg4[%c21_259, %c0_260, %c0_261] : memref<25x32x16xf32, #tpu.memory_space<vmem>>, vector<1x32x16xf32>
    %252 = vector.shape_cast %251 : vector<1x32x16xf32> to vector<32x16xf32>
    %cst_262 = arith.constant dense<0.000000e+00> : vector<40x16xf32>
    %253 = tpu.matmul %250, %252, %cst_262 {dimension_numbers = #tpu.dot_dimension_numbers<[1], [0], [0], [1], [0, 0, 1, 1], [], []>} : vector<40x32xf32>, vector<32x16xf32>, vector<40x16xf32> -> vector<40x16xf32>
    %254 = arith.addf %249, %253 : vector<40x16xf32>
    %c50_263 = arith.constant 50 : index
    %c0_264 = arith.constant 0 : index
    %255 = vector.load %arg11[%c50_263, %c0_264] : memref<96x32xf32, #tpu.memory_space<vmem>>, vector<40x32xf32>
    %c22_265 = arith.constant 22 : index
    %c0_266 = arith.constant 0 : index
    %c0_267 = arith.constant 0 : index
    %256 = vector.load %arg4[%c22_265, %c0_266, %c0_267] : memref<25x32x16xf32, #tpu.memory_space<vmem>>, vector<1x32x16xf32>
    %257 = vector.shape_cast %256 : vector<1x32x16xf32> to vector<32x16xf32>
    %cst_268 = arith.constant dense<0.000000e+00> : vector<40x16xf32>
    %258 = tpu.matmul %255, %257, %cst_268 {dimension_numbers = #tpu.dot_dimension_numbers<[1], [0], [0], [1], [0, 0, 1, 1], [], []>} : vector<40x32xf32>, vector<32x16xf32>, vector<40x16xf32> -> vector<40x16xf32>
    %259 = arith.addf %254, %258 : vector<40x16xf32>
    %c51_269 = arith.constant 51 : index
    %c0_270 = arith.constant 0 : index
    %260 = vector.load %arg11[%c51_269, %c0_270] : memref<96x32xf32, #tpu.memory_space<vmem>>, vector<40x32xf32>
    %c23_271 = arith.constant 23 : index
    %c0_272 = arith.constant 0 : index
    %c0_273 = arith.constant 0 : index
    %261 = vector.load %arg4[%c23_271, %c0_272, %c0_273] : memref<25x32x16xf32, #tpu.memory_space<vmem>>, vector<1x32x16xf32>
    %262 = vector.shape_cast %261 : vector<1x32x16xf32> to vector<32x16xf32>
    %cst_274 = arith.constant dense<0.000000e+00> : vector<40x16xf32>
    %263 = tpu.matmul %260, %262, %cst_274 {dimension_numbers = #tpu.dot_dimension_numbers<[1], [0], [0], [1], [0, 0, 1, 1], [], []>} : vector<40x32xf32>, vector<32x16xf32>, vector<40x16xf32> -> vector<40x16xf32>
    %264 = arith.addf %259, %263 : vector<40x16xf32>
    %c52_275 = arith.constant 52 : index
    %c0_276 = arith.constant 0 : index
    %265 = vector.load %arg11[%c52_275, %c0_276] : memref<96x32xf32, #tpu.memory_space<vmem>>, vector<40x32xf32>
    %c24_277 = arith.constant 24 : index
    %c0_278 = arith.constant 0 : index
    %c0_279 = arith.constant 0 : index
    %266 = vector.load %arg4[%c24_277, %c0_278, %c0_279] : memref<25x32x16xf32, #tpu.memory_space<vmem>>, vector<1x32x16xf32>
    %267 = vector.shape_cast %266 : vector<1x32x16xf32> to vector<32x16xf32>
    %cst_280 = arith.constant dense<0.000000e+00> : vector<40x16xf32>
    %268 = tpu.matmul %265, %267, %cst_280 {dimension_numbers = #tpu.dot_dimension_numbers<[1], [0], [0], [1], [0, 0, 1, 1], [], []>} : vector<40x32xf32>, vector<32x16xf32>, vector<40x16xf32> -> vector<40x16xf32>
    %269 = arith.addf %264, %268 : vector<40x16xf32>
    %c2_281 = arith.constant 2 : index
    %c0_282 = arith.constant 0 : index
    %270 = vector.load %arg7[%c2_281, %c0_282] : memref<6x128xf32, #tpu.memory_space<vmem>>, vector<1x16xf32>
    %271 = vector.broadcast %270 : vector<1x16xf32> to vector<40x16xf32>
    %272 = arith.addf %269, %271 : vector<40x16xf32>
    %c0_283 = arith.constant 0 : index
    %c0_284 = arith.constant 0 : index
    %273 = vector.load %arg12[%c0_283, %c0_284] : memref<40x16xf32, #tpu.memory_space<vmem>>, vector<40x16xf32>
    tpu.vector_store %arg12[%c0_283, %c0_284], %272 {strides = array<i32>} : memref<40x16xf32, #tpu.memory_space<vmem>>, vector<40x16xf32>,
    %cst_285 = arith.constant 0.000000e+00 : f32
    %274 = vector.broadcast %cst_285 : f32 to vector<1x128xf32>
    %c0_286 = arith.constant 0 : index
    %c0_287 = arith.constant 0 : index
    %275 = vector.load %arg12[%c0_286, %c0_287] : memref<40x16xf32, #tpu.memory_space<vmem>>, vector<1x16xf32>
    %c0_288 = arith.constant 0 : index
    %c0_289 = arith.constant 0 : index
    %c0_290 = arith.constant 0 : index
    %276 = vector.load %arg5[%c0_288, %c0_289, %c0_290] : memref<16x16x128xf32, #tpu.memory_space<vmem>>, vector<1x16x128xf32>
    %277 = vector.shape_cast %276 : vector<1x16x128xf32> to vector<16x128xf32>
    %cst_291 = arith.constant dense<0.000000e+00> : vector<1x128xf32>
    %278 = tpu.matmul %275, %277, %cst_291 {dimension_numbers = #tpu.dot_dimension_numbers<[1], [0], [0], [1], [0, 0, 1, 1], [], []>} : vector<1x16xf32>, vector<16x128xf32>, vector<1x128xf32> -> vector<1x128xf32>
    %279 = arith.addf %274, %278 : vector<1x128xf32>
    %c1_292 = arith.constant 1 : index
    %c0_293 = arith.constant 0 : index
    %280 = vector.load %arg12[%c1_292, %c0_293] : memref<40x16xf32, #tpu.memory_space<vmem>>, vector<1x16xf32>
    %c1_294 = arith.constant 1 : index
    %c0_295 = arith.constant 0 : index
    %c0_296 = arith.constant 0 : index
    %281 = vector.load %arg5[%c1_294, %c0_295, %c0_296] : memref<16x16x128xf32, #tpu.memory_space<vmem>>, vector<1x16x128xf32>
    %282 = vector.shape_cast %281 : vector<1x16x128xf32> to vector<16x128xf32>
    %cst_297 = arith.constant dense<0.000000e+00> : vector<1x128xf32>
    %283 = tpu.matmul %280, %282, %cst_297 {dimension_numbers = #tpu.dot_dimension_numbers<[1], [0], [0], [1], [0, 0, 1, 1], [], []>} : vector<1x16xf32>, vector<16x128xf32>, vector<1x128xf32> -> vector<1x128xf32>
    %284 = arith.addf %279, %283 : vector<1x128xf32>
    %c2_298 = arith.constant 2 : index
    %c0_299 = arith.constant 0 : index
    %285 = vector.load %arg12[%c2_298, %c0_299] : memref<40x16xf32, #tpu.memory_space<vmem>>, vector<1x16xf32>
    %c2_300 = arith.constant 2 : index
    %c0_301 = arith.constant 0 : index
    %c0_302 = arith.constant 0 : index
    %286 = vector.load %arg5[%c2_300, %c0_301, %c0_302] : memref<16x16x128xf32, #tpu.memory_space<vmem>>, vector<1x16x128xf32>
    %287 = vector.shape_cast %286 : vector<1x16x128xf32> to vector<16x128xf32>
    %cst_303 = arith.constant dense<0.000000e+00> : vector<1x128xf32>
    %288 = tpu.matmul %285, %287, %cst_303 {dimension_numbers = #tpu.dot_dimension_numbers<[1], [0], [0], [1], [0, 0, 1, 1], [], []>} : vector<1x16xf32>, vector<16x128xf32>, vector<1x128xf32> -> vector<1x128xf32>
    %289 = arith.addf %284, %288 : vector<1x128xf32>
    %c3_304 = arith.constant 3 : index
    %c0_305 = arith.constant 0 : index
    %290 = vector.load %arg12[%c3_304, %c0_305] : memref<40x16xf32, #tpu.memory_space<vmem>>, vector<1x16xf32>
    %c3_306 = arith.constant 3 : index
    %c0_307 = arith.constant 0 : index
    %c0_308 = arith.constant 0 : index
    %291 = vector.load %arg5[%c3_306, %c0_307, %c0_308] : memref<16x16x128xf32, #tpu.memory_space<vmem>>, vector<1x16x128xf32>
    %292 = vector.shape_cast %291 : vector<1x16x128xf32> to vector<16x128xf32>
    %cst_309 = arith.constant dense<0.000000e+00> : vector<1x128xf32>
    %293 = tpu.matmul %290, %292, %cst_309 {dimension_numbers = #tpu.dot_dimension_numbers<[1], [0], [0], [1], [0, 0, 1, 1], [], []>} : vector<1x16xf32>, vector<16x128xf32>, vector<1x128xf32> -> vector<1x128xf32>
    %294 = arith.addf %289, %293 : vector<1x128xf32>
    %c12_310 = arith.constant 12 : index
    %c0_311 = arith.constant 0 : index
    %295 = vector.load %arg12[%c12_310, %c0_311] : memref<40x16xf32, #tpu.memory_space<vmem>>, vector<1x16xf32>
    %c4_312 = arith.constant 4 : index
    %c0_313 = arith.constant 0 : index
    %c0_314 = arith.constant 0 : index
    %296 = vector.load %arg5[%c4_312, %c0_313, %c0_314] : memref<16x16x128xf32, #tpu.memory_space<vmem>>, vector<1x16x128xf32>
    %297 = vector.shape_cast %296 : vector<1x16x128xf32> to vector<16x128xf32>
    %cst_315 = arith.constant dense<0.000000e+00> : vector<1x128xf32>
    %298 = tpu.matmul %295, %297, %cst_315 {dimension_numbers = #tpu.dot_dimension_numbers<[1], [0], [0], [1], [0, 0, 1, 1], [], []>} : vector<1x16xf32>, vector<16x128xf32>, vector<1x128xf32> -> vector<1x128xf32>
    %299 = arith.addf %294, %298 : vector<1x128xf32>
    %c13_316 = arith.constant 13 : index
    %c0_317 = arith.constant 0 : index
    %300 = vector.load %arg12[%c13_316, %c0_317] : memref<40x16xf32, #tpu.memory_space<vmem>>, vector<1x16xf32>
    %c5_318 = arith.constant 5 : index
    %c0_319 = arith.constant 0 : index
    %c0_320 = arith.constant 0 : index
    %301 = vector.load %arg5[%c5_318, %c0_319, %c0_320] : memref<16x16x128xf32, #tpu.memory_space<vmem>>, vector<1x16x128xf32>
    %302 = vector.shape_cast %301 : vector<1x16x128xf32> to vector<16x128xf32>
    %cst_321 = arith.constant dense<0.000000e+00> : vector<1x128xf32>
    %303 = tpu.matmul %300, %302, %cst_321 {dimension_numbers = #tpu.dot_dimension_numbers<[1], [0], [0], [1], [0, 0, 1, 1], [], []>} : vector<1x16xf32>, vector<16x128xf32>, vector<1x128xf32> -> vector<1x128xf32>
    %304 = arith.addf %299, %303 : vector<1x128xf32>
    %c14_322 = arith.constant 14 : index
    %c0_323 = arith.constant 0 : index
    %305 = vector.load %arg12[%c14_322, %c0_323] : memref<40x16xf32, #tpu.memory_space<vmem>>, vector<1x16xf32>
    %c6_324 = arith.constant 6 : index
    %c0_325 = arith.constant 0 : index
    %c0_326 = arith.constant 0 : index
    %306 = vector.load %arg5[%c6_324, %c0_325, %c0_326] : memref<16x16x128xf32, #tpu.memory_space<vmem>>, vector<1x16x128xf32>
    %307 = vector.shape_cast %306 : vector<1x16x128xf32> to vector<16x128xf32>
    %cst_327 = arith.constant dense<0.000000e+00> : vector<1x128xf32>
    %308 = tpu.matmul %305, %307, %cst_327 {dimension_numbers = #tpu.dot_dimension_numbers<[1], [0], [0], [1], [0, 0, 1, 1], [], []>} : vector<1x16xf32>, vector<16x128xf32>, vector<1x128xf32> -> vector<1x128xf32>
    %309 = arith.addf %304, %308 : vector<1x128xf32>
    %c15_328 = arith.constant 15 : index
    %c0_329 = arith.constant 0 : index
    %310 = vector.load %arg12[%c15_328, %c0_329] : memref<40x16xf32, #tpu.memory_space<vmem>>, vector<1x16xf32>
    %c7_330 = arith.constant 7 : index
    %c0_331 = arith.constant 0 : index
    %c0_332 = arith.constant 0 : index
    %311 = vector.load %arg5[%c7_330, %c0_331, %c0_332] : memref<16x16x128xf32, #tpu.memory_space<vmem>>, vector<1x16x128xf32>
    %312 = vector.shape_cast %311 : vector<1x16x128xf32> to vector<16x128xf32>
    %cst_333 = arith.constant dense<0.000000e+00> : vector<1x128xf32>
    %313 = tpu.matmul %310, %312, %cst_333 {dimension_numbers = #tpu.dot_dimension_numbers<[1], [0], [0], [1], [0, 0, 1, 1], [], []>} : vector<1x16xf32>, vector<16x128xf32>, vector<1x128xf32> -> vector<1x128xf32>
    %314 = arith.addf %309, %313 : vector<1x128xf32>
    %c24_334 = arith.constant 24 : index
    %c0_335 = arith.constant 0 : index
    %315 = vector.load %arg12[%c24_334, %c0_335] : memref<40x16xf32, #tpu.memory_space<vmem>>, vector<1x16xf32>
    %c8_336 = arith.constant 8 : index
    %c0_337 = arith.constant 0 : index
    %c0_338 = arith.constant 0 : index
    %316 = vector.load %arg5[%c8_336, %c0_337, %c0_338] : memref<16x16x128xf32, #tpu.memory_space<vmem>>, vector<1x16x128xf32>
    %317 = vector.shape_cast %316 : vector<1x16x128xf32> to vector<16x128xf32>
    %cst_339 = arith.constant dense<0.000000e+00> : vector<1x128xf32>
    %318 = tpu.matmul %315, %317, %cst_339 {dimension_numbers = #tpu.dot_dimension_numbers<[1], [0], [0], [1], [0, 0, 1, 1], [], []>} : vector<1x16xf32>, vector<16x128xf32>, vector<1x128xf32> -> vector<1x128xf32>
    %319 = arith.addf %314, %318 : vector<1x128xf32>
    %c25_340 = arith.constant 25 : index
    %c0_341 = arith.constant 0 : index
    %320 = vector.load %arg12[%c25_340, %c0_341] : memref<40x16xf32, #tpu.memory_space<vmem>>, vector<1x16xf32>
    %c9_342 = arith.constant 9 : index
    %c0_343 = arith.constant 0 : index
    %c0_344 = arith.constant 0 : index
    %321 = vector.load %arg5[%c9_342, %c0_343, %c0_344] : memref<16x16x128xf32, #tpu.memory_space<vmem>>, vector<1x16x128xf32>
    %322 = vector.shape_cast %321 : vector<1x16x128xf32> to vector<16x128xf32>
    %cst_345 = arith.constant dense<0.000000e+00> : vector<1x128xf32>
    %323 = tpu.matmul %320, %322, %cst_345 {dimension_numbers = #tpu.dot_dimension_numbers<[1], [0], [0], [1], [0, 0, 1, 1], [], []>} : vector<1x16xf32>, vector<16x128xf32>, vector<1x128xf32> -> vector<1x128xf32>
    %324 = arith.addf %319, %323 : vector<1x128xf32>
    %c26_346 = arith.constant 26 : index
    %c0_347 = arith.constant 0 : index
    %325 = vector.load %arg12[%c26_346, %c0_347] : memref<40x16xf32, #tpu.memory_space<vmem>>, vector<1x16xf32>
    %c10_348 = arith.constant 10 : index
    %c0_349 = arith.constant 0 : index
    %c0_350 = arith.constant 0 : index
    %326 = vector.load %arg5[%c10_348, %c0_349, %c0_350] : memref<16x16x128xf32, #tpu.memory_space<vmem>>, vector<1x16x128xf32>
    %327 = vector.shape_cast %326 : vector<1x16x128xf32> to vector<16x128xf32>
    %cst_351 = arith.constant dense<0.000000e+00> : vector<1x128xf32>
    %328 = tpu.matmul %325, %327, %cst_351 {dimension_numbers = #tpu.dot_dimension_numbers<[1], [0], [0], [1], [0, 0, 1, 1], [], []>} : vector<1x16xf32>, vector<16x128xf32>, vector<1x128xf32> -> vector<1x128xf32>
    %329 = arith.addf %324, %328 : vector<1x128xf32>
    %c27_352 = arith.constant 27 : index
    %c0_353 = arith.constant 0 : index
    %330 = vector.load %arg12[%c27_352, %c0_353] : memref<40x16xf32, #tpu.memory_space<vmem>>, vector<1x16xf32>
    %c11_354 = arith.constant 11 : index
    %c0_355 = arith.constant 0 : index
    %c0_356 = arith.constant 0 : index
    %331 = vector.load %arg5[%c11_354, %c0_355, %c0_356] : memref<16x16x128xf32, #tpu.memory_space<vmem>>, vector<1x16x128xf32>
    %332 = vector.shape_cast %331 : vector<1x16x128xf32> to vector<16x128xf32>
    %cst_357 = arith.constant dense<0.000000e+00> : vector<1x128xf32>
    %333 = tpu.matmul %330, %332, %cst_357 {dimension_numbers = #tpu.dot_dimension_numbers<[1], [0], [0], [1], [0, 0, 1, 1], [], []>} : vector<1x16xf32>, vector<16x128xf32>, vector<1x128xf32> -> vector<1x128xf32>
    %334 = arith.addf %329, %333 : vector<1x128xf32>
    %c36_358 = arith.constant 36 : index
    %c0_359 = arith.constant 0 : index
    %335 = vector.load %arg12[%c36_358, %c0_359] : memref<40x16xf32, #tpu.memory_space<vmem>>, vector<1x16xf32>
    %c12_360 = arith.constant 12 : index
    %c0_361 = arith.constant 0 : index
    %c0_362 = arith.constant 0 : index
    %336 = vector.load %arg5[%c12_360, %c0_361, %c0_362] : memref<16x16x128xf32, #tpu.memory_space<vmem>>, vector<1x16x128xf32>
    %337 = vector.shape_cast %336 : vector<1x16x128xf32> to vector<16x128xf32>
    %cst_363 = arith.constant dense<0.000000e+00> : vector<1x128xf32>
    %338 = tpu.matmul %335, %337, %cst_363 {dimension_numbers = #tpu.dot_dimension_numbers<[1], [0], [0], [1], [0, 0, 1, 1], [], []>} : vector<1x16xf32>, vector<16x128xf32>, vector<1x128xf32> -> vector<1x128xf32>
    %339 = arith.addf %334, %338 : vector<1x128xf32>
    %c37_364 = arith.constant 37 : index
    %c0_365 = arith.constant 0 : index
    %340 = vector.load %arg12[%c37_364, %c0_365] : memref<40x16xf32, #tpu.memory_space<vmem>>, vector<1x16xf32>
    %c13_366 = arith.constant 13 : index
    %c0_367 = arith.constant 0 : index
    %c0_368 = arith.constant 0 : index
    %341 = vector.load %arg5[%c13_366, %c0_367, %c0_368] : memref<16x16x128xf32, #tpu.memory_space<vmem>>, vector<1x16x128xf32>
    %342 = vector.shape_cast %341 : vector<1x16x128xf32> to vector<16x128xf32>
    %cst_369 = arith.constant dense<0.000000e+00> : vector<1x128xf32>
    %343 = tpu.matmul %340, %342, %cst_369 {dimension_numbers = #tpu.dot_dimension_numbers<[1], [0], [0], [1], [0, 0, 1, 1], [], []>} : vector<1x16xf32>, vector<16x128xf32>, vector<1x128xf32> -> vector<1x128xf32>
    %344 = arith.addf %339, %343 : vector<1x128xf32>
    %c38_370 = arith.constant 38 : index
    %c0_371 = arith.constant 0 : index
    %345 = vector.load %arg12[%c38_370, %c0_371] : memref<40x16xf32, #tpu.memory_space<vmem>>, vector<1x16xf32>
    %c14_372 = arith.constant 14 : index
    %c0_373 = arith.constant 0 : index
    %c0_374 = arith.constant 0 : index
    %346 = vector.load %arg5[%c14_372, %c0_373, %c0_374] : memref<16x16x128xf32, #tpu.memory_space<vmem>>, vector<1x16x128xf32>
    %347 = vector.shape_cast %346 : vector<1x16x128xf32> to vector<16x128xf32>
    %cst_375 = arith.constant dense<0.000000e+00> : vector<1x128xf32>
    %348 = tpu.matmul %345, %347, %cst_375 {dimension_numbers = #tpu.dot_dimension_numbers<[1], [0], [0], [1], [0, 0, 1, 1], [], []>} : vector<1x16xf32>, vector<16x128xf32>, vector<1x128xf32> -> vector<1x128xf32>
    %349 = arith.addf %344, %348 : vector<1x128xf32>
    %c39_376 = arith.constant 39 : index
    %c0_377 = arith.constant 0 : index
    %350 = vector.load %arg12[%c39_376, %c0_377] : memref<40x16xf32, #tpu.memory_space<vmem>>, vector<1x16xf32>
    %c15_378 = arith.constant 15 : index
    %c0_379 = arith.constant 0 : index
    %c0_380 = arith.constant 0 : index
    %351 = vector.load %arg5[%c15_378, %c0_379, %c0_380] : memref<16x16x128xf32, #tpu.memory_space<vmem>>, vector<1x16x128xf32>
    %352 = vector.shape_cast %351 : vector<1x16x128xf32> to vector<16x128xf32>
    %cst_381 = arith.constant dense<0.000000e+00> : vector<1x128xf32>
    %353 = tpu.matmul %350, %352, %cst_381 {dimension_numbers = #tpu.dot_dimension_numbers<[1], [0], [0], [1], [0, 0, 1, 1], [], []>} : vector<1x16xf32>, vector<16x128xf32>, vector<1x128xf32> -> vector<1x128xf32>
    %354 = arith.addf %349, %353 : vector<1x128xf32>
    %c3_382 = arith.constant 3 : index
    %c0_383 = arith.constant 0 : index
    %355 = vector.load %arg7[%c3_382, %c0_383] : memref<6x128xf32, #tpu.memory_space<vmem>>, vector<1x128xf32>
    %356 = arith.addf %354, %355 : vector<1x128xf32>
    %cst_384 = arith.constant 0.000000e+00 : f32
    %357 = vector.broadcast %cst_384 : f32 to vector<1x128xf32>
    %358 = arith.cmpf ogt, %356, %357 : vector<1x128xf32>
    %cst_385 = arith.constant 0.00999999977 : f32
    %359 = vector.broadcast %cst_385 : f32 to vector<1x128xf32>
    %360 = arith.mulf %359, %356 : vector<1x128xf32>
    %361 = arith.select %358, %356, %360 : vector<1x128xi1>, vector<1x128xf32>
    %c0_386 = arith.constant 0 : index
    %c0_387 = arith.constant 0 : index
    %362 = vector.load %arg6[%c0_386, %c0_387] : memref<128x136xf32, #tpu.memory_space<vmem>>, vector<128x128xf32>
    %c0_388 = arith.constant 0 : index
    %c128 = arith.constant 128 : index
    %363 = vector.load %arg6[%c0_388, %c128] : memref<128x136xf32, #tpu.memory_space<vmem>>, vector<128x8xf32>
    %cst_389 = arith.constant dense<0.000000e+00> : vector<1x128xf32>
    %364 = tpu.matmul %361, %362, %cst_389 {dimension_numbers = #tpu.dot_dimension_numbers<[1], [0], [0], [1], [0, 0, 1, 1], [], []>} : vector<1x128xf32>, vector<128x128xf32>, vector<1x128xf32> -> vector<1x128xf32>
    %c4_390 = arith.constant 4 : index
    %c0_391 = arith.constant 0 : index
    %365 = vector.load %arg7[%c4_390, %c0_391] : memref<6x128xf32, #tpu.memory_space<vmem>>, vector<1x128xf32>
    %366 = arith.addf %364, %365 : vector<1x128xf32>
    %cst_392 = arith.constant 0.000000e+00 : f32
    %367 = vector.broadcast %cst_392 : f32 to vector<1x128xf32>
    %368 = arith.cmpf ogt, %366, %367 : vector<1x128xf32>
    %cst_393 = arith.constant 0.00999999977 : f32
    %369 = vector.broadcast %cst_393 : f32 to vector<1x128xf32>
    %370 = arith.mulf %369, %366 : vector<1x128xf32>
    %371 = arith.select %368, %366, %370 : vector<1x128xi1>, vector<1x128xf32>
    %cst_394 = arith.constant dense<0.000000e+00> : vector<1x8xf32>
    %372 = tpu.matmul %371, %363, %cst_394 {dimension_numbers = #tpu.dot_dimension_numbers<[1], [0], [0], [1], [0, 0, 1, 1], [], []>} : vector<1x128xf32>, vector<128x8xf32>, vector<1x8xf32> -> vector<1x8xf32>
    %c5_395 = arith.constant 5 : index
    %c0_396 = arith.constant 0 : index
    %373 = vector.load %arg7[%c5_395, %c0_396] : memref<6x128xf32, #tpu.memory_space<vmem>>, vector<1x8xf32>
    %374 = arith.addf %372, %373 : vector<1x8xf32>
    %375 = vector.extract_strided_slice %374 {offsets = [0, 0], sizes = [1, 4], strides = [1, 1]} : vector<1x8xf32> to vector<1x4xf32>
    %376 = math.tanh %375 : vector<1x4xf32>
    %377 = vector.extract_strided_slice %374 {offsets = [0, 4], sizes = [1, 4], strides = [1, 1]} : vector<1x8xf32> to vector<1x4xf32>
    %cst_397 = arith.constant dense<0xFF800000> : vector<1xf32>
    %378 = vector.multi_reduction <maximumf>, %377, %cst_397 [1] : vector<1x4xf32> to vector<1xf32>
    %379 = vector.shape_cast %378 : vector<1xf32> to vector<1x1xf32>
    %380 = vector.broadcast %379 : vector<1x1xf32> to vector<1x4xf32>
    %381 = arith.subf %377, %380 : vector<1x4xf32>
    %382 = math.exp %381 : vector<1x4xf32>
    %cst_398 = arith.constant dense<0.000000e+00> : vector<1xf32>
    %383 = vector.multi_reduction <add>, %382, %cst_398 [1] : vector<1x4xf32> to vector<1xf32>
    %384 = vector.shape_cast %383 : vector<1xf32> to vector<1x1xf32>
    %385 = vector.broadcast %384 : vector<1x1xf32> to vector<1x4xf32>
    %386 = arith.divf %382, %385 : vector<1x4xf32>
    %c0_399 = arith.constant 0 : index
    %c0_400 = arith.constant 0 : index
    %c0_401 = arith.constant 0 : index
    %387 = vector.load %arg8[%c0_399, %c0_400, %c0_401] : memref<1x1x4xf32, #tpu.memory_space<vmem>>, vector<1x1x4xf32>
    %388 = vector.shape_cast %387 : vector<1x1x4xf32> to vector<1x4xf32>
    %389 = arith.mulf %386, %388 : vector<1x4xf32>
    %390 = arith.addf %376, %389 : vector<1x4xf32>
    %c0_402 = arith.constant 0 : index
    %c0_403 = arith.constant 0 : index
    %c0_404 = arith.constant 0 : index
    %391 = vector.load %arg9[%c0_402, %c0_403, %c0_404] : memref<1x1x4xf32, #tpu.memory_space<vmem>>, vector<1x1x4xf32>
    %392 = vector.shape_cast %391 : vector<1x1x4xf32> to vector<1x4xf32>
    %393 = vector.shape_cast %390 : vector<1x4xf32> to vector<1x1x4xf32>
    tpu.vector_store %arg9[%c0_402, %c0_403, %c0_404], %393 {strides = array<i32>} : memref<1x1x4xf32, #tpu.memory_space<vmem>>, vector<1x1x4xf32>,
    return
  }
  func.func @transform_0(%arg0: i32) -> (i32, i32, i32) {
    %c0_i32 = arith.constant 0 : i32
    %c0_i32_0 = arith.constant 0 : i32
    %c0_i32_1 = arith.constant 0 : i32
    return %arg0, %c0_i32, %c0_i32_0 : i32, i32, i32
  }
  func.func @transform_1(%arg0: i32) -> (i32, i32) {
    %c0_i32 = arith.constant 0 : i32
    %c0_i32_0 = arith.constant 0 : i32
    %c0_i32_1 = arith.constant 0 : i32
    return %c0_i32, %c0_i32_0 : i32, i32
  }
  func.func @transform_2(%arg0: i32) -> (i32, i32, i32) {
    %c0_i32 = arith.constant 0 : i32
    %c0_i32_0 = arith.constant 0 : i32
    %c0_i32_1 = arith.constant 0 : i32
    %c0_i32_2 = arith.constant 0 : i32
    return %c0_i32, %c0_i32_0, %c0_i32_1 : i32, i32, i32
  }
  func.func @transform_3(%arg0: i32) -> (i32, i32, i32) {
    %c0_i32 = arith.constant 0 : i32
    %c0_i32_0 = arith.constant 0 : i32
    %c0_i32_1 = arith.constant 0 : i32
    %c0_i32_2 = arith.constant 0 : i32
    return %c0_i32, %c0_i32_0, %c0_i32_1 : i32, i32, i32
  }
  func.func @transform_4(%arg0: i32) -> (i32, i32, i32) {
    %c0_i32 = arith.constant 0 : i32
    %c0_i32_0 = arith.constant 0 : i32
    %c0_i32_1 = arith.constant 0 : i32
    %c0_i32_2 = arith.constant 0 : i32
    return %c0_i32, %c0_i32_0, %c0_i32_1 : i32, i32, i32
  }
  func.func @transform_5(%arg0: i32) -> (i32, i32) {
    %c0_i32 = arith.constant 0 : i32
    %c0_i32_0 = arith.constant 0 : i32
    %c0_i32_1 = arith.constant 0 : i32
    return %c0_i32, %c0_i32_0 : i32, i32
  }
  func.func @transform_6(%arg0: i32) -> (i32, i32) {
    %c0_i32 = arith.constant 0 : i32
    %c0_i32_0 = arith.constant 0 : i32
    %c0_i32_1 = arith.constant 0 : i32
    return %c0_i32, %c0_i32_0 : i32, i32
  }
  func.func @transform_7(%arg0: i32) -> (i32, i32, i32) {
    %c0_i32 = arith.constant 0 : i32
    %c0_i32_0 = arith.constant 0 : i32
    %c0_i32_1 = arith.constant 0 : i32
    return %arg0, %c0_i32, %c0_i32_0 : i32, i32, i32
  }
  func.func @transform_8(%arg0: i32) -> (i32, i32, i32) {
    %c0_i32 = arith.constant 0 : i32
    %c0_i32_0 = arith.constant 0 : i32
    %c0_i32_1 = arith.constant 0 : i32
    return %arg0, %c0_i32, %c0_i32_0 : i32, i32, i32
  }
}

</mosaic_0001>

<bundles_post_ra>
// kernel: ppo_image_actor_forward.1
= control target key start
LH: loop header
LB: loop body
LE: loop exit
PB: predicated region body
PF: predicated region fallthrough
CT: control target
= control target key end

     0   :  { %13 = vsyncpa [#allocation6], 0  ;;  %s17866_s0 = inlined_call_operand.vmem [shape: f32[2,152,300], index: 0, kind: input, shape index: {}]   ;;  %s17867_s1 = inlined_call_operand.vmem [shape: f32[300,64], index: 1, kind: input, shape index: {}]   ;;  %s17868_s2 = inlined_call_operand.vmem [shape: f32[25,64,32], index: 2, kind: input, shape index: {}]   ;;  %s17869_s3 = inlined_call_operand.vmem [shape: f32[25,32,16], index: 3, kind: input, shape index: {}]   ;;  %s17870_s4 = inlined_call_operand.vmem [shape: f32[16,16,128], index: 4, kind: input, shape index: {}]   ;;  %s17871_s5 = inlined_call_operand.vmem [shape: f32[128,136], index: 5, kind: input, shape index: {}]   ;;  %s17872_s6 = inlined_call_operand.vmem [shape: f32[6,128], index: 6, kind: input, shape index: {}]   ;;  %s17873_s7 = inlined_call_operand.vmem [shape: f32[2,1,4], index: 7, kind: input, shape index: {}]   ;;  %s17874_s8 = inlined_call_operand.hbm [shape: f32[2,1,4], index: 8, kind: output, shape index: {}]  }
   0x1   :  { %15 = vsyncpa [#allocation6 + $0x1], 0  ;;  %s14961_s27 = smov 0   ;;  %s14963_s28 = smov 0  }
   0x2   :  { %s14965_s29 = smov 0   ;;  %s14967_s30 = smov 0  }
   0x3 LB: > { %s14982_s9 = sadd.s32 4294967295, %s14907_s30   ;;  %s10347_s10 = sadd.s32 4294967294, %s14907_s30   ;;  %s14907_s30 = sphi %s14967_s30, %s17918_s30   ;;  %s14903_s29 = sphi %s14965_s29, %s17917_s29   ;;  %s14899_s28 = sphi %s14963_s28, %s17916_s28   ;;  %s14895_s27 = sphi %s14961_s27, %s17915_s27  }
   0x4   : > { %s14986_s11 = sadd.s32 1, %s14907_s30   ;;  %s206_s12 = sadd.s32 1, %s14903_s29 }
   0x5   : > { %s203_s13 = ssub.s32 %s14907_s30, %s14986_s11  ;;  %p216_p0 = scmp.ne.s32.totalorder %s14903_s29, %s14899_s28 }
   0x6   : > { %p204_p1 = scmp.eq.s32.totalorder %s203_s13, 0  ;;  %p217_p2 = scmp.eq.s32.totalorder %s14982_s9, 1 }
   0x7   : > { %p222_p3 = scmp.ne.s32.totalorder %s14899_s28, %s14895_s27  ;;  %p223_p4 = scmp.eq.s32.totalorder %s10347_s10, 1 }
   0x8   : > { %s14997_s14 = scalar_select %p204_p1, %s14903_s29, %s206_s12  }
   0x9   : > { %p14999_p5 = por %p217_p2, %p216_p0  ;;  %p15003_p6 = por %p223_p4, %p222_p3 }
   0xa   : > { %p10350_p7 = scmp.ge.s32.totalorder %s14907_s30, 1  ;;  %p273_p8 = scmp.lt.s32.totalorder %s14907_s30, 3 }
   0xc   : > { %p274_p9 = pnand %p10350_p7, %p273_p8 }
   0xe   : > { %277 = sbr.rel (%p274_p9) target bundleno = 3081 (0xc09), region = 52 }
  0x15   : > { %v333_v0 = vld [vmem:[%s17867_s1 + $0x80] sm:$0xff]  ;;  %v334_v1 = vld [vmem:[%s17867_s1 + $0x88] sm:$0xff]  ;;  %p309_p10 = scmp.lt.s32.totalorder %s14982_s9, 1  ;;  %v335_v5 = vld [vmem:[%s17867_s1 + $0x90] sm:$0xff]  ;;  %vm421_vm0 = vcmask 1043456   ;;  %vm390_vm1 = vcmask 359424  }
  0x16   : > { %v317_v2 = vld [vmem:[%s17867_s1] sm:$0xff]  ;;  %v15019_v3 = vpack.c.bf16 %v334_v1, %v333_v0  ;;  %v318_v4 = vld [vmem:[%s17867_s1 + $0x8] sm:$0xff]  ;;  %v336_v6 = vld [vmem:[%s17867_s1 + $0x98] sm:$0xff]  ;;  %vm14909_vm2 = vmmov 1   ;;  %vm14911_vm4 = vmmov 0   ;;  %vm655_vm5 = vcmask 523264  }
  0x17   : > { %v15030_v7 = vpack.c.bf16 %v318_v4, %v317_v2  ;;  %v15032_v8 = vpack.c.bf16 %v336_v6, %v335_v5  ;;  %v319_v9 = vld [vmem:[%s17867_s1 + $0x10] sm:$0xff]  ;;  %v320_v10 = vld [vmem:[%s17867_s1 + $0x18] sm:$0xff]  ;;  %v337_v11 = vld [vmem:[%s17867_s1 + $0xa0] sm:$0xff]  ;;  %s15044_s22 = scalar_select %p309_p10, %s14982_s9, 1  ;;  %v17877_v4 = vmov 0.0|0.0   ;;  %vm5791_vm6 = vcmask 261120  }
  0x18   : > { %13772 = vmatprep.subr.bf16.mxu0 %v15019_v3  ;;  %v338_v12 = vld [vmem:[%s17867_s1 + $0xa8] sm:$0xff]  ;;  %v15051_v13 = vpack.c.bf16 %v320_v10, %v319_v9  ;;  %v321_v15 = vld [vmem:[%s17867_s1 + $0x20] sm:$0xff]  ;;  %v339_v17 = vld [vmem:[%s17867_s1 + $0xb0] sm:$0xff]  ;;  %vm8803_vm7 = vcmask 130048   ;;  %vm10237_vm10 = vcmask 57376   ;;  %vm10248_vm11 = vcmask 24576  }
  0x19   : > { %13774 = vmatpush3.bf16.msra.mxu0 %v15030_v7  ;;  %v15054_v14 = vpack.c.bf16 %v338_v12, %v337_v11  ;;  %v322_v16 = vld [vmem:[%s17867_s1 + $0x28] sm:$0xff]  ;;  %s14793_s13 = smul.u32 456, %s15044_s22  ;;  %v340_v18 = vld [vmem:[%s17867_s1 + $0xb8] sm:$0xff]  ;;  %v349_v20 = vld [vmem:[%s17867_s1 + $0x100] sm:$0xff]  ;;  %s316_s17 = scalar_lea.vmem %s17873_s7, %s15044_s22 }
  0x1a   : > { %13776 = vmatprep.subr.bf16.mxu0 %v15032_v8  ;;  %v15070_v19 = vpack.c.bf16 %v322_v16, %v321_v15  ;;  %v350_v21 = vld [vmem:[%s17867_s1 + $0x108] sm:$0xff]  ;;  %v15079_v22 = vpack.c.bf16 %v340_v18, %v339_v17  ;;  %v323_v23 = vld [vmem:[%s17867_s1 + $0x30] sm:$0xff]  ;;  %v324_v24 = vld [vmem:[%s17867_s1 + $0x38] sm:$0xff]  ;;  %s307_s18 = sand.u32 1, %s14899_s28   ;;  %s11136_s19 = sshll.u32 %s14982_s9, 4 }
  0x1b   : > { %v341_v25 = vld [vmem:[%s17867_s1 + $0xc0] sm:$0xff]  ;;  %v15090_v26 = vpack.c.bf16 %v350_v21, %v349_v20  ;;  %s15095_s23 = scalar_lea.vmem %s17866_s0, %s14793_s13  ;;  %v342_v27 = vld [vmem:[%s17867_s1 + $0xc8] sm:$0xff]  ;;  %v351_v28 = vld [vmem:[%s17867_s1 + $0x110] sm:$0xff]  ;;  %v15110_v31 = vpack.c.bf16 %v324_v24, %v323_v23  ;;  %s14914_s13 = smov 4  }
  0x1c   : > { %v352_v29 = vld [vmem:[%s17867_s1 + $0x118] sm:$0xff]  ;;  %v357_v32 = vld [vmem:[%s15095_s23 + $0x8] sm:$0xff]  ;;  %v353_v33 = vld [vmem:[%s17867_s1 + $0x120] sm:$0xff]  ;;  %v15121_v35 = vpack.c.bf16 %v342_v27, %v341_v25  ;;  %s308_s20 = scalar_lea.vmem [#allocation5], %s307_s18  ;;  %s17823_s25 = scalar_lea.hbm %s17874_s8, %s11136_s19 }
  0x1d   : > { %13778 = vmatpush3.bf16.msra.mxu0 %v15051_v13  ;;  %13804 = vmatprep.subr.bf16.mxu1 %v15090_v26  ;;  %v15107_v30 = vpack.c.bf16 %v352_v29, %v351_v28  ;;  %v354_v34 = vld [vmem:[%s17867_s1 + $0x128] sm:$0xf]  ;;  %v325_v36 = vld [vmem:[%s17867_s1 + $0x40] sm:$0xff]  ;;  %v343_v38 = vld [vmem:[%s17867_s1 + $0xd0] sm:$0xff]  ;;  %s10283_s21 = sshll.u32 %s308_s20, 4  ;;  %s10271_s26 = scalar_lea.sflag [#allocation6], %s307_s18  ;;  %s17825_s21 = int_to_ptr.vmem [resolvable:$true] %s10283_s21 }
  0x1e   : > { %13780 = vmatprep.subr.bf16.mxu0 %v15054_v14  ;;  %13806 = vmatpush3.bf16.msra.mxu1 %v15090_v26  ;;  %v326_v37 = vld [vmem:[%s17867_s1 + $0x48] sm:$0xff]  ;;  %v15133_v39 = vpack.c.bf16 %v354_v34, %v353_v33  ;;  %v344_v40 = vld [vmem:[%s17867_s1 + $0xd8] sm:$0xff]  ;;  %vm15139_vm3 = vmpackc.low %vm421_vm0, %vm14909_vm2  ;;  %s14915_s9 = smov [#allocation5]  }
  0x1f   : > { %13808 = vmatprep.subr.bf16.mxu1 %v15107_v30  ;;  %489 = vmatprep.mubr.f32.mxu0 %v357_v32  ;;  %v358_v42 = vld [vmem:[%s15095_s23 + $0x10] sm:$0xff]  ;;  %v15146_v43 = vpack.c.bf16 %v326_v37, %v325_v36  ;;  %v15150_v44 = vpack.c.bf16 %v344_v40, %v343_v38  ;;  %v328_v46 = vld [vmem:[%s17867_s1 + $0x58] sm:$0xff]  ;;  %v345_v47 = vld [vmem:[%s17867_s1 + $0xe0] sm:$0xff]  ;;  %s14849_s10 = sshll.u32 %s14915_s9, 4  ;;  %s14850_s10 = int_to_ptr.vmem [resolvable:$false] %s14849_s10 }
  0x20   : > { %12110 = vmatprep.mubr.msk.f32.mxu1 %vm390_vm1, %v358_v42  ;;  %v327_v45 = vld [vmem:[%s17867_s1 + $0x50] sm:$0xff]  ;;  %v346_v48 = vld [vmem:[%s17867_s1 + $0xe8] sm:$0xff]  ;;  %v329_v52 = vld [vmem:[%s17867_s1 + $0x60] sm:$0xff]  ;;  %s14851_s12 = scalar_lea.vmem %s14850_s10, 32  ;;  %p14852_p0 = scmp.lt.s32.totalorder %s17825_s21, %s14850_s10 }
  0x21   : > { %13782 = vmatpush3.bf16.msra.mxu0 %v15070_v19  ;;  %v15168_v49 = vpack.c.bf16 %v328_v46, %v327_v45  ;;  %v361_v50 = vld [vmem:[%s15095_s23 + $0x28] sm:$0xff]  ;;  %v15175_v51 = vpack.c.bf16 %v346_v48, %v345_v47  ;;  %v347_v54 = vld [vmem:[%s17867_s1 + $0xf0] sm:$0xff]  ;;  %v348_v55 = vld [vmem:[%s17867_s1 + $0xf8] sm:$0xff] }
  0x22   : > { %13784 = vmatprep.subr.bf16.mxu0 %v15079_v22  ;;  %13810 = vmatpush3.bf16.msra.mxu1 %v15107_v30  ;;  %v330_v53 = vld [vmem:[%s17867_s1 + $0x68] sm:$0xff]  ;;  %v364_v56 = vld [vmem:[%s15095_s23 + $0x40] sm:$0xff]  ;;  %v367_v58 = vld [vmem:[%s15095_s23 + $0x58] sm:$0xff]  ;;  %v13799_v59 = vpack.c.bf16 %v348_v55, %v347_v54 }
  0x23   : > { %13813 = vmatprep.subr.msk.bf16.mxu1 %vm15139_vm3, %v15133_v39  ;;  %v15193_v57 = vpack.c.bf16 %v330_v53, %v329_v52  ;;  %v331_v60 = vld [vmem:[%s17867_s1 + $0x70] sm:$0xff]  ;;  %v332_v61 = vld [vmem:[%s17867_s1 + $0x78] sm:$0xff]  ;;  %v373_v0 = vld [vmem:[%s15095_s23 + $0x88] sm:$0xff] }
  0x24   : > { %v370_v62 = vld [vmem:[%s15095_s23 + $0x70] sm:$0xff]  ;;  %v13801_v63 = vpack.c.bf16 %v332_v61, %v331_v60  ;;  %v376_v1 = vld [vmem:[%s15095_s23 + $0xa0] sm:$0xff]  ;;  %v363_v9 = vld [vmem:[%s15095_s23 + $0x38] sm:$0xff] }
  0x25   : > { %13786 = vmatpush3.bf16.msra.mxu0 %v15110_v31  ;;  %v356_v2 = vld [vmem:[%s15095_s23] sm:$0xff]  ;;  %v382_v6 = vld [vmem:[%s15095_s23 + $0xd0] sm:$0xff]  ;;  %v667_v10 = vld [vmem:[%s15095_s23 + $0xf8] sm:$0xff] }
  0x26   : > { %13788 = vmatprep.subr.bf16.mxu0 %v15121_v35  ;;  %13816 = vmatpush3.bf16.msk.msra.mxu1 %vm15139_vm3, %v15133_v39  ;;  %v360_v5 = vld [vmem:[%s15095_s23 + $0x20] sm:$0xff]  ;;  %v362_v11 = vld [vmem:[%s15095_s23 + $0x30] sm:$0xff]  ;;  %v371_v17 = vld [vmem:[%s15095_s23 + $0x78] sm:$0xff] }
  0x27   : > { %13818 = vmatprep.subr.bf16.mxu1 %v15019_v3  ;;  %v379_v3 = vld [vmem:[%s15095_s23 + $0xb8] sm:$0xff]  ;;  %v366_v12 = vld [vmem:[%s15095_s23 + $0x50] sm:$0xff]  ;;  %v368_v15 = vld [vmem:[%s15095_s23 + $0x60] sm:$0xff] }
  0x28   : > { %v372_v16 = vld [vmem:[%s15095_s23 + $0x80] sm:$0xff]  ;;  %v375_v18 = vld [vmem:[%s15095_s23 + $0x98] sm:$0xff]  ;;  %v670_v20 = vld [vmem:[%s15095_s23 + $0x110] sm:$0xff] }
  0x29   : > { %13790 = vmatpush3.bf16.msra.mxu0 %v15146_v43  ;;  %12111 = vmatmul.mubr.msk.f32.vlgmr.msra.gmra.mrb[0].mxu1 %vm390_vm1, %v361_v50  ;;  %v374_v21 = vld [vmem:[%s15095_s23 + $0x90] sm:$0xff]  ;;  %v669_v23 = vld [vmem:[%s15095_s23 + $0x108] sm:$0xff]  ;;  %v672_v27 = vld [vmem:[%s15095_s23 + $0x120] sm:$0xff] }
  0x2a   : > { %13792 = vmatprep.subr.bf16.mxu0 %v15150_v44  ;;  %13820 = vmatpush3.bf16.msra.mxu1 %v15030_v7  ;;  %v359_v7 = vld [vmem:[%s15095_s23 + $0x18] sm:$0xff]  ;;  %v673_v24 = vld [vmem:[%s15095_s23 + $0x128] sm:$0xff]  ;;  %v676_v28 = vld [vmem:[%s15095_s23 + $0x140] sm:$0xff] }
  0x2b   : > { %13822 = vmatprep.subr.bf16.mxu1 %v15032_v8  ;;  %12113 = vmatprep.mubr.msk.f32.mxu1 %vm390_vm1, %v364_v56  ;;  %v385_v8 = vld [vmem:[%s15095_s23 + $0xe8] sm:$0xff]  ;;  %v380_v29 = vld [vmem:[%s15095_s23 + $0xc0] sm:$0xff]  ;;  %v679_v32 = vld [vmem:[%s15095_s23 + $0x158] sm:$0xff] }
  0x2c   : > { %v377_v25 = vld [vmem:[%s15095_s23 + $0xa8] sm:$0xff]  ;;  %v383_v33 = vld [vmem:[%s15095_s23 + $0xd8] sm:$0xff]  ;;  %v678_v34 = vld [vmem:[%s15095_s23 + $0x150] sm:$0xff] }
  0x2d   : > { %13794 = vmatpush3.bf16.msra.mxu0 %v15168_v49  ;;  %12114 = vmatmul.mubr.msk.f32.gmra.mrb[2].mxu1 %vm390_vm1, %v367_v58  ;;  %v668_v36 = vld [vmem:[%s15095_s23 + $0x100] sm:$0xff]  ;;  %v671_v37 = vld [vmem:[%s15095_s23 + $0x118] sm:$0xff]  ;;  %v674_v38 = vld [vmem:[%s15095_s23 + $0x130] sm:$0xff] }
  0x2e   : > { %13796 = vmatprep.subr.bf16.mxu0 %v15175_v51  ;;  %13824 = vmatpush3.bf16.msra.mxu1 %v15051_v13  ;;  %v365_v13 = vld [vmem:[%s15095_s23 + $0x48] sm:$0xff]  ;;  %v680_v40 = vld [vmem:[%s15095_s23 + $0x160] sm:$0xff]  ;;  %v10376_v47 = vld [vmem:[%s17868_s2 + $0x50] sm:$0xff] }
  0x2f   : > { %13826 = vmatprep.subr.bf16.mxu1 %v15054_v14  ;;  %12116 = vmatprep.mubr.msk.f32.mxu1 %vm390_vm1, %v370_v62  ;;  %v369_v14 = vld [vmem:[%s15095_s23 + $0x68] sm:$0xff]  ;;  %v10374_v41 = vld [vmem:[%s17868_s2 + $0x40] sm:$0xff]  ;;  %v10377_v48 = vld [vmem:[%s17868_s2 + $0x58] sm:$0xff] }
  0x30   : > { %v10375_v42 = vld [vmem:[%s17868_s2 + $0x48] sm:$0xff]  ;;  %v13863_v50 = vpack.c.bf16 %v10377_v48, %v10376_v47  ;;  %v10378_v52 = vld [vmem:[%s17868_s2 + $0x60] sm:$0xff]  ;;  %v687_v54 = vld [vmem:[%s15095_s23 + $0x198] sm:$0xff] }
  0x31   : > { %13798 = vmatpush3.bf16.msra.mxu0 %v15193_v57  ;;  %12117 = vmatmul.mubr.msk.f32.gmra.mrb[4].mxu1 %vm390_vm1, %v373_v0  ;;  %v681_v45 = vld [vmem:[%s15095_s23 + $0x168] sm:$0xff]  ;;  %v691_v56 = vld [vmem:[%s15095_s23 + $0x1b8] sm:$0xff]  ;;  %v686_v62 = vld [vmem:[%s15095_s23 + $0x190] sm:$0xff] }
  0x32   : > { %13800 = vmatprep.subr.bf16.mxu0 %v13799_v59  ;;  %13828 = vmatpush3.bf16.msra.mxu1 %v15070_v19  ;;  %v666_v19 = vld [vmem:[%s15095_s23 + $0xf0] sm:$0xff]  ;;  %v685_v46 = vld [vmem:[%s15095_s23 + $0x188] sm:$0xff]  ;;  %v10381_v58 = vld [vmem:[%s17868_s2 + $0x78] sm:$0xff] }
  0x33   : > { %13830 = vmatprep.subr.bf16.mxu1 %v15079_v22  ;;  %12119 = vmatprep.mubr.msk.f32.mxu1 %vm390_vm1, %v376_v1  ;;  %v378_v22 = vld [vmem:[%s15095_s23 + $0xb0] sm:$0xff]  ;;  %v10379_v53 = vld [vmem:[%s17868_s2 + $0x68] sm:$0xff]  ;;  %v683_v61 = vld [vmem:[%s15095_s23 + $0x178] sm:$0xff] }
  0x34   : > { %v13867_v55 = vpack.c.bf16 %v10379_v53, %v10378_v52  ;;  %v692_v0 = vld [vmem:[%s15095_s23 + $0x1c0] sm:$0xff] }
  0x35   : > { %13802 = vmatpush3.bf16.msra.mxu0 %v13801_v63  ;;  %12120 = vmatmul.mubr.msk.f32.gmra.mrb[6].mxu1 %vm390_vm1, %v379_v3  ;;  %v961_v1 = vld [vmem:[%s17868_s2] sm:$0xff] }
  0x36   : > { %13849 = vmatprep.subr.bf16.mxu0 %v17877_v4  ;;  %13832 = vmatpush3.bf16.msra.mxu1 %v15110_v31  ;;  %v675_v31 = vld [vmem:[%s15095_s23 + $0x138] sm:$0xff]  ;;  %v965_v53 = vld [vmem:[%s17868_s2 + $0x20] sm:$0xff] }
  0x37   : > { %13834 = vmatprep.subr.bf16.mxu1 %v15121_v35  ;;  %12122 = vmatprep.mubr.msk.f32.mxu1 %vm390_vm1, %v382_v6  ;;  %v17875_v35 = vmov 0.0  }
  0x38   : > { %490 = vmatmul.mubr.f32.vlgmr.msra.gmra.mrb[0].mxu0 %v356_v2  ;;  %v962_v2 = vld [vmem:[%s17868_s2 + $0x8] sm:$0xff] }
  0x39   : > { %13851 = vmatpush3.bf16.msra.mxu0 %v15090_v26  ;;  %494 = vmatprep.mubr.f32.mxu0 %v360_v5  ;;  %v381_v26 = vld [vmem:[%s15095_s23 + $0xc8] sm:$0xff]  ;;  %v13875_v3 = vpack.c.bf16 %v962_v2, %v961_v1  ;;  %v967_v1 = vld [vmem:[%s17868_s2 + $0x30] sm:$0xff]  ;;  %v968_v2 = vld [vmem:[%s17868_s2 + $0x38] sm:$0xff] }
  0x3a   : > { %13852 = vmatprep.subr.bf16.mxu0 %v17877_v4  ;;  %12123 = vmatmul.mubr.msk.f32.gmra.mrb[8].mxu1 %vm390_vm1, %v385_v8 }
  0x3b   : > { %13836 = vmatpush3.bf16.msra.mxu1 %v15146_v43  ;;  %784 = vmatprep.mubr.f32.mxu1 %v667_v10  ;;  %v13859_v43 = vpack.c.bf16 %v10375_v42, %v10374_v41  ;;  %v963_v41 = vld [vmem:[%s17868_s2 + $0x10] sm:$0xff]  ;;  %v964_v42 = vld [vmem:[%s17868_s2 + $0x18] sm:$0xff] }
  0x3c   : > { %495 = vmatmul.mubr.f32.gmra.mrb[2].mxu0 %v359_v7  ;;  %13838 = vmatprep.subr.bf16.mxu1 %v15150_v44  ;;  %v682_v44 = vld [vmem:[%s15095_s23 + $0x170] sm:$0xff] }
  0x3d   : > { %499 = vmatprep.mubr.f32.mxu0 %v363_v9  ;;  %13854 = vmatpush3.bf16.msra.mxu0 %v15107_v30  ;;  %v384_v30 = vld [vmem:[%s15095_s23 + $0xe0] sm:$0xff] }
  0x3e   : > { %13855 = vmatprep.subr.bf16.mxu0 %v17877_v4 }
  0x3f   : > { %13840 = vmatpush3.bf16.msra.mxu1 %v15168_v49  ;;  %v684_v49 = vld [vmem:[%s15095_s23 + $0x180] sm:$0xff] }
  0x40   : > { %500 = vmatmul.mubr.f32.gmra.mrb[4].mxu0 %v362_v11  ;;  %13842 = vmatprep.subr.bf16.mxu1 %v15175_v51  ;;  %v688_v51 = vld [vmem:[%s15095_s23 + $0x1a0] sm:$0xff] }
  0x41   : > { %504 = vmatprep.mubr.f32.mxu0 %v366_v12  ;;  %13858 = vmatpush3.bf16.msk.msra.mxu0 %vm15139_vm3, %v15133_v39  ;;  %v677_v39 = vld [vmem:[%s15095_s23 + $0x148] sm:$0xff] }
  0x42   : > { %14259 = vmatprep.subr.bf16.mxu0 %v17877_v4  ;;  %v10550_v4 = vld [vmem:[%s17868_s2 + $0x260] sm:$0xff] }
  0x43   : > { %13844 = vmatpush3.bf16.msra.mxu1 %v15193_v57  ;;  %v10380_v57 = vld [vmem:[%s17868_s2 + $0x70] sm:$0xff] }
  0x44   : > { %505 = vmatmul.mubr.f32.gmra.mrb[6].mxu0 %v365_v13  ;;  %13846 = vmatprep.subr.bf16.mxu1 %v13799_v59  ;;  %v690_v59 = vld [vmem:[%s15095_s23 + $0x1b0] sm:$0xff]  ;;  %v13871_v60 = vpack.c.bf16 %v10381_v58, %v10380_v57 }
  0x45   : > { %509 = vmatprep.mubr.f32.mxu0 %v369_v14  ;;  %v15350_v14 = vld [vmem:[%s17872_s6] ss:$0 sm:$0xff] }
  0x47   : > { %13848 = vmatpush3.bf16.msra.mxu1 %v13801_v63  ;;  %v689_v63 = vld [vmem:[%s15095_s23 + $0x1a8] sm:$0xff]  ;;  %s14913_s23 = smov 124  }
  0x48   : > { %510 = vmatmul.mubr.f32.gmra.mrb[8].mxu0 %v368_v15  ;;  %13860 = vmatprep.subr.bf16.mxu1 %v13859_v43 }
  0x49   : > { %514 = vmatprep.mubr.f32.mxu0 %v372_v16 }
  0x4a   : > { %785 = vmatmul.mubr.f32.vlgmr.msra.gmra.mrb[10].mxu1 %v666_v19 }
  0x4b   : > { %789 = vmatprep.mubr.f32.mxu1 %v670_v20  ;;  %13862 = vmatpush3.bf16.msra.mxu1 %v13859_v43 }
  0x4c   : > { %515 = vmatmul.mubr.f32.gmra.mrb[10].mxu0 %v371_v17  ;;  %13864 = vmatprep.subr.bf16.mxu1 %v13863_v50 }
  0x4d   : > { %519 = vmatprep.mubr.f32.mxu0 %v375_v18 }
  0x4e   : > { %790 = vmatmul.mubr.f32.gmra.mrb[12].mxu1 %v669_v23 }
  0x4f   : > { %794 = vmatprep.mubr.f32.mxu1 %v673_v24  ;;  %13866 = vmatpush3.bf16.msra.mxu1 %v13863_v50  ;;  %v13879_v50 = vpack.c.bf16 %v964_v42, %v963_v41 }
  0x50   : > { %520 = vmatmul.mubr.f32.gmra.mrb[12].mxu0 %v374_v21  ;;  %13868 = vmatprep.subr.bf16.mxu1 %v13867_v55 }
  0x51   : > { %524 = vmatprep.mubr.f32.mxu0 %v378_v22 }
  0x52   : > { %795 = vmatmul.mubr.f32.gmra.mrb[14].mxu1 %v672_v27 }
  0x53   : > { %799 = vmatprep.mubr.f32.mxu1 %v676_v28  ;;  %13870 = vmatpush3.bf16.msra.mxu1 %v13867_v55 }
  0x54   : > { %525 = vmatmul.mubr.f32.gmra.mrb[14].mxu0 %v377_v25  ;;  %13872 = vmatprep.subr.bf16.mxu1 %v13871_v60 }
  0x55   : > { %529 = vmatprep.mubr.f32.mxu0 %v381_v26 }
  0x56   : > { %800 = vmatmul.mubr.f32.gmra.mrb[16].mxu1 %v675_v31 }
  0x57   : > { %804 = vmatprep.mubr.f32.mxu1 %v679_v32  ;;  %13874 = vmatpush3.bf16.msra.mxu1 %v13871_v60 }
  0x58   : > { %530 = vmatmul.mubr.f32.gmra.mrb[16].mxu0 %v380_v29  ;;  %13876 = vmatprep.subr.bf16.mxu1 %v13875_v3 }
  0x59   : > { %534 = vmatprep.mubr.f32.mxu0 %v384_v30 }
  0x5a   : > { %805 = vmatmul.mubr.f32.gmra.mrb[18].mxu1 %v678_v34 }
  0x5b   : > { %809 = vmatprep.mubr.f32.mxu1 %v682_v44 }
  0x5c   : > { %535 = vmatmul.mubr.f32.gmra.mrb[18].mxu0 %v383_v33 }
  0x5d   : > { %12137 = vmatprep.mubr.msk.f32.mxu0 %vm14911_vm4, %v17875_v35 }
  0x5e   : > { %810 = vmatmul.mubr.f32.gmra.mrb[20].mxu1 %v681_v45 }
  0x5f   : > { %814 = vmatprep.mubr.f32.mxu1 %v685_v46 }
  0x60   : > { %12138 = vmatmul.mubr.msk.f32.vlgmr.msra.gmra.mrb[20].mxu0 %vm390_vm1, %v668_v36 }
  0x61   : > { %12140 = vmatprep.mubr.msk.f32.mxu0 %vm14911_vm4, %v17875_v35 }
  0x62   : > { %815 = vmatmul.mubr.f32.gmra.mrb[22].mxu1 %v684_v49 }
  0x63   : > { %819 = vmatprep.mubr.f32.mxu1 %v688_v51 }
  0x64   : > { %12141 = vmatmul.mubr.msk.f32.gmra.mrb[22].mxu0 %vm390_vm1, %v671_v37 }
  0x65   : > { %12143 = vmatprep.mubr.msk.f32.mxu0 %vm14911_vm4, %v17875_v35 }
  0x66   : > { %820 = vmatmul.mubr.f32.gmra.mrb[24].mxu1 %v687_v54  ;;  %v966_v54 = vld [vmem:[%s17868_s2 + $0x28] sm:$0xff] }
  0x67   : > { %824 = vmatprep.mubr.f32.mxu1 %v691_v56 }
  0x68   : > { %12144 = vmatmul.mubr.msk.f32.gmra.mrb[24].mxu0 %vm390_vm1, %v674_v38 }
  0x69   : > { %12146 = vmatprep.mubr.msk.f32.mxu0 %vm14911_vm4, %v17875_v35 }
  0x6a   : > { %825 = vmatmul.mubr.f32.gmra.mrb[26].mxu1 %v690_v59 }
  0x6c   : > { %12147 = vmatmul.mubr.msk.f32.gmra.mrb[26].mxu0 %vm390_vm1, %v677_v39 }
  0x6d   : > { %12149 = vmatprep.mubr.msk.f32.mxu0 %vm14911_vm4, %v17875_v35 }
  0x70   : > { %12150 = vmatmul.mubr.msk.f32.gmra.mrb[28].mxu0 %vm390_vm1, %v680_v40 }
  0x71   : > { %12152 = vmatprep.mubr.msk.f32.mxu0 %vm14911_vm4, %v17875_v35 }
  0x74   : > { %12153 = vmatmul.mubr.msk.f32.gmra.mrb[30].mxu0 %vm390_vm1, %v683_v61 }
  0x75   : > { %12155 = vmatprep.mubr.msk.f32.mxu0 %vm14911_vm4, %v17875_v35 }
  0x78   : > { %12156 = vmatmul.mubr.msk.f32.gmra.mrb[32].mxu0 %vm390_vm1, %v686_v62  ;;  %v13883_v62 = vpack.c.bf16 %v966_v54, %v965_v53 }
  0x79   : > { %12158 = vmatprep.mubr.msk.f32.mxu0 %vm14911_vm4, %v17875_v35 }
  0x7c   : > { %12159 = vmatmul.mubr.msk.f32.gmra.mrb[34].mxu0 %vm390_vm1, %v689_v63 }
  0x7d   : > { %12161 = vmatprep.mubr.msk.f32.mxu0 %vm14911_vm4, %v17875_v35 }
  0x80   : > { %12162 = vmatmul.mubr.msk.f32.gmra.mrb[36].mxu0 %vm390_vm1, %v692_v0 }
  0x81   : > { %13022 = vmatprep.mubr.msk.f32.mxu0 %vm14911_vm4, %v17875_v35 }
  0xfc   : > { %v12112_v5 = vpop.f32.mrb[0].mxu1 }
  0xfd   : > { %v606_v6 = vpop.f32.mrb[1].mxu1 }
 0x100   : > { %v12115_v7 = vpop.f32.mrb[2].mxu1 }
 0x101   : > { %v616_v8 = vpop.f32.mrb[3].mxu1 }
 0x104   : > { %v12118_v9 = vpop.f32.mrb[4].mxu1 }
 0x105   : > { %v626_v10 = vpop.f32.mrb[5].mxu1 }
 0x108   : > { %v15345_v12 = vpop.f32.mrb[6].mxu1 }
 0x109   : > { %v15352_v15 = vpop.f32.mrb[7].mxu1 }
 0x10b   : > { %v11171_v11 = vpop.f32.mrb[0].mxu0 }
 0x10c   : > { %v11172_v13 = vpop.f32.mrb[1].mxu0 }
 0x10d   : > { %v11173_v16 = vadd.f32 %v11172_v13, %v11171_v11  ;;  %v15355_v19 = vpop.f32.mrb[8].mxu1  ;;  %v13887_v11 = vpack.c.bf16 %v968_v2, %v967_v1  ;;  %v10408_v1 = vld [vmem:[%s17868_s2 + $0x90] sm:$0xff]  ;;  %v10409_v2 = vld [vmem:[%s17868_s2 + $0x98] sm:$0xff] }
 0x10e   : > { %v15357_v21 = vpop.f32.mrb[9].mxu1 }
 0x10f   : > { %v11174_v17 = vpop.f32.mrb[2].mxu0  ;;  %v492_v18 = vadd.f32 %v11173_v16, %v15350_v14 }
 0x110   : > { %v11175_v20 = vpop.f32.mrb[3].mxu0 }
 0x111   : > { %v11176_v22 = vadd.f32 %v11175_v20, %v11174_v17  ;;  %v607_v23 = vadd.f32 %v606_v6, %v492_v18  ;;  %v10406_v17 = vld [vmem:[%s17868_s2 + $0x80] sm:$0xff]  ;;  %v10407_v18 = vld [vmem:[%s17868_s2 + $0x88] sm:$0xff] }
 0x113   : > { %v497_v24 = vadd.f32 %v11176_v22, %v15350_v14  ;;  %656 = vst.msk [vmem:[#allocation2] sm:$0xff] %vm655_vm5, %v607_v23  ;;  %v11177_v25 = vpop.f32.mrb[4].mxu0 }
 0x114   : > { %v11178_v26 = vpop.f32.mrb[5].mxu0 }
 0x115   : > { %v612_v27 = vadd.f32 %v12112_v5, %v497_v24  ;;  %v11179_v28 = vadd.f32 %v11178_v26, %v11177_v25 }
 0x117   : > { %657 = vst.msk [vmem:[#allocation2 + $0x8] sm:$0xff] %vm655_vm5, %v612_v27  ;;  %v11180_v29 = vpop.f32.mrb[6].mxu0  ;;  %v502_v30 = vadd.f32 %v11179_v28, %v15350_v14  ;;  %v15403_v27 = vpack.c.bf16 %v10407_v18, %v10406_v17 }
 0x118   : > { %v11181_v31 = vpop.f32.mrb[7].mxu0 }
 0x119   : > { %v11182_v32 = vadd.f32 %v11181_v31, %v11180_v29  ;;  %v617_v33 = vadd.f32 %v616_v8, %v502_v30 }
 0x11b   : > { %v507_v34 = vadd.f32 %v11182_v32, %v15350_v14  ;;  %658 = vst.msk [vmem:[#allocation2 + $0x10] sm:$0xff] %vm655_vm5, %v617_v33  ;;  %v11183_v36 = vpop.f32.mrb[8].mxu0 }
 0x11c   : > { %v11184_v37 = vpop.f32.mrb[9].mxu0 }
 0x11d   : > { %v622_v38 = vadd.f32 %v12115_v7, %v507_v34  ;;  %v11185_v39 = vadd.f32 %v11184_v37, %v11183_v36  ;;  %v11249_v46 = vpop.f32.mrb[10].mxu1 }
 0x11e   : > { %v969_v40 = vld [vmem:[#allocation2 + $0x1] sm:$0xff]  ;;  %v11250_v49 = vpop.f32.mrb[11].mxu1 }
 0x11f   : > { %659 = vst.msk [vmem:[#allocation2 + $0x18] sm:$0xff] %vm655_vm5, %v622_v38  ;;  %v11186_v43 = vpop.f32.mrb[10].mxu0  ;;  %12180 = vmatprep.mubr.msk.f32.mxu1 %vm655_vm5, %v969_v40  ;;  %v512_v44 = vadd.f32 %v11185_v39, %v15350_v14  ;;  %v11251_v52 = vadd.f32 %v11250_v49, %v11249_v46 }
 0x120   : > { %v11187_v45 = vpop.f32.mrb[11].mxu0 }
 0x121   : > { %v11188_v47 = vadd.f32 %v11187_v45, %v11186_v43  ;;  %v627_v48 = vadd.f32 %v626_v10, %v512_v44  ;;  %v11252_v58 = vpop.f32.mrb[12].mxu1  ;;  %v787_v32 = vadd.f32 %v11251_v52, %v15350_v14 }
 0x122   : > { %v970_v51 = vld [vmem:[#allocation2 + $0x9] sm:$0xff]  ;;  %v11253_v61 = vpop.f32.mrb[13].mxu1 }
 0x123   : > { %v517_v55 = vadd.f32 %v11188_v47, %v15350_v14  ;;  %660 = vst.msk [vmem:[#allocation2 + $0x20] sm:$0xff] %vm655_vm5, %v627_v48  ;;  %v11189_v56 = vpop.f32.mrb[12].mxu0  ;;  %12181 = vmatmul.mubr.msk.f32.vlgmr.msra.gmra.mrb[28].mxu1 %vm655_vm5, %v970_v51  ;;  %v11254_v0 = vadd.f32 %v11253_v61, %v11252_v58 }
 0x124   : > { %v11190_v57 = vpop.f32.mrb[13].mxu0  ;;  %13878 = vmatpush3.bf16.msra.mxu1 %v13875_v3 }
 0x125   : > { %v632_v59 = vadd.f32 %v12118_v9, %v517_v55  ;;  %v11191_v60 = vadd.f32 %v11190_v57, %v11189_v56  ;;  %13880 = vmatprep.subr.bf16.mxu1 %v13879_v50  ;;  %v11255_v7 = vpop.f32.mrb[14].mxu1  ;;  %v792_v42 = vadd.f32 %v11254_v0, %v15350_v14 }
 0x126   : > { %v971_v63 = vld [vmem:[#allocation2 + $0x11] sm:$0xff]  ;;  %v11256_v10 = vpop.f32.mrb[15].mxu1 }
 0x127   : > { %661 = vst.msk [vmem:[#allocation2 + $0x28] sm:$0xff] %vm655_vm5, %v632_v59  ;;  %v11192_v5 = vpop.f32.mrb[14].mxu0  ;;  %v522_v3 = vadd.f32 %v11191_v60, %v15350_v14  ;;  %12183 = vmatprep.mubr.msk.f32.mxu1 %vm655_vm5, %v971_v63  ;;  %v11257_v16 = vadd.f32 %v11256_v10, %v11255_v7  ;;  %v10410_v7 = vld [vmem:[%s17868_s2 + $0xa0] sm:$0xff]  ;;  %v2477_v35 = vld [vmem:[#allocation2 + $0x17] sm:$0xff] }
 0x128   : > { %v11193_v6 = vpop.f32.mrb[15].mxu0  ;;  %13882 = vmatpush3.bf16.msra.mxu1 %v13879_v50 }
 0x129   : > { %v637_v8 = vadd.f32 %v15352_v15, %v522_v3  ;;  %v11194_v9 = vadd.f32 %v11193_v6, %v11192_v5  ;;  %13884 = vmatprep.subr.bf16.mxu1 %v13883_v62  ;;  %v11258_v23 = vpop.f32.mrb[16].mxu1  ;;  %v797_v47 = vadd.f32 %v11257_v16, %v15350_v14  ;;  %v949_v5 = vld [vmem:[#allocation2] sm:$0xff]  ;;  %v13895_v3 = vpack.c.bf16 %v10409_v2, %v10408_v1  ;;  %v950_v6 = vld [vmem:[#allocation2 + $0x8] sm:$0xff]  ;;  %v10413_v16 = vld [vmem:[%s17868_s2 + $0xb8] sm:$0xff] }
 0x12a   : > { %v972_v13 = vld [vmem:[#allocation2 + $0x19] sm:$0xff]  ;;  %v11259_v26 = vpop.f32.mrb[17].mxu1 }
 0x12b   : > { %662 = vst.msk [vmem:[#allocation2 + $0x30] sm:$0xff] %vm655_vm5, %v637_v8  ;;  %v527_v20 = vadd.f32 %v11194_v9, %v15350_v14  ;;  %v11195_v22 = vpop.f32.mrb[16].mxu0  ;;  %12184 = vmatmul.mubr.msk.f32.gmra.mrb[30].mxu1 %vm655_vm5, %v972_v13  ;;  %v11260_v29 = vadd.f32 %v11259_v26, %v11258_v23  ;;  %v10411_v8 = vld [vmem:[%s17868_s2 + $0xa8] sm:$0xff]  ;;  %v15448_v9 = vld [vmem:[#allocation2 + $0x10] sm:$0xff]  ;;  %v15463_v17 = vld [vmem:[#allocation2 + $0x20] sm:$0xff] }
 0x12c   : > { %v11196_v15 = vpop.f32.mrb[17].mxu0  ;;  %13886 = vmatpush3.bf16.msra.mxu1 %v13883_v62  ;;  %v13899_v10 = vpack.c.bf16 %v10411_v8, %v10410_v7  ;;  %v10412_v13 = vld [vmem:[%s17868_s2 + $0xb0] sm:$0xff]  ;;  %v10450_v8 = vld [vmem:[%s17868_s2 + $0x120] sm:$0xff] }
 0x12d   : > { %v642_v24 = vadd.f32 %v15345_v12, %v527_v20  ;;  %v11197_v25 = vadd.f32 %v11196_v15, %v11195_v22  ;;  %13888 = vmatprep.subr.bf16.mxu1 %v13887_v11  ;;  %v11261_v34 = vpop.f32.mrb[18].mxu1  ;;  %v13903_v18 = vpack.c.bf16 %v10413_v16, %v10412_v13  ;;  %v10426_v22 = vld [vmem:[%s17868_s2 + $0xc0] sm:$0xff]  ;;  %v10427_v15 = vld [vmem:[%s17868_s2 + $0xc8] sm:$0xff] }
 0x12e   : > { %v973_v28 = vld [vmem:[#allocation2 + $0x21] sm:$0xff]  ;;  %v11262_v37 = vpop.f32.mrb[19].mxu1  ;;  %v1507_v7 = vld [vmem:[#allocation2 + $0xb] sm:$0xff] }
 0x12f   : > { %663 = vst.msk [vmem:[#allocation2 + $0x38] sm:$0xff] %vm655_vm5, %v642_v24  ;;  %v532_v30 = vadd.f32 %v11197_v25, %v15350_v14  ;;  %v11198_v31 = vpop.f32.mrb[18].mxu0  ;;  %12186 = vmatprep.mubr.msk.f32.mxu1 %vm655_vm5, %v973_v28  ;;  %v11263_v39 = vadd.f32 %v11262_v37, %v11261_v34  ;;  %v15467_v20 = vld [vmem:[#allocation2 + $0x28] sm:$0xff]  ;;  %v13907_v24 = vpack.c.bf16 %v10427_v15, %v10426_v22  ;;  %v1314_v37 = vld [vmem:[#allocation2 + $0x12] sm:$0xff] }
 0x130   : > { %v11199_v33 = vpop.f32.mrb[19].mxu0  ;;  %13890 = vmatpush3.bf16.msra.mxu1 %v13887_v11  ;;  %v15453_v11 = vld [vmem:[#allocation2 + $0x18] sm:$0xff]  ;;  %v1313_v34 = vld [vmem:[#allocation2 + $0xa] sm:$0xff] }
 0x131   : > { %v647_v12 = vadd.f32 %v15357_v21, %v532_v30  ;;  %v11200_v36 = vadd.f32 %v11199_v33, %v11198_v31  ;;  %13892 = vmatprep.subr.bf16.mxu1 %v15403_v27  ;;  %v807_v58 = vadd.f32 %v11263_v39, %v15350_v14  ;;  %v10428_v30 = vld [vmem:[%s17868_s2 + $0xd0] sm:$0xff]  ;;  %v10429_v31 = vld [vmem:[%s17868_s2 + $0xd8] sm:$0xff] }
 0x132   : > { %v974_v38 = vld [vmem:[#allocation2 + $0x29] sm:$0xff]  ;;  %v13911_v33 = vpack.c.bf16 %v10429_v31, %v10428_v30  ;;  %v15516_v39 = vld [vmem:[#allocation2 + $0x1a] sm:$0xff] }
 0x133   : > { %664 = vst.msk [vmem:[#allocation2 + $0x40] sm:$0xff] %vm655_vm5, %v647_v12  ;;  %v537_v40 = vadd.f32 %v11200_v36, %v15350_v14  ;;  %v896_v41 = vpop.f32.mrb[20].mxu0  ;;  %12187 = vmatmul.mubr.msk.f32.gmra.mrb[32].mxu1 %vm655_vm5, %v974_v38  ;;  %v15477_v23 = vld [vmem:[#allocation2 + $0x30] sm:$0xff]  ;;  %v10430_v12 = vld [vmem:[%s17868_s2 + $0xe0] sm:$0xff]  ;;  %v10431_v36 = vld [vmem:[%s17868_s2 + $0xe8] sm:$0xff] }
 0x134   : > { %v897_v43 = vadd.f32 %v896_v41, %v787_v32  ;;  %v12139_v44 = vpop.f32.mrb[21].mxu0  ;;  %v1312_v32 = vld [vmem:[#allocation2 + $0x2] sm:$0xff]  ;;  %v13915_v38 = vpack.c.bf16 %v10431_v36, %v10430_v12  ;;  %v10433_v41 = vld [vmem:[%s17868_s2 + $0xf8] sm:$0xff] }
 0x135   : > { %v652_v45 = vadd.f32 %v15355_v19, %v537_v40  ;;  %v802_v19 = vadd.f32 %v11260_v29, %v15350_v14  ;;  %v10432_v40 = vld [vmem:[%s17868_s2 + $0xf0] sm:$0xff]  ;;  %v10453_v12 = vld [vmem:[%s17868_s2 + $0x138] sm:$0xff] }
 0x136   : > { %940 = vst.msk [vmem:[#allocation2 + $0x50] sm:$0xff] %vm655_vm5, %v897_v43  ;;  %v975_v21 = vld [vmem:[#allocation2 + $0x31] sm:$0xff]  ;;  %v13919_v43 = vpack.c.bf16 %v10433_v41, %v10432_v40 }
 0x137   : > { %665 = vst.msk [vmem:[#allocation2 + $0x48] sm:$0xff] %vm655_vm5, %v652_v45  ;;  %v901_v46 = vpop.f32.mrb[22].mxu0  ;;  %12189 = vmatprep.mubr.msk.f32.mxu1 %vm655_vm5, %v975_v21  ;;  %v15481_v25 = vld [vmem:[#allocation2 + $0x38] sm:$0xff]  ;;  %v15530_v44 = vld [vmem:[#allocation2 + $0x2a] sm:$0xff]  ;;  %v10446_v45 = vld [vmem:[%s17868_s2 + $0x100] sm:$0xff] }
 0x138   : > { %v902_v48 = vadd.f32 %v901_v46, %v792_v42  ;;  %v12142_v49 = vpop.f32.mrb[23].mxu0  ;;  %v15526_v42 = vld [vmem:[#allocation2 + $0x22] sm:$0xff]  ;;  %v15540_v46 = vld [vmem:[#allocation2 + $0x32] sm:$0xff] }
 0x139   : > { %v10447_v21 = vld [vmem:[%s17868_s2 + $0x108] sm:$0xff] }
 0x13a   : > { %941 = vst.msk [vmem:[#allocation2 + $0x58] sm:$0xff] %vm655_vm5, %v902_v48  ;;  %v976_v50 = vld [vmem:[#allocation2 + $0x39] sm:$0xff] }
 0x13b   : > { %v906_v51 = vpop.f32.mrb[24].mxu0  ;;  %12190 = vmatmul.mubr.msk.f32.gmra.mrb[34].mxu1 %vm655_vm5, %v976_v50  ;;  %v15485_v26 = vld [vmem:[#allocation2 + $0x40] sm:$0xff]  ;;  %v11264_v50 = vpop.f32.mrb[20].mxu1 }
 0x13c   : > { %v907_v52 = vadd.f32 %v906_v51, %v797_v47  ;;  %v12145_v53 = vpop.f32.mrb[25].mxu0  ;;  %v13923_v47 = vpack.c.bf16 %v10447_v21, %v10446_v45  ;;  %v15544_v48 = vld [vmem:[#allocation2 + $0x3a] sm:$0xff]  ;;  %v11265_v51 = vpop.f32.mrb[21].mxu1  ;;  %v15600_v21 = vld [vmem:[#allocation2 + $0x2b] sm:$0xff] }
 0x13d   : > { %v15493_v28 = vld [vmem:[#allocation2 + $0x50] sm:$0xff] }
 0x13e   : > { %942 = vst.msk [vmem:[#allocation2 + $0x60] sm:$0xff] %vm655_vm5, %v907_v52  ;;  %v977_v54 = vld [vmem:[#allocation2 + $0x41] sm:$0xff]  ;;  %v978_v55 = vld [vmem:[#allocation2 + $0x49] sm:$0xff]  ;;  %v11266_v52 = vadd.f32 %v11265_v51, %v11264_v50 }
 0x13f   : > { %v911_v56 = vpop.f32.mrb[26].mxu0  ;;  %12192 = vmatprep.mubr.msk.f32.mxu1 %vm655_vm5, %v977_v54  ;;  %v15548_v49 = vld [vmem:[#allocation2 + $0x42] sm:$0xff] }
 0x140   : > { %v912_v57 = vadd.f32 %v911_v56, %v802_v19  ;;  %12193 = vmatmul.mubr.msk.f32.gmra.mrb[36].mxu1 %vm655_vm5, %v978_v55  ;;  %v12148_v59 = vpop.f32.mrb[27].mxu0  ;;  %v15552_v19 = vld [vmem:[#allocation2 + $0x4a] sm:$0xff]  ;;  %v812_v54 = vadd.f32 %v11266_v52, %v15350_v14  ;;  %v11267_v55 = vpop.f32.mrb[22].mxu1  ;;  %v15610_v52 = vld [vmem:[#allocation2 + $0x33] sm:$0xff] }
 0x141   : > { %v979_v60 = vld [vmem:[#allocation2 + $0x51] sm:$0xff]  ;;  %v11268_v56 = vpop.f32.mrb[23].mxu1  ;;  %v10467_v50 = vld [vmem:[%s17868_s2 + $0x148] sm:$0xff] }
 0x142   : > { %943 = vst.msk [vmem:[#allocation2 + $0x68] sm:$0xff] %vm655_vm5, %v912_v57  ;;  %12195 = vmatprep.mubr.msk.f32.mxu1 %vm655_vm5, %v979_v60  ;;  %v15497_v29 = vld [vmem:[#allocation2 + $0x58] sm:$0xff]  ;;  %v11269_v60 = vadd.f32 %v11268_v56, %v11267_v55 }
 0x143   : > { %v916_v61 = vpop.f32.mrb[28].mxu0  ;;  %v15556_v53 = vld [vmem:[#allocation2 + $0x52] sm:$0xff]  ;;  %v15615_v56 = vld [vmem:[#allocation2 + $0x3b] sm:$0xff] }
 0x144   : > { %v917_v62 = vadd.f32 %v916_v61, %v807_v58  ;;  %v12151_v63 = vpop.f32.mrb[29].mxu0  ;;  %v10448_v58 = vld [vmem:[%s17868_s2 + $0x110] sm:$0xff]  ;;  %v10449_v59 = vld [vmem:[%s17868_s2 + $0x118] sm:$0xff]  ;;  %v817_v2 = vadd.f32 %v11269_v60, %v15350_v14 }
 0x145   : > { %v15429_v0 = vld [vmem:[#allocation2 + $0x59] sm:$0xff] }
 0x146   : > { %12196 = vmatmul.mubr.msk.f32.gmra.mrb[38].mxu1 %vm655_vm5, %v15429_v0  ;;  %944 = vst.msk [vmem:[#allocation2 + $0x70] sm:$0xff] %vm655_vm5, %v917_v62  ;;  %v15561_v57 = vld [vmem:[#allocation2 + $0x5a] sm:$0xff]  ;;  %v1506_v62 = vld [vmem:[#allocation2 + $0x3] sm:$0xff] }
 0x147   : > { %12214 = vmatprep.mubr.msk.f32.mxu1 %vm655_vm5, %v949_v5  ;;  %v921_v61 = vpop.f32.mrb[30].mxu0  ;;  %v11270_v5 = vpop.f32.mrb[24].mxu1  ;;  %v15627_v60 = vld [vmem:[#allocation2 + $0x53] sm:$0xff] }
 0x148   : > { %v922_v63 = vadd.f32 %v921_v61, %v812_v54  ;;  %v12154_v1 = vpop.f32.mrb[31].mxu0  ;;  %v15631_v61 = vld [vmem:[#allocation2 + $0x5b] sm:$0xff] }
 0x149   : > { %v1700_v1 = vld [vmem:[#allocation2 + $0x4] sm:$0xff] }
 0x14a   : > { %12215 = vmatmul.mubr.msk.f32.vlgmr.msra.gmra.mrb[28].mxu1 %vm655_vm5, %v950_v6  ;;  %945 = vst.msk [vmem:[#allocation2 + $0x78] sm:$0xff] %vm655_vm5, %v922_v63  ;;  %v11271_v6 = vpop.f32.mrb[25].mxu1  ;;  %v10469_v63 = vld [vmem:[%s17868_s2 + $0x158] sm:$0xff] }
 0x14b   : > { %12217 = vmatprep.mubr.msk.f32.mxu1 %vm655_vm5, %v15448_v9  ;;  %13894 = vmatpush3.bf16.msra.mxu1 %v15403_v27  ;;  %v15489_v27 = vld [vmem:[#allocation2 + $0x48] sm:$0xff]  ;;  %v11272_v13 = vadd.f32 %v11271_v6, %v11270_v5  ;;  %v926_v16 = vpop.f32.mrb[32].mxu0  ;;  %v11273_v30 = vpop.f32.mrb[26].mxu1 }
 0x14c   : > { %13896 = vmatprep.subr.bf16.mxu1 %v13895_v3  ;;  %v927_v22 = vadd.f32 %v926_v16, %v817_v2  ;;  %v12157_v15 = vpop.f32.mrb[33].mxu0  ;;  %v1701_v5 = vld [vmem:[#allocation2 + $0xc] sm:$0xff]  ;;  %v10473_v16 = vld [vmem:[%s17868_s2 + $0x178] sm:$0xff] }
 0x14d   : > { %v10471_v6 = vld [vmem:[%s17868_s2 + $0x168] sm:$0xff] }
 0x14e   : > { %12218 = vmatmul.mubr.msk.f32.gmra.mrb[30].mxu1 %vm655_vm5, %v15453_v11  ;;  %946 = vst.msk [vmem:[#allocation2 + $0x80] sm:$0xff] %vm655_vm5, %v927_v22  ;;  %v15664_v15 = vld [vmem:[#allocation2 + $0x2c] sm:$0xff] }
 0x14f   : > { %12220 = vmatprep.mubr.msk.f32.mxu1 %vm655_vm5, %v15463_v17  ;;  %13898 = vmatpush3.bf16.msra.mxu1 %v13895_v3  ;;  %v13927_v3 = vpack.c.bf16 %v10449_v59, %v10448_v58  ;;  %v15619_v58 = vld [vmem:[#allocation2 + $0x43] sm:$0xff]  ;;  %v15623_v59 = vld [vmem:[#allocation2 + $0x4b] sm:$0xff] }
 0x150   : > { %13900 = vmatprep.subr.bf16.mxu1 %v13899_v10 }
 0x152   : > { %12221 = vmatmul.mubr.msk.f32.gmra.mrb[32].mxu1 %vm655_vm5, %v15467_v20 }
 0x153   : > { %12223 = vmatprep.mubr.msk.f32.mxu1 %vm655_vm5, %v15477_v23  ;;  %13902 = vmatpush3.bf16.msra.mxu1 %v13899_v10  ;;  %v10451_v10 = vld [vmem:[%s17868_s2 + $0x128] sm:$0xff] }
 0x154   : > { %13904 = vmatprep.subr.bf16.mxu1 %v13903_v18  ;;  %v13931_v31 = vpack.c.bf16 %v10451_v10, %v10450_v8  ;;  %v15650_v10 = vld [vmem:[#allocation2 + $0x1c] sm:$0xff] }
 0x156   : > { %12224 = vmatmul.mubr.msk.f32.gmra.mrb[34].mxu1 %vm655_vm5, %v15481_v25 }
 0x157   : > { %12226 = vmatprep.mubr.msk.f32.mxu1 %vm655_vm5, %v15485_v26  ;;  %13906 = vmatpush3.bf16.msra.mxu1 %v13903_v18  ;;  %v1508_v18 = vld [vmem:[#allocation2 + $0x13] sm:$0xff] }
 0x158   : > { %13908 = vmatprep.subr.bf16.mxu1 %v13907_v24 }
 0x15a   : > { %12227 = vmatmul.mubr.msk.f32.gmra.mrb[36].mxu1 %vm655_vm5, %v15489_v27 }
 0x15b   : > { %12229 = vmatprep.mubr.msk.f32.mxu1 %vm655_vm5, %v15493_v28 }
 0x15e   : > { %12230 = vmatmul.mubr.msk.f32.gmra.mrb[38].mxu1 %vm655_vm5, %v15497_v29 }
 0x15f   : > { %12248 = vmatprep.mubr.msk.f32.mxu1 %vm655_vm5, %v1312_v32  ;;  %v11274_v32 = vpop.f32.mrb[27].mxu1 }
 0x160   : > { %v11275_v36 = vadd.f32 %v11274_v32, %v11273_v30  ;;  %v10487_v30 = vld [vmem:[%s17868_s2 + $0x188] sm:$0xff] }
 0x162   : > { %12249 = vmatmul.mubr.msk.f32.vlgmr.msra.gmra.mrb[28].mxu1 %vm655_vm5, %v1313_v34  ;;  %v10452_v34 = vld [vmem:[%s17868_s2 + $0x130] sm:$0xff] }
 0x163   : > { %12251 = vmatprep.mubr.msk.f32.mxu1 %vm655_vm5, %v1314_v37  ;;  %13910 = vmatpush3.bf16.msra.mxu1 %v13907_v24  ;;  %v822_v24 = vadd.f32 %v11272_v13, %v15350_v14  ;;  %v931_v37 = vpop.f32.mrb[34].mxu0  ;;  %v13935_v45 = vpack.c.bf16 %v10453_v12, %v10452_v34  ;;  %v10472_v13 = vld [vmem:[%s17868_s2 + $0x170] sm:$0xff]  ;;  %v15678_v34 = vld [vmem:[#allocation2 + $0x3c] sm:$0xff]  ;;  %v15682_v12 = vld [vmem:[#allocation2 + $0x44] sm:$0xff] }
 0x164   : > { %13912 = vmatprep.subr.bf16.mxu1 %v13911_v33  ;;  %v12160_v41 = vpop.f32.mrb[35].mxu0  ;;  %v13951_v22 = vpack.c.bf16 %v10473_v16, %v10472_v13  ;;  %v10510_v13 = vld [vmem:[%s17868_s2 + $0x1e0] sm:$0xff]  ;;  %v10511_v16 = vld [vmem:[%s17868_s2 + $0x1e8] sm:$0xff] }
 0x165   : > { %v932_v40 = vadd.f32 %v931_v37, %v822_v24  ;;  %v936_v51 = vpop.f32.mrb[36].mxu0  ;;  %v10486_v24 = vld [vmem:[%s17868_s2 + $0x180] sm:$0xff]  ;;  %v15690_v37 = vld [vmem:[#allocation2 + $0x54] sm:$0xff] }
 0x166   : > { %12252 = vmatmul.mubr.msk.f32.gmra.mrb[30].mxu1 %vm655_vm5, %v15516_v39  ;;  %v12163_v54 = vpop.f32.mrb[37].mxu0  ;;  %v13955_v32 = vpack.c.bf16 %v10487_v30, %v10486_v24  ;;  %v10488_v41 = vld [vmem:[%s17868_s2 + $0x190] sm:$0xff]  ;;  %v13979_v24 = vpack.c.bf16 %v10511_v16, %v10510_v13  ;;  %v15761_v30 = vld [vmem:[#allocation2 + $0x25] sm:$0xff] }
 0x167   : > { %12254 = vmatprep.mubr.msk.f32.mxu1 %vm655_vm5, %v15526_v42  ;;  %13914 = vmatpush3.bf16.msra.mxu1 %v13911_v33  ;;  %v15584_v33 = vld [vmem:[#allocation2 + $0x1b] sm:$0xff]  ;;  %947 = vst.msk [vmem:[#allocation2 + $0x88] sm:$0xff] %vm655_vm5, %v932_v40 }
 0x168   : > { %13916 = vmatprep.subr.bf16.mxu1 %v13915_v38  ;;  %v15694_v40 = vld [vmem:[#allocation2 + $0x5c] sm:$0xff] }
 0x169   : > { %v10493_v54 = vld [vmem:[%s17868_s2 + $0x1b8] sm:$0xff]  ;;  %v10530_v16 = vld [vmem:[%s17868_s2 + $0x220] sm:$0xff] }
 0x16a   : > { %12255 = vmatmul.mubr.msk.f32.gmra.mrb[32].mxu1 %vm655_vm5, %v15530_v44  ;;  %v2283_v13 = vld [vmem:[#allocation2 + $0x16] sm:$0xff] }
 0x16b   : > { %12257 = vmatprep.mubr.msk.f32.mxu1 %vm655_vm5, %v15540_v46  ;;  %13918 = vmatpush3.bf16.msra.mxu1 %v13915_v38  ;;  %v15594_v38 = vld [vmem:[#allocation2 + $0x23] sm:$0xff] }
 0x16c   : > { %13920 = vmatprep.subr.bf16.mxu1 %v13919_v43 }
 0x16e   : > { %12258 = vmatmul.mubr.msk.f32.gmra.mrb[34].mxu1 %vm655_vm5, %v15544_v48 }
 0x16f   : > { %12260 = vmatprep.mubr.msk.f32.mxu1 %vm655_vm5, %v15548_v49  ;;  %13922 = vmatpush3.bf16.msra.mxu1 %v13919_v43  ;;  %v827_v43 = vadd.f32 %v11275_v36, %v15350_v14  ;;  %v15686_v36 = vld [vmem:[#allocation2 + $0x4c] sm:$0xff] }
 0x170   : > { %13924 = vmatprep.subr.bf16.mxu1 %v13923_v47 }
 0x171   : > { %v937_v14 = vadd.f32 %v936_v51, %v827_v43  ;;  %v10489_v43 = vld [vmem:[%s17868_s2 + $0x198] sm:$0xff] }
 0x172   : > { %12261 = vmatmul.mubr.msk.f32.gmra.mrb[36].mxu1 %vm655_vm5, %v15552_v19 }
 0x173   : > { %12263 = vmatprep.mubr.msk.f32.mxu1 %vm655_vm5, %v15556_v53  ;;  %948 = vst.msk [vmem:[#allocation2 + $0x90] sm:$0xff] %vm655_vm5, %v937_v14  ;;  %v10492_v14 = vld [vmem:[%s17868_s2 + $0x1b0] sm:$0xff] }
 0x176   : > { %12264 = vmatmul.mubr.msk.f32.gmra.mrb[38].mxu1 %vm655_vm5, %v15561_v57 }
 0x177   : > { %12282 = vmatprep.mubr.msk.f32.mxu1 %vm655_vm5, %v1506_v62  ;;  %v10468_v62 = vld [vmem:[%s17868_s2 + $0x150] sm:$0xff] }
 0x178   : > { %v13943_v2 = vpack.c.bf16 %v10469_v63, %v10468_v62  ;;  %v10506_v62 = vld [vmem:[%s17868_s2 + $0x1c0] sm:$0xff]  ;;  %v10507_v63 = vld [vmem:[%s17868_s2 + $0x1c8] sm:$0xff] }
 0x17a   : > { %12283 = vmatmul.mubr.msk.f32.vlgmr.msra.gmra.mrb[28].mxu1 %vm655_vm5, %v1507_v7  ;;  %v1702_v7 = vld [vmem:[#allocation2 + $0x14] sm:$0xff] }
 0x17b   : > { %12285 = vmatprep.mubr.msk.f32.mxu1 %vm655_vm5, %v1508_v18  ;;  %13926 = vmatpush3.bf16.msra.mxu1 %v13923_v47  ;;  %v10466_v47 = vld [vmem:[%s17868_s2 + $0x140] sm:$0xff] }
 0x17c   : > { %13928 = vmatprep.subr.bf16.mxu1 %v13927_v3  ;;  %v13939_v55 = vpack.c.bf16 %v10467_v50, %v10466_v47  ;;  %v15660_v18 = vld [vmem:[#allocation2 + $0x24] sm:$0xff] }
 0x17d   : > { %v10490_v47 = vld [vmem:[%s17868_s2 + $0x1a0] sm:$0xff]  ;;  %v10491_v50 = vld [vmem:[%s17868_s2 + $0x1a8] sm:$0xff] }
 0x17e   : > { %12286 = vmatmul.mubr.msk.f32.gmra.mrb[30].mxu1 %vm655_vm5, %v15584_v33  ;;  %v13963_v51 = vpack.c.bf16 %v10491_v50, %v10490_v47  ;;  %v15775_v47 = vld [vmem:[#allocation2 + $0x35] sm:$0xff]  ;;  %v10526_v50 = vld [vmem:[%s17868_s2 + $0x200] sm:$0xff] }
 0x17f   : > { %12288 = vmatprep.mubr.msk.f32.mxu1 %vm655_vm5, %v15594_v38  ;;  %13930 = vmatpush3.bf16.msra.mxu1 %v13927_v3  ;;  %v10470_v3 = vld [vmem:[%s17868_s2 + $0x160] sm:$0xff] }
 0x180   : > { %13932 = vmatprep.subr.bf16.mxu1 %v13931_v31  ;;  %v13947_v8 = vpack.c.bf16 %v10471_v6, %v10470_v3  ;;  %v10509_v3 = vld [vmem:[%s17868_s2 + $0x1d8] sm:$0xff]  ;;  %v2088_v6 = vld [vmem:[#allocation2 + $0xd] sm:$0xff] }
 0x182   : > { %12289 = vmatmul.mubr.msk.f32.gmra.mrb[32].mxu1 %vm655_vm5, %v15600_v21 }
 0x183   : > { %12291 = vmatprep.mubr.msk.f32.mxu1 %vm655_vm5, %v15610_v52  ;;  %13934 = vmatpush3.bf16.msra.mxu1 %v13931_v31  ;;  %v15674_v31 = vld [vmem:[#allocation2 + $0x34] sm:$0xff] }
 0x184   : > { %13936 = vmatprep.subr.bf16.mxu1 %v13935_v45 }
 0x186   : > { %12292 = vmatmul.mubr.msk.f32.gmra.mrb[34].mxu1 %vm655_vm5, %v15615_v56 }
 0x187   : > { %12294 = vmatprep.mubr.msk.f32.mxu1 %vm655_vm5, %v15619_v58  ;;  %13938 = vmatpush3.bf16.msra.mxu1 %v13935_v45  ;;  %v13959_v45 = vpack.c.bf16 %v10489_v43, %v10488_v41  ;;  %v10513_v41 = vld [vmem:[%s17868_s2 + $0x1f8] sm:$0xff]  ;;  %v15771_v43 = vld [vmem:[#allocation2 + $0x2d] sm:$0xff] }
 0x188   : > { %13940 = vmatprep.subr.bf16.mxu1 %v13939_v55 }
 0x18a   : > { %12295 = vmatmul.mubr.msk.f32.gmra.mrb[36].mxu1 %vm655_vm5, %v15623_v59 }
 0x18b   : > { %12297 = vmatprep.mubr.msk.f32.mxu1 %vm655_vm5, %v15627_v60 }
 0x18e   : > { %12298 = vmatmul.mubr.msk.f32.gmra.mrb[38].mxu1 %vm655_vm5, %v15631_v61 }
 0x18f   : > { %12316 = vmatprep.mubr.msk.f32.mxu1 %vm655_vm5, %v1700_v1  ;;  %v13971_v1 = vpack.c.bf16 %v10507_v63, %v10506_v62  ;;  %v15793_v62 = vld [vmem:[#allocation2 + $0x4d] sm:$0xff]  ;;  %v15797_v63 = vld [vmem:[#allocation2 + $0x55] sm:$0xff] }
 0x192   : > { %12317 = vmatmul.mubr.msk.f32.vlgmr.msra.gmra.mrb[28].mxu1 %vm655_vm5, %v1701_v5 }
 0x193   : > { %12319 = vmatprep.mubr.msk.f32.mxu1 %vm655_vm5, %v1702_v7  ;;  %13942 = vmatpush3.bf16.msra.mxu1 %v13939_v55  ;;  %v13967_v55 = vpack.c.bf16 %v10493_v54, %v10492_v14  ;;  %v15785_v14 = vld [vmem:[#allocation2 + $0x3d] sm:$0xff] }
 0x194   : > { %13944 = vmatprep.subr.bf16.mxu1 %v13943_v2 }
 0x196   : > { %12320 = vmatmul.mubr.msk.f32.gmra.mrb[30].mxu1 %vm655_vm5, %v15650_v10 }
 0x197   : > { %12322 = vmatprep.mubr.msk.f32.mxu1 %vm655_vm5, %v15660_v18  ;;  %13946 = vmatpush3.bf16.msra.mxu1 %v13943_v2  ;;  %v15742_v2 = vld [vmem:[#allocation2 + $0x64] sm:$0xff] }
 0x198   : > { %13948 = vmatprep.subr.bf16.mxu1 %v13947_v8 }
 0x19a   : > { %12323 = vmatmul.mubr.msk.f32.gmra.mrb[32].mxu1 %vm655_vm5, %v15664_v15 }
 0x19b   : > { %12325 = vmatprep.mubr.msk.f32.mxu1 %vm655_vm5, %v15674_v31  ;;  %13950 = vmatpush3.bf16.msra.mxu1 %v13947_v8  ;;  %v2089_v8 = vld [vmem:[#allocation2 + $0x15] sm:$0xff] }
 0x19c   : > { %13952 = vmatprep.subr.bf16.mxu1 %v13951_v22 }
 0x19e   : > { %12326 = vmatmul.mubr.msk.f32.gmra.mrb[34].mxu1 %vm655_vm5, %v15678_v34 }
 0x19f   : > { %12328 = vmatprep.mubr.msk.f32.mxu1 %vm655_vm5, %v15682_v12  ;;  %13954 = vmatpush3.bf16.msra.mxu1 %v13951_v22  ;;  %v2090_v22 = vld [vmem:[#allocation2 + $0x1d] sm:$0xff] }
 0x1a0   : > { %13956 = vmatprep.subr.bf16.mxu1 %v13955_v32 }
 0x1a2   : > { %12329 = vmatmul.mubr.msk.f32.gmra.mrb[36].mxu1 %vm655_vm5, %v15686_v36 }
 0x1a3   : > { %12331 = vmatprep.mubr.msk.f32.mxu1 %vm655_vm5, %v15690_v37 }
 0x1a6   : > { %12332 = vmatmul.mubr.msk.f32.gmra.mrb[38].mxu1 %vm655_vm5, %v15694_v40 }
 0x1a7   : > { %12350 = vmatprep.mubr.msk.f32.mxu1 %vm655_vm5, %v1701_v5  ;;  %v10508_v5 = vld [vmem:[%s17868_s2 + $0x1d0] sm:$0xff] }
 0x1aa   : > { %12351 = vmatmul.mubr.msk.f32.vlgmr.msra.gmra.mrb[28].mxu1 %vm655_vm5, %v1702_v7  ;;  %v13975_v7 = vpack.c.bf16 %v10509_v3, %v10508_v5  ;;  %v15805_v5 = vld [vmem:[#allocation2 + $0x65] sm:$0xff]  ;;  %v10528_v3 = vld [vmem:[%s17868_s2 + $0x210] sm:$0xff] }
 0x1ab   : > { %12353 = vmatprep.mubr.msk.f32.mxu1 %vm655_vm5, %v15650_v10  ;;  %13958 = vmatpush3.bf16.msra.mxu1 %v13955_v32  ;;  %v10512_v32 = vld [vmem:[%s17868_s2 + $0x1f0] sm:$0xff] }
 0x1ac   : > { %13960 = vmatprep.subr.bf16.mxu1 %v13959_v45 }
 0x1ae   : > { %12354 = vmatmul.mubr.msk.f32.gmra.mrb[30].mxu1 %vm655_vm5, %v15660_v18 }
 0x1af   : > { %12356 = vmatprep.mubr.msk.f32.mxu1 %vm655_vm5, %v15664_v15  ;;  %13962 = vmatpush3.bf16.msra.mxu1 %v13959_v45  ;;  %v13983_v45 = vpack.c.bf16 %v10513_v41, %v10512_v32  ;;  %v15824_v41 = vld [vmem:[#allocation2 + $0x26] sm:$0xff] }
 0x1b0   : > { %13964 = vmatprep.subr.bf16.mxu1 %v13963_v51 }
 0x1b2   : > { %12357 = vmatmul.mubr.msk.f32.gmra.mrb[32].mxu1 %vm655_vm5, %v15674_v31 }
 0x1b3   : > { %12359 = vmatprep.mubr.msk.f32.mxu1 %vm655_vm5, %v15678_v34  ;;  %13966 = vmatpush3.bf16.msra.mxu1 %v13963_v51  ;;  %v10527_v51 = vld [vmem:[%s17868_s2 + $0x208] sm:$0xff] }
 0x1b4   : > { %13968 = vmatprep.subr.bf16.mxu1 %v13967_v55  ;;  %v13987_v54 = vpack.c.bf16 %v10527_v51, %v10526_v50  ;;  %v10533_v50 = vld [vmem:[%s17868_s2 + $0x238] sm:$0xff]  ;;  %v15834_v51 = vld [vmem:[#allocation2 + $0x2e] sm:$0xff] }
 0x1b6   : > { %12360 = vmatmul.mubr.msk.f32.gmra.mrb[34].mxu1 %vm655_vm5, %v15682_v12 }
 0x1b7   : > { %12362 = vmatprep.mubr.msk.f32.mxu1 %vm655_vm5, %v15686_v36  ;;  %13970 = vmatpush3.bf16.msra.mxu1 %v13967_v55  ;;  %v15789_v55 = vld [vmem:[#allocation2 + $0x45] sm:$0xff] }
 0x1b8   : > { %13972 = vmatprep.subr.bf16.mxu1 %v13971_v1 }
 0x1ba   : > { %12363 = vmatmul.mubr.msk.f32.gmra.mrb[36].mxu1 %vm655_vm5, %v15690_v37 }
 0x1bb   : > { %12365 = vmatprep.mubr.msk.f32.mxu1 %vm655_vm5, %v15694_v40 }
 0x1be   : > { %12366 = vmatmul.mubr.msk.f32.gmra.mrb[38].mxu1 %vm655_vm5, %v15742_v2 }
 0x1bf   : > { %12384 = vmatprep.mubr.msk.f32.mxu1 %vm655_vm5, %v2088_v6  ;;  %v10529_v6 = vld [vmem:[%s17868_s2 + $0x218] sm:$0xff] }
 0x1c2   : > { %12385 = vmatmul.mubr.msk.f32.vlgmr.msra.gmra.mrb[28].mxu1 %vm655_vm5, %v2089_v8  ;;  %v13991_v8 = vpack.c.bf16 %v10529_v6, %v10528_v3  ;;  %v15838_v3 = vld [vmem:[#allocation2 + $0x36] sm:$0xff]  ;;  %v10546_v6 = vld [vmem:[%s17868_s2 + $0x240] sm:$0xff] }
 0x1c3   : > { %12387 = vmatprep.mubr.msk.f32.mxu1 %vm655_vm5, %v2090_v22  ;;  %13974 = vmatpush3.bf16.msra.mxu1 %v13971_v1  ;;  %v15801_v1 = vld [vmem:[#allocation2 + $0x5d] sm:$0xff]  ;;  %v10531_v22 = vld [vmem:[%s17868_s2 + $0x228] sm:$0xff] }
 0x1c4   : > { %13976 = vmatprep.subr.bf16.mxu1 %v13975_v7  ;;  %v13995_v32 = vpack.c.bf16 %v10531_v22, %v10530_v16  ;;  %v15852_v16 = vld [vmem:[#allocation2 + $0x46] sm:$0xff]  ;;  %v15856_v22 = vld [vmem:[#allocation2 + $0x4e] sm:$0xff] }
 0x1c5   : > { %17893 = vst [vmem:[#allocation8_spill] sm:$0xff] %v15856_v22 }
 0x1c6   : > { %12388 = vmatmul.mubr.msk.f32.gmra.mrb[30].mxu1 %vm655_vm5, %v15761_v30 }
 0x1c7   : > { %12390 = vmatprep.mubr.msk.f32.mxu1 %vm655_vm5, %v15771_v43  ;;  %13978 = vmatpush3.bf16.msra.mxu1 %v13975_v7  ;;  %v2282_v7 = vld [vmem:[#allocation2 + $0xe] sm:$0xff] }
 0x1c8   : > { %13980 = vmatprep.subr.bf16.mxu1 %v13979_v24 }
 0x1ca   : > { %12391 = vmatmul.mubr.msk.f32.gmra.mrb[32].mxu1 %vm655_vm5, %v15775_v47 }
 0x1cb   : > { %12393 = vmatprep.mubr.msk.f32.mxu1 %vm655_vm5, %v15785_v14  ;;  %13982 = vmatpush3.bf16.msra.mxu1 %v13979_v24  ;;  %v2284_v24 = vld [vmem:[#allocation2 + $0x1e] sm:$0xff] }
 0x1cc   : > { %13984 = vmatprep.subr.bf16.mxu1 %v13983_v45 }
 0x1ce   : > { %12394 = vmatmul.mubr.msk.f32.gmra.mrb[34].mxu1 %vm655_vm5, %v15789_v55 }
 0x1cf   : > { %12396 = vmatprep.mubr.msk.f32.mxu1 %vm655_vm5, %v15793_v62  ;;  %13986 = vmatpush3.bf16.msra.mxu1 %v13983_v45  ;;  %v10532_v45 = vld [vmem:[%s17868_s2 + $0x230] sm:$0xff] }
 0x1d0   : > { %13988 = vmatprep.subr.bf16.mxu1 %v13987_v54 }
 0x1d2   : > { %12397 = vmatmul.mubr.msk.f32.gmra.mrb[36].mxu1 %vm655_vm5, %v15797_v63 }
 0x1d3   : > { %12399 = vmatprep.mubr.msk.f32.mxu1 %vm655_vm5, %v15801_v1 }
 0x1d6   : > { %12400 = vmatmul.mubr.msk.f32.gmra.mrb[38].mxu1 %vm655_vm5, %v15805_v5 }
 0x1d7   : > { %12418 = vmatprep.mubr.msk.f32.mxu1 %vm655_vm5, %v2282_v7  ;;  %v10547_v7 = vld [vmem:[%s17868_s2 + $0x248] sm:$0xff] }
 0x1da   : > { %12419 = vmatmul.mubr.msk.f32.vlgmr.msra.gmra.mrb[28].mxu1 %vm655_vm5, %v2283_v13  ;;  %v15848_v13 = vld [vmem:[#allocation2 + $0x3e] sm:$0xff] }
 0x1db   : > { %12421 = vmatprep.mubr.msk.f32.mxu1 %vm655_vm5, %v2284_v24  ;;  %13990 = vmatpush3.bf16.msra.mxu1 %v13987_v54  ;;  %v13999_v54 = vpack.c.bf16 %v10533_v50, %v10532_v45  ;;  %v15860_v24 = vld [vmem:[#allocation2 + $0x56] sm:$0xff]  ;;  %v15868_v45 = vld [vmem:[#allocation2 + $0x66] sm:$0xff] }
 0x1dc   : > { %13992 = vmatprep.subr.bf16.mxu1 %v13991_v8  ;;  %17894 = vst [vmem:[#allocation9_spill] sm:$0xff] %v15860_v24  ;;  %17896 = vst [vmem:[#allocation11_spill] sm:$0xff] %v15868_v45  ;;  %v10548_v50 = vld [vmem:[%s17868_s2 + $0x250] sm:$0xff] }
 0x1de   : > { %12422 = vmatmul.mubr.msk.f32.gmra.mrb[30].mxu1 %vm655_vm5, %v15824_v41 }
 0x1df   : > { %12424 = vmatprep.mubr.msk.f32.mxu1 %vm655_vm5, %v15834_v51  ;;  %13994 = vmatpush3.bf16.msra.mxu1 %v13991_v8  ;;  %v14003_v8 = vpack.c.bf16 %v10547_v7, %v10546_v6  ;;  %v2476_v6 = vld [vmem:[#allocation2 + $0xf] sm:$0xff] }
 0x1e0   : > { %13996 = vmatprep.subr.bf16.mxu1 %v13995_v32 }
 0x1e2   : > { %12425 = vmatmul.mubr.msk.f32.gmra.mrb[32].mxu1 %vm655_vm5, %v15838_v3 }
 0x1e3   : > { %12427 = vmatprep.mubr.msk.f32.mxu1 %vm655_vm5, %v15848_v13  ;;  %13998 = vmatpush3.bf16.msra.mxu1 %v13995_v32  ;;  %v15864_v32 = vld [vmem:[#allocation2 + $0x5e] sm:$0xff] }
 0x1e4   : > { %14000 = vmatprep.subr.bf16.mxu1 %v13999_v54  ;;  %17895 = vst [vmem:[#allocation10_spill] sm:$0xff] %v15864_v32 }
 0x1e6   : > { %12428 = vmatmul.mubr.msk.f32.gmra.mrb[34].mxu1 %vm655_vm5, %v15852_v16 }
 0x1e7   : > { %12430 = vmatprep.mubr.msk.f32.mxu1 %vm655_vm5, %v15856_v22  ;;  %14002 = vmatpush3.bf16.msra.mxu1 %v13999_v54  ;;  %v10549_v54 = vld [vmem:[%s17868_s2 + $0x258] sm:$0xff]  ;;  %v15887_v22 = vld [vmem:[#allocation2 + $0x27] sm:$0xff] }
 0x1e8   : > { %14004 = vmatprep.subr.bf16.mxu1 %v14003_v8  ;;  %v14007_v7 = vpack.c.bf16 %v10549_v54, %v10548_v50  ;;  %v10552_v50 = vld [vmem:[%s17868_s2 + $0x270] sm:$0xff]  ;;  %v10553_v54 = vld [vmem:[%s17868_s2 + $0x278] sm:$0xff] }
 0x1ea   : > { %12431 = vmatmul.mubr.msk.f32.gmra.mrb[36].mxu1 %vm655_vm5, %v15860_v24  ;;  %v2478_v24 = vld [vmem:[#allocation2 + $0x1f] sm:$0xff] }
 0x1eb   : > { %12433 = vmatprep.mubr.msk.f32.mxu1 %vm655_vm5, %v15864_v32  ;;  %v10551_v32 = vld [vmem:[%s17868_s2 + $0x268] sm:$0xff] }
 0x1ee   : > { %12434 = vmatmul.mubr.msk.f32.gmra.mrb[38].mxu1 %vm655_vm5, %v15868_v45  ;;  %v14011_v45 = vpack.c.bf16 %v10551_v32, %v10550_v4  ;;  %v14015_v4 = vpack.c.bf16 %v10553_v54, %v10552_v50  ;;  %v10567_v32 = vld [vmem:[%s17868_s2 + $0x288] sm:$0xff] }
 0x1ef   : > { %12452 = vmatprep.mubr.msk.f32.mxu1 %vm655_vm5, %v2476_v6  ;;  %v15911_v6 = vld [vmem:[#allocation2 + $0x3f] sm:$0xff]  ;;  %v15915_v50 = vld [vmem:[#allocation2 + $0x47] sm:$0xff]  ;;  %v15919_v54 = vld [vmem:[#allocation2 + $0x4f] sm:$0xff] }
 0x1f0   : > { %17898 = vst [vmem:[#allocation13_spill] sm:$0xff] %v15915_v50  ;;  %17899 = vst [vmem:[#allocation14_spill] sm:$0xff] %v15919_v54 }
 0x1f2   : > { %12453 = vmatmul.mubr.msk.f32.vlgmr.msra.gmra.mrb[28].mxu1 %vm655_vm5, %v2477_v35  ;;  %v15897_v35 = vld [vmem:[#allocation2 + $0x2f] sm:$0xff] }
 0x1f3   : > { %12455 = vmatprep.mubr.msk.f32.mxu1 %vm655_vm5, %v2478_v24  ;;  %14006 = vmatpush3.bf16.msra.mxu1 %v14003_v8  ;;  %v15901_v8 = vld [vmem:[#allocation2 + $0x37] sm:$0xff]  ;;  %v10566_v24 = vld [vmem:[%s17868_s2 + $0x280] sm:$0xff] }
 0x1f4   : > { %14008 = vmatprep.subr.bf16.mxu1 %v14007_v7  ;;  %17897 = vst [vmem:[#allocation12_spill] sm:$0xff] %v15901_v8 }
 0x1f6   : > { %12456 = vmatmul.mubr.msk.f32.gmra.mrb[30].mxu1 %vm655_vm5, %v15887_v22 }
 0x1f7   : > { %12458 = vmatprep.mubr.msk.f32.mxu1 %vm655_vm5, %v15897_v35  ;;  %14010 = vmatpush3.bf16.msra.mxu1 %v14007_v7  ;;  %v14019_v7 = vpack.c.bf16 %v10567_v32, %v10566_v24  ;;  %v15931_v24 = vld [vmem:[#allocation2 + $0x67] sm:$0xff]  ;;  %v10568_v32 = vld [vmem:[%s17868_s2 + $0x290] sm:$0xff] }
 0x1f8   : > { %14012 = vmatprep.subr.bf16.mxu1 %v14011_v45  ;;  %17902 = vst [vmem:[#allocation17_spill] sm:$0xff] %v15931_v24 }
 0x1fa   : > { %12459 = vmatmul.mubr.msk.f32.gmra.mrb[32].mxu1 %vm655_vm5, %v15901_v8  ;;  %v15923_v8 = vld [vmem:[#allocation2 + $0x57] sm:$0xff] }
 0x1fb   : > { %12461 = vmatprep.mubr.msk.f32.mxu1 %vm655_vm5, %v15911_v6  ;;  %14014 = vmatpush3.bf16.msra.mxu1 %v14011_v45  ;;  %17900 = vst [vmem:[#allocation15_spill] sm:$0xff] %v15923_v8  ;;  %v15927_v45 = vld [vmem:[#allocation2 + $0x5f] sm:$0xff] }
 0x1fc   : > { %14016 = vmatprep.subr.bf16.mxu1 %v14015_v4  ;;  %17901 = vst [vmem:[#allocation16_spill] sm:$0xff] %v15927_v45 }
 0x1fe   : > { %12462 = vmatmul.mubr.msk.f32.gmra.mrb[34].mxu1 %vm655_vm5, %v15915_v50 }
 0x1ff   : > { %12464 = vmatprep.mubr.msk.f32.mxu1 %vm655_vm5, %v15919_v54  ;;  %14018 = vmatpush3.bf16.msra.mxu1 %v14015_v4  ;;  %v10569_v4 = vld [vmem:[%s17868_s2 + $0x298] sm:$0xff]  ;;  %v10571_v54 = vld [vmem:[%s17868_s2 + $0x2a8] sm:$0xff] }
 0x200   : > { %14020 = vmatprep.subr.bf16.mxu1 %v14019_v7 }
 0x202   : > { %12465 = vmatmul.mubr.msk.f32.gmra.mrb[36].mxu1 %vm655_vm5, %v15923_v8  ;;  %v14023_v8 = vpack.c.bf16 %v10569_v4, %v10568_v32  ;;  %v10573_v32 = vld [vmem:[%s17868_s2 + $0x2b8] sm:$0xff] }
 0x203   : > { %12467 = vmatprep.mubr.msk.f32.mxu1 %vm655_vm5, %v15927_v45  ;;  %v10570_v45 = vld [vmem:[%s17868_s2 + $0x2a0] sm:$0xff] }
 0x206   : > { %12468 = vmatmul.mubr.msk.f32.gmra.mrb[38].mxu1 %vm655_vm5, %v15931_v24  ;;  %v14027_v24 = vpack.c.bf16 %v10571_v54, %v10570_v45  ;;  %v10587_v54 = vld [vmem:[%s17868_s2 + $0x2c8] sm:$0xff] }
 0x207   : > { %12486 = vmatprep.mubr.msk.f32.mxu1 %vm655_vm5, %v15448_v9  ;;  %v10572_v9 = vld [vmem:[%s17868_s2 + $0x2b0] sm:$0xff] }
 0x208   : > { %v14031_v4 = vpack.c.bf16 %v10573_v32, %v10572_v9  ;;  %v15983_v9 = vld [vmem:[#allocation2 + $0x68] sm:$0xff]  ;;  %v10589_v32 = vld [vmem:[%s17868_s2 + $0x2d8] sm:$0xff] }
 0x20a   : > { %12487 = vmatmul.mubr.msk.f32.vlgmr.msra.gmra.mrb[28].mxu1 %vm655_vm5, %v15453_v11 }
 0x20b   : > { %12489 = vmatprep.mubr.msk.f32.mxu1 %vm655_vm5, %v15463_v17  ;;  %14022 = vmatpush3.bf16.msra.mxu1 %v14019_v7  ;;  %v10586_v7 = vld [vmem:[%s17868_s2 + $0x2c0] sm:$0xff] }
 0x20c   : > { %14024 = vmatprep.subr.bf16.mxu1 %v14023_v8  ;;  %v14035_v45 = vpack.c.bf16 %v10587_v54, %v10586_v7  ;;  %v10590_v7 = vld [vmem:[%s17868_s2 + $0x2e0] sm:$0xff]  ;;  %v10591_v54 = vld [vmem:[%s17868_s2 + $0x2e8] sm:$0xff] }
 0x20d   : > { %v14043_v50 = vpack.c.bf16 %v10591_v54, %v10590_v7  ;;  %v3060_v7 = vld [vmem:[#allocation2 + $0x29] sm:$0xff] }
 0x20e   : > { %12490 = vmatmul.mubr.msk.f32.gmra.mrb[30].mxu1 %vm655_vm5, %v15467_v20 }
 0x20f   : > { %12492 = vmatprep.mubr.msk.f32.mxu1 %vm655_vm5, %v15477_v23  ;;  %14026 = vmatpush3.bf16.msra.mxu1 %v14023_v8  ;;  %v15979_v8 = vld [vmem:[#allocation2 + $0x60] sm:$0xff] }
 0x210   : > { %14028 = vmatprep.subr.bf16.mxu1 %v14027_v24 }
 0x212   : > { %12493 = vmatmul.mubr.msk.f32.gmra.mrb[32].mxu1 %vm655_vm5, %v15481_v25 }
 0x213   : > { %12495 = vmatprep.mubr.msk.f32.mxu1 %vm655_vm5, %v15485_v26  ;;  %14030 = vmatpush3.bf16.msra.mxu1 %v14027_v24  ;;  %v10588_v24 = vld [vmem:[%s17868_s2 + $0x2d0] sm:$0xff] }
 0x214   : > { %14032 = vmatprep.subr.bf16.mxu1 %v14031_v4 }
 0x216   : > { %12496 = vmatmul.mubr.msk.f32.gmra.mrb[34].mxu1 %vm655_vm5, %v15489_v27 }
 0x217   : > { %12498 = vmatprep.mubr.msk.f32.mxu1 %vm655_vm5, %v15493_v28  ;;  %14034 = vmatpush3.bf16.msra.mxu1 %v14031_v4  ;;  %v14039_v4 = vpack.c.bf16 %v10589_v32, %v10588_v24  ;;  %v10593_v24 = vld [vmem:[%s17868_s2 + $0x2f8] sm:$0xff]  ;;  %v10610_v32 = vld [vmem:[%s17868_s2 + $0x320] sm:$0xff] }
 0x218   : > { %14036 = vmatprep.subr.bf16.mxu1 %v14035_v45 }
 0x21a   : > { %12499 = vmatmul.mubr.msk.f32.gmra.mrb[36].mxu1 %vm655_vm5, %v15497_v29 }
 0x21b   : > { %12501 = vmatprep.mubr.msk.f32.mxu1 %vm655_vm5, %v15979_v8 }
 0x21e   : > { %12502 = vmatmul.mubr.msk.f32.gmra.mrb[38].mxu1 %vm655_vm5, %v15983_v9 }
 0x21f   : > { %12520 = vmatprep.mubr.msk.f32.mxu1 %vm655_vm5, %v15453_v11  ;;  %v10592_v11 = vld [vmem:[%s17868_s2 + $0x2f0] sm:$0xff] }
 0x222   : > { %12521 = vmatmul.mubr.msk.f32.vlgmr.msra.gmra.mrb[28].mxu1 %vm655_vm5, %v15463_v17  ;;  %v14047_v17 = vpack.c.bf16 %v10593_v24, %v10592_v11  ;;  %v16052_v11 = vld [vmem:[#allocation2 + $0x31] sm:$0xff] }
 0x223   : > { %12523 = vmatprep.mubr.msk.f32.mxu1 %vm655_vm5, %v15467_v20  ;;  %14038 = vmatpush3.bf16.msra.mxu1 %v14035_v45  ;;  %v10606_v20 = vld [vmem:[%s17868_s2 + $0x300] sm:$0xff]  ;;  %v10607_v45 = vld [vmem:[%s17868_s2 + $0x308] sm:$0xff]  ;;  %v10612_v24 = vld [vmem:[%s17868_s2 + $0x330] sm:$0xff] }
 0x224   : > { %14040 = vmatprep.subr.bf16.mxu1 %v14039_v4 }
 0x226   : > { %12524 = vmatmul.mubr.msk.f32.gmra.mrb[30].mxu1 %vm655_vm5, %v15477_v23  ;;  %v14051_v23 = vpack.c.bf16 %v10607_v45, %v10606_v20  ;;  %v16062_v20 = vld [vmem:[#allocation2 + $0x39] sm:$0xff] }
 0x227   : > { %12526 = vmatprep.mubr.msk.f32.mxu1 %vm655_vm5, %v15481_v25  ;;  %14042 = vmatpush3.bf16.msra.mxu1 %v14039_v4  ;;  %v16033_v25 = vld [vmem:[#allocation2 + $0x70] sm:$0xff]  ;;  %v10611_v4 = vld [vmem:[%s17868_s2 + $0x328] sm:$0xff] }
 0x228   : > { %14044 = vmatprep.subr.bf16.mxu1 %v14043_v50  ;;  %v14059_v54 = vpack.c.bf16 %v10611_v4, %v10610_v32  ;;  %v16086_v32 = vld [vmem:[#allocation2 + $0x61] sm:$0xff]  ;;  %v16090_v4 = vld [vmem:[#allocation2 + $0x69] sm:$0xff] }
 0x22a   : > { %12527 = vmatmul.mubr.msk.f32.gmra.mrb[32].mxu1 %vm655_vm5, %v15485_v26  ;;  %v10608_v26 = vld [vmem:[%s17868_s2 + $0x310] sm:$0xff] }
 0x22b   : > { %12529 = vmatprep.mubr.msk.f32.mxu1 %vm655_vm5, %v15489_v27  ;;  %14046 = vmatpush3.bf16.msra.mxu1 %v14043_v50  ;;  %v10609_v27 = vld [vmem:[%s17868_s2 + $0x318] sm:$0xff]  ;;  %v3059_v50 = vld [vmem:[#allocation2 + $0x21] sm:$0xff] }
 0x22c   : > { %14048 = vmatprep.subr.bf16.mxu1 %v14047_v17 }
 0x22e   : > { %12530 = vmatmul.mubr.msk.f32.gmra.mrb[34].mxu1 %vm655_vm5, %v15493_v28  ;;  %v3058_v28 = vld [vmem:[#allocation2 + $0x19] sm:$0xff] }
 0x22f   : > { %12532 = vmatprep.mubr.msk.f32.mxu1 %vm655_vm5, %v15497_v29  ;;  %14050 = vmatpush3.bf16.msra.mxu1 %v14047_v17  ;;  %v14055_v29 = vpack.c.bf16 %v10609_v27, %v10608_v26  ;;  %v10613_v17 = vld [vmem:[%s17868_s2 + $0x338] sm:$0xff]  ;;  %v10626_v26 = vld [vmem:[%s17868_s2 + $0x340] sm:$0xff]  ;;  %v10627_v27 = vld [vmem:[%s17868_s2 + $0x348] sm:$0xff] }
 0x230   : > { %14052 = vmatprep.subr.bf16.mxu1 %v14051_v23  ;;  %v14063_v45 = vpack.c.bf16 %v10613_v17, %v10612_v24  ;;  %v10630_v17 = vld [vmem:[%s17868_s2 + $0x360] sm:$0xff] }
 0x232   : > { %12533 = vmatmul.mubr.msk.f32.gmra.mrb[36].mxu1 %vm655_vm5, %v15979_v8 }
 0x233   : > { %12535 = vmatprep.mubr.msk.f32.mxu1 %vm655_vm5, %v15983_v9 }
 0x236   : > { %12536 = vmatmul.mubr.msk.f32.gmra.mrb[38].mxu1 %vm655_vm5, %v16033_v25 }
 0x237   : > { %12554 = vmatprep.mubr.msk.f32.mxu1 %vm655_vm5, %v3058_v28  ;;  %v16076_v28 = vld [vmem:[#allocation2 + $0x49] sm:$0xff] }
 0x23a   : > { %12555 = vmatmul.mubr.msk.f32.vlgmr.msra.gmra.mrb[28].mxu1 %vm655_vm5, %v3059_v50  ;;  %v16080_v50 = vld [vmem:[#allocation2 + $0x51] sm:$0xff] }
 0x23b   : > { %12557 = vmatprep.mubr.msk.f32.mxu1 %vm655_vm5, %v3060_v7  ;;  %14054 = vmatpush3.bf16.msra.mxu1 %v14051_v23  ;;  %v16066_v23 = vld [vmem:[#allocation2 + $0x41] sm:$0xff]  ;;  %v16094_v7 = vld [vmem:[#allocation2 + $0x71] sm:$0xff] }
 0x23c   : > { %14056 = vmatprep.subr.bf16.mxu1 %v14055_v29 }
 0x23e   : > { %12558 = vmatmul.mubr.msk.f32.gmra.mrb[30].mxu1 %vm655_vm5, %v16052_v11 }
 0x23f   : > { %12560 = vmatprep.mubr.msk.f32.mxu1 %vm655_vm5, %v16062_v20  ;;  %14058 = vmatpush3.bf16.msra.mxu1 %v14055_v29  ;;  %v14067_v29 = vpack.c.bf16 %v10627_v27, %v10626_v26  ;;  %v10633_v27 = vld [vmem:[%s17868_s2 + $0x378] sm:$0xff] }
 0x240   : > { %14060 = vmatprep.subr.bf16.mxu1 %v14059_v54 }
 0x242   : > { %12561 = vmatmul.mubr.msk.f32.gmra.mrb[32].mxu1 %vm655_vm5, %v16066_v23 }
 0x243   : > { %12563 = vmatprep.mubr.msk.f32.mxu1 %vm655_vm5, %v16076_v28  ;;  %14062 = vmatpush3.bf16.msra.mxu1 %v14059_v54  ;;  %v10628_v54 = vld [vmem:[%s17868_s2 + $0x350] sm:$0xff] }
 0x244   : > { %14064 = vmatprep.subr.bf16.mxu1 %v14063_v45 }
 0x246   : > { %12564 = vmatmul.mubr.msk.f32.gmra.mrb[34].mxu1 %vm655_vm5, %v16080_v50 }
 0x247   : > { %12566 = vmatprep.mubr.msk.f32.mxu1 %vm655_vm5, %v15429_v0  ;;  %14066 = vmatpush3.bf16.msra.mxu1 %v14063_v45  ;;  %v10629_v0 = vld [vmem:[%s17868_s2 + $0x358] sm:$0xff]  ;;  %v10631_v45 = vld [vmem:[%s17868_s2 + $0x368] sm:$0xff] }
 0x248   : > { %14068 = vmatprep.subr.bf16.mxu1 %v14067_v29  ;;  %v14071_v24 = vpack.c.bf16 %v10629_v0, %v10628_v54  ;;  %v14075_v26 = vpack.c.bf16 %v10631_v45, %v10630_v17  ;;  %v10650_v0 = vld [vmem:[%s17868_s2 + $0x3a0] sm:$0xff]  ;;  %v10653_v45 = vld [vmem:[%s17868_s2 + $0x3b8] sm:$0xff] }
 0x24a   : > { %12567 = vmatmul.mubr.msk.f32.gmra.mrb[36].mxu1 %vm655_vm5, %v16086_v32 }
 0x24b   : > { %12569 = vmatprep.mubr.msk.f32.mxu1 %vm655_vm5, %v16090_v4 }
 0x24e   : > { %12570 = vmatmul.mubr.msk.f32.gmra.mrb[38].mxu1 %vm655_vm5, %v16094_v7 }
 0x24f   : > { %12588 = vmatprep.mubr.msk.f32.mxu1 %vm655_vm5, %v15516_v39  ;;  %v10632_v39 = vld [vmem:[%s17868_s2 + $0x370] sm:$0xff] }
 0x252   : > { %12589 = vmatmul.mubr.msk.f32.vlgmr.msra.gmra.mrb[28].mxu1 %vm655_vm5, %v15526_v42  ;;  %v14079_v42 = vpack.c.bf16 %v10633_v27, %v10632_v39  ;;  %v10670_v27 = vld [vmem:[%s17868_s2 + $0x3e0] sm:$0xff] }
 0x253   : > { %12591 = vmatprep.mubr.msk.f32.mxu1 %vm655_vm5, %v15530_v44  ;;  %14070 = vmatpush3.bf16.msra.mxu1 %v14067_v29  ;;  %v10646_v44 = vld [vmem:[%s17868_s2 + $0x380] sm:$0xff]  ;;  %v10647_v29 = vld [vmem:[%s17868_s2 + $0x388] sm:$0xff] }
 0x254   : > { %14072 = vmatprep.subr.bf16.mxu1 %v14071_v24 }
 0x256   : > { %12592 = vmatmul.mubr.msk.f32.gmra.mrb[30].mxu1 %vm655_vm5, %v15540_v46  ;;  %v14083_v46 = vpack.c.bf16 %v10647_v29, %v10646_v44  ;;  %v10673_v29 = vld [vmem:[%s17868_s2 + $0x3f8] sm:$0xff] }
 0x257   : > { %12594 = vmatprep.mubr.msk.f32.mxu1 %vm655_vm5, %v15544_v48  ;;  %14074 = vmatpush3.bf16.msra.mxu1 %v14071_v24  ;;  %v16140_v48 = vld [vmem:[#allocation2 + $0x62] sm:$0xff] }
 0x258   : > { %14076 = vmatprep.subr.bf16.mxu1 %v14075_v26  ;;  %v10651_v24 = vld [vmem:[%s17868_s2 + $0x3a8] sm:$0xff] }
 0x259   : > { %v14091_v17 = vpack.c.bf16 %v10651_v24, %v10650_v0  ;;  %v16250_v0 = vld [vmem:[#allocation2 + $0x6c] sm:$0xff]  ;;  %v16254_v24 = vld [vmem:[#allocation2 + $0x74] sm:$0xff] }
 0x25a   : > { %12595 = vmatmul.mubr.msk.f32.gmra.mrb[32].mxu1 %vm655_vm5, %v15548_v49  ;;  %v16144_v49 = vld [vmem:[#allocation2 + $0x6a] sm:$0xff] }
 0x25b   : > { %12597 = vmatprep.mubr.msk.f32.mxu1 %vm655_vm5, %v15552_v19  ;;  %14078 = vmatpush3.bf16.msra.mxu1 %v14075_v26  ;;  %v16148_v19 = vld [vmem:[#allocation2 + $0x72] sm:$0xff]  ;;  %v10667_v26 = vld [vmem:[%s17868_s2 + $0x3c8] sm:$0xff] }
 0x25c   : > { %14080 = vmatprep.subr.bf16.mxu1 %v14079_v42 }
 0x25e   : > { %12598 = vmatmul.mubr.msk.f32.gmra.mrb[34].mxu1 %vm655_vm5, %v15556_v53  ;;  %v10648_v53 = vld [vmem:[%s17868_s2 + $0x390] sm:$0xff] }
 0x25f   : > { %12600 = vmatprep.mubr.msk.f32.mxu1 %vm655_vm5, %v15561_v57  ;;  %14082 = vmatpush3.bf16.msra.mxu1 %v14079_v42  ;;  %v10649_v57 = vld [vmem:[%s17868_s2 + $0x398] sm:$0xff]  ;;  %v10671_v42 = vld [vmem:[%s17868_s2 + $0x3e8] sm:$0xff] }
 0x260   : > { %14084 = vmatprep.subr.bf16.mxu1 %v14083_v46  ;;  %v14087_v54 = vpack.c.bf16 %v10649_v57, %v10648_v53  ;;  %v14107_v44 = vpack.c.bf16 %v10671_v42, %v10670_v27  ;;  %v10686_v53 = vld [vmem:[%s17868_s2 + $0x400] sm:$0xff]  ;;  %v10687_v57 = vld [vmem:[%s17868_s2 + $0x408] sm:$0xff]  ;;  %v10713_v27 = vld [vmem:[%s17868_s2 + $0x478] sm:$0xff] }
 0x261   : > { %v10727_v42 = vld [vmem:[%s17868_s2 + $0x488] sm:$0xff] }
 0x262   : > { %12601 = vmatmul.mubr.msk.f32.gmra.mrb[36].mxu1 %vm655_vm5, %v16140_v48 }
 0x263   : > { %12603 = vmatprep.mubr.msk.f32.mxu1 %vm655_vm5, %v16144_v49 }
 0x266   : > { %12604 = vmatmul.mubr.msk.f32.gmra.mrb[38].mxu1 %vm655_vm5, %v16148_v19 }
 0x267   : > { %12622 = vmatprep.mubr.msk.f32.mxu1 %vm655_vm5, %v15584_v33  ;;  %v10652_v33 = vld [vmem:[%s17868_s2 + $0x3b0] sm:$0xff] }
 0x26a   : > { %12623 = vmatmul.mubr.msk.f32.vlgmr.msra.gmra.mrb[28].mxu1 %vm655_vm5, %v15594_v38  ;;  %v14095_v38 = vpack.c.bf16 %v10653_v45, %v10652_v33  ;;  %v10689_v33 = vld [vmem:[%s17868_s2 + $0x418] sm:$0xff] }
 0x26b   : > { %12625 = vmatprep.mubr.msk.f32.mxu1 %vm655_vm5, %v15600_v21  ;;  %14086 = vmatpush3.bf16.msra.mxu1 %v14083_v46  ;;  %v10666_v21 = vld [vmem:[%s17868_s2 + $0x3c0] sm:$0xff] }
 0x26c   : > { %14088 = vmatprep.subr.bf16.mxu1 %v14087_v54 }
 0x26e   : > { %12626 = vmatmul.mubr.msk.f32.gmra.mrb[30].mxu1 %vm655_vm5, %v15610_v52  ;;  %v14099_v52 = vpack.c.bf16 %v10667_v26, %v10666_v21  ;;  %v10691_v21 = vld [vmem:[%s17868_s2 + $0x428] sm:$0xff] }
 0x26f   : > { %12628 = vmatprep.mubr.msk.f32.mxu1 %vm655_vm5, %v15615_v56  ;;  %14090 = vmatpush3.bf16.msra.mxu1 %v14087_v54  ;;  %v16194_v56 = vld [vmem:[#allocation2 + $0x63] sm:$0xff]  ;;  %v14115_v54 = vpack.c.bf16 %v10687_v57, %v10686_v53  ;;  %v10733_v53 = vld [vmem:[%s17868_s2 + $0x4b8] sm:$0xff] }
 0x270   : > { %14092 = vmatprep.subr.bf16.mxu1 %v14091_v17  ;;  %v10747_v57 = vld [vmem:[%s17868_s2 + $0x4c8] sm:$0xff] }
 0x272   : > { %12629 = vmatmul.mubr.msk.f32.gmra.mrb[32].mxu1 %vm655_vm5, %v15619_v58  ;;  %v16198_v58 = vld [vmem:[#allocation2 + $0x6b] sm:$0xff] }
 0x273   : > { %12631 = vmatprep.mubr.msk.f32.mxu1 %vm655_vm5, %v15623_v59  ;;  %14094 = vmatpush3.bf16.msra.mxu1 %v14091_v17  ;;  %v16202_v59 = vld [vmem:[#allocation2 + $0x73] sm:$0xff] }
 0x274   : > { %14096 = vmatprep.subr.bf16.mxu1 %v14095_v38  ;;  %v10688_v17 = vld [vmem:[%s17868_s2 + $0x410] sm:$0xff] }
 0x275   : > { %v14119_v45 = vpack.c.bf16 %v10689_v33, %v10688_v17  ;;  %v17904_v17 = vld [vmem:[#allocation9_spill] sm:$0xff]  ;;  %v17906_v33 = vld [vmem:[#allocation11_spill] sm:$0xff] }
 0x276   : > { %12632 = vmatmul.mubr.msk.f32.gmra.mrb[34].mxu1 %vm655_vm5, %v15627_v60  ;;  %v10668_v60 = vld [vmem:[%s17868_s2 + $0x3d0] sm:$0xff] }
 0x277   : > { %12634 = vmatprep.mubr.msk.f32.mxu1 %vm655_vm5, %v15631_v61  ;;  %14098 = vmatpush3.bf16.msra.mxu1 %v14095_v38  ;;  %v10669_v61 = vld [vmem:[%s17868_s2 + $0x3d8] sm:$0xff]  ;;  %v10690_v38 = vld [vmem:[%s17868_s2 + $0x420] sm:$0xff] }
 0x278   : > { %14100 = vmatprep.subr.bf16.mxu1 %v14099_v52  ;;  %v14103_v39 = vpack.c.bf16 %v10669_v61, %v10668_v60  ;;  %v14123_v26 = vpack.c.bf16 %v10691_v21, %v10690_v38  ;;  %v10707_v60 = vld [vmem:[%s17868_s2 + $0x448] sm:$0xff]  ;;  %v4232_v38 = vld [vmem:[#allocation2 + $0x76] sm:$0xff]  ;;  %v4233_v21 = vld [vmem:[#allocation2 + $0x7e] sm:$0xff] }
 0x279   : > { %v10711_v61 = vld [vmem:[%s17868_s2 + $0x468] sm:$0xff] }
 0x27a   : > { %12635 = vmatmul.mubr.msk.f32.gmra.mrb[36].mxu1 %vm655_vm5, %v16194_v56 }
 0x27b   : > { %12637 = vmatprep.mubr.msk.f32.mxu1 %vm655_vm5, %v16198_v58 }
 0x27e   : > { %12638 = vmatmul.mubr.msk.f32.gmra.mrb[38].mxu1 %vm655_vm5, %v16202_v59 }
 0x27f   : > { %12656 = vmatprep.mubr.msk.f32.mxu1 %vm655_vm5, %v15650_v10  ;;  %v10672_v10 = vld [vmem:[%s17868_s2 + $0x3f0] sm:$0xff] }
 0x280   : > { %v14111_v46 = vpack.c.bf16 %v10673_v29, %v10672_v10  ;;  %v10730_v10 = vld [vmem:[%s17868_s2 + $0x4a0] sm:$0xff]  ;;  %v10731_v29 = vld [vmem:[%s17868_s2 + $0x4a8] sm:$0xff] }
 0x282   : > { %12657 = vmatmul.mubr.msk.f32.vlgmr.msra.gmra.mrb[28].mxu1 %vm655_vm5, %v15660_v18 }
 0x283   : > { %12659 = vmatprep.mubr.msk.f32.mxu1 %vm655_vm5, %v15664_v15  ;;  %14102 = vmatpush3.bf16.msra.mxu1 %v14099_v52  ;;  %v10693_v52 = vld [vmem:[%s17868_s2 + $0x438] sm:$0xff] }
 0x284   : > { %14104 = vmatprep.subr.bf16.mxu1 %v14103_v39 }
 0x286   : > { %12660 = vmatmul.mubr.msk.f32.gmra.mrb[30].mxu1 %vm655_vm5, %v15674_v31 }
 0x287   : > { %12662 = vmatprep.mubr.msk.f32.mxu1 %vm655_vm5, %v15678_v34  ;;  %14106 = vmatpush3.bf16.msra.mxu1 %v14103_v39 }
 0x288   : > { %14108 = vmatprep.subr.bf16.mxu1 %v14107_v44 }
 0x28a   : > { %12663 = vmatmul.mubr.msk.f32.gmra.mrb[32].mxu1 %vm655_vm5, %v15682_v12 }
 0x28b   : > { %12665 = vmatprep.mubr.msk.f32.mxu1 %vm655_vm5, %v15686_v36  ;;  %14110 = vmatpush3.bf16.msra.mxu1 %v14107_v44  ;;  %v4038_v44 = vld [vmem:[#allocation2 + $0x75] sm:$0xff] }
 0x28c   : > { %14112 = vmatprep.subr.bf16.mxu1 %v14111_v46 }
 0x28e   : > { %12666 = vmatmul.mubr.msk.f32.gmra.mrb[34].mxu1 %vm655_vm5, %v15690_v37 }
 0x28f   : > { %12668 = vmatprep.mubr.msk.f32.mxu1 %vm655_vm5, %v15694_v40  ;;  %14114 = vmatpush3.bf16.msra.mxu1 %v14111_v46  ;;  %v14155_v46 = vpack.c.bf16 %v10731_v29, %v10730_v10  ;;  %v4612_v10 = vld [vmem:[#allocation2 + $0x38] sm:$0xff] }
 0x290   : > { %14116 = vmatprep.subr.bf16.mxu1 %v14115_v54 }
 0x292   : > { %12669 = vmatmul.mubr.msk.f32.gmra.mrb[36].mxu1 %vm655_vm5, %v15742_v2 }
 0x293   : > { %12671 = vmatprep.mubr.msk.f32.mxu1 %vm655_vm5, %v16250_v0 }
 0x296   : > { %12672 = vmatmul.mubr.msk.f32.gmra.mrb[38].mxu1 %vm655_vm5, %v16254_v24 }
 0x297   : > { %12690 = vmatprep.mubr.msk.f32.mxu1 %vm655_vm5, %v15660_v18  ;;  %v10692_v18 = vld [vmem:[%s17868_s2 + $0x430] sm:$0xff] }
 0x29a   : > { %12691 = vmatmul.mubr.msk.f32.vlgmr.msra.gmra.mrb[28].mxu1 %vm655_vm5, %v15664_v15  ;;  %v14127_v15 = vpack.c.bf16 %v10693_v52, %v10692_v18  ;;  %v10749_v18 = vld [vmem:[%s17868_s2 + $0x4d8] sm:$0xff] }
 0x29b   : > { %12693 = vmatprep.mubr.msk.f32.mxu1 %vm655_vm5, %v15674_v31  ;;  %14118 = vmatpush3.bf16.msra.mxu1 %v14115_v54  ;;  %v10706_v31 = vld [vmem:[%s17868_s2 + $0x440] sm:$0xff] }
 0x29c   : > { %14120 = vmatprep.subr.bf16.mxu1 %v14119_v45  ;;  %v17903_v54 = vld [vmem:[#allocation8_spill] sm:$0xff] }
 0x29e   : > { %12694 = vmatmul.mubr.msk.f32.gmra.mrb[30].mxu1 %vm655_vm5, %v15678_v34  ;;  %v14131_v34 = vpack.c.bf16 %v10707_v60, %v10706_v31  ;;  %v10751_v31 = vld [vmem:[%s17868_s2 + $0x4e8] sm:$0xff] }
 0x29f   : > { %12696 = vmatprep.mubr.msk.f32.mxu1 %vm655_vm5, %v15682_v12  ;;  %14122 = vmatpush3.bf16.msra.mxu1 %v14119_v45  ;;  %v16304_v12 = vld [vmem:[#allocation2 + $0x7c] sm:$0xff]  ;;  %v4231_v45 = vld [vmem:[#allocation2 + $0x6e] sm:$0xff] }
 0x2a0   : > { %14124 = vmatprep.subr.bf16.mxu1 %v14123_v26  ;;  %v17907_v60 = vld [vmem:[#allocation12_spill] sm:$0xff] }
 0x2a2   : > { %12697 = vmatmul.mubr.msk.f32.gmra.mrb[32].mxu1 %vm655_vm5, %v15686_v36  ;;  %v10708_v36 = vld [vmem:[%s17868_s2 + $0x450] sm:$0xff] }
 0x2a3   : > { %12699 = vmatprep.mubr.msk.f32.mxu1 %vm655_vm5, %v15690_v37  ;;  %14126 = vmatpush3.bf16.msra.mxu1 %v14123_v26  ;;  %v10709_v37 = vld [vmem:[%s17868_s2 + $0x458] sm:$0xff]  ;;  %v10748_v26 = vld [vmem:[%s17868_s2 + $0x4d0] sm:$0xff] }
 0x2a4   : > { %14128 = vmatprep.subr.bf16.mxu1 %v14127_v15  ;;  %v14167_v52 = vpack.c.bf16 %v10749_v18, %v10748_v26  ;;  %v10870_v26 = vld [vmem:[%s17869_s3 + $0x38] sm:$0xff] }
 0x2a6   : > { %12700 = vmatmul.mubr.msk.f32.gmra.mrb[34].mxu1 %vm655_vm5, %v15694_v40  ;;  %v14135_v40 = vpack.c.bf16 %v10709_v37, %v10708_v36  ;;  %v10753_v36 = vld [vmem:[%s17868_s2 + $0x4f8] sm:$0xff]  ;;  %v17908_v37 = vld [vmem:[#allocation13_spill] sm:$0xff] }
 0x2a7   : > { %12702 = vmatprep.mubr.msk.f32.mxu1 %vm655_vm5, %v15742_v2  ;;  %14130 = vmatpush3.bf16.msra.mxu1 %v14127_v15  ;;  %v10710_v2 = vld [vmem:[%s17868_s2 + $0x460] sm:$0xff] }
 0x2a8   : > { %14132 = vmatprep.subr.bf16.mxu1 %v14131_v34  ;;  %v14139_v39 = vpack.c.bf16 %v10711_v61, %v10710_v2  ;;  %v10750_v15 = vld [vmem:[%s17868_s2 + $0x4e0] sm:$0xff]  ;;  %v10767_v2 = vld [vmem:[%s17868_s2 + $0x508] sm:$0xff]  ;;  %v17909_v61 = vld [vmem:[#allocation14_spill] sm:$0xff] }
 0x2aa   : > { %12703 = vmatmul.mubr.msk.f32.gmra.mrb[36].mxu1 %vm655_vm5, %v16250_v0 }
 0x2ab   : > { %12705 = vmatprep.mubr.msk.f32.mxu1 %vm655_vm5, %v16254_v24 }
 0x2ae   : > { %12706 = vmatmul.mubr.msk.f32.gmra.mrb[38].mxu1 %vm655_vm5, %v16304_v12 }
 0x2af   : > { %12724 = vmatprep.mubr.msk.f32.mxu1 %vm655_vm5, %v15761_v30  ;;  %v10712_v30 = vld [vmem:[%s17868_s2 + $0x470] sm:$0xff] }
 0x2b2   : > { %12725 = vmatmul.mubr.msk.f32.vlgmr.msra.gmra.mrb[28].mxu1 %vm655_vm5, %v15771_v43  ;;  %v14143_v43 = vpack.c.bf16 %v10713_v27, %v10712_v30  ;;  %v17911_v30 = vld [vmem:[#allocation16_spill] sm:$0xff]  ;;  %v17912_v27 = vld [vmem:[#allocation17_spill] sm:$0xff] }
 0x2b3   : > { %12727 = vmatprep.mubr.msk.f32.mxu1 %vm655_vm5, %v15775_v47  ;;  %14134 = vmatpush3.bf16.msra.mxu1 %v14131_v34  ;;  %v10726_v47 = vld [vmem:[%s17868_s2 + $0x480] sm:$0xff]  ;;  %v14171_v34 = vpack.c.bf16 %v10751_v31, %v10750_v15  ;;  %v17913_v15 = vmov 0.0|0.0  }
 0x2b4   : > { %14136 = vmatprep.subr.bf16.mxu1 %v14135_v40  ;;  %v4621_v31 = vld [vmem:[#allocation2 + $0x80] sm:$0xff] }
 0x2b6   : > { %12728 = vmatmul.mubr.msk.f32.gmra.mrb[30].mxu1 %vm655_vm5, %v15785_v14  ;;  %v14147_v14 = vpack.c.bf16 %v10727_v42, %v10726_v47  ;;  %v4426_v47 = vld [vmem:[#allocation2 + $0x77] sm:$0xff]  ;;  %v4427_v42 = vld [vmem:[#allocation2 + $0x7f] sm:$0xff] }
 0x2b7   : > { %12730 = vmatprep.mubr.msk.f32.mxu1 %vm655_vm5, %v15789_v55  ;;  %14138 = vmatpush3.bf16.msra.mxu1 %v14135_v40  ;;  %v4037_v55 = vld [vmem:[#allocation2 + $0x6d] sm:$0xff]  ;;  %v10766_v40 = vld [vmem:[%s17868_s2 + $0x500] sm:$0xff] }
 0x2b8   : > { %14140 = vmatprep.subr.bf16.mxu1 %v14139_v39 }
 0x2ba   : > { %12731 = vmatmul.mubr.msk.f32.gmra.mrb[32].mxu1 %vm655_vm5, %v15793_v62  ;;  %v4039_v62 = vld [vmem:[#allocation2 + $0x7d] sm:$0xff] }
 0x2bb   : > { %12733 = vmatprep.mubr.msk.f32.mxu1 %vm655_vm5, %v15797_v63  ;;  %14142 = vmatpush3.bf16.msra.mxu1 %v14139_v39  ;;  %v10728_v63 = vld [vmem:[%s17868_s2 + $0x490] sm:$0xff]  ;;  %v17910_v39 = vld [vmem:[#allocation15_spill] sm:$0xff] }
 0x2bc   : > { %14144 = vmatprep.subr.bf16.mxu1 %v14143_v43 }
 0x2be   : > { %12734 = vmatmul.mubr.msk.f32.gmra.mrb[34].mxu1 %vm655_vm5, %v15801_v1  ;;  %v10729_v1 = vld [vmem:[%s17868_s2 + $0x498] sm:$0xff] }
 0x2bf   : > { %12736 = vmatprep.mubr.msk.f32.mxu1 %vm655_vm5, %v15805_v5  ;;  %14146 = vmatpush3.bf16.msra.mxu1 %v14143_v43  ;;  %v14151_v5 = vpack.c.bf16 %v10729_v1, %v10728_v63  ;;  %v4425_v43 = vld [vmem:[#allocation2 + $0x6f] sm:$0xff]  ;;  %v10770_v1 = vld [vmem:[%s17868_s2 + $0x520] sm:$0xff] }
 0x2c0   : > { %14148 = vmatprep.subr.bf16.mxu1 %v14147_v14  ;;  %v4611_v63 = vld [vmem:[#allocation2 + $0x30] sm:$0xff] }
 0x2c2   : > { %12737 = vmatmul.mubr.msk.f32.gmra.mrb[36].mxu1 %vm655_vm5, %v4037_v55  ;;  %v10769_v55 = vld [vmem:[%s17868_s2 + $0x518] sm:$0xff] }
 0x2c3   : > { %12739 = vmatprep.mubr.msk.f32.mxu1 %vm655_vm5, %v4038_v44  ;;  %v4610_v44 = vld [vmem:[#allocation2 + $0x28] sm:$0xff] }
 0x2c6   : > { %12740 = vmatmul.mubr.msk.f32.gmra.mrb[38].mxu1 %vm655_vm5, %v4039_v62 }
 0x2c7   : > { %12758 = vmatprep.mubr.msk.f32.mxu1 %vm655_vm5, %v15824_v41  ;;  %v10732_v41 = vld [vmem:[%s17868_s2 + $0x4b0] sm:$0xff] }
 0x2ca   : > { %12759 = vmatmul.mubr.msk.f32.vlgmr.msra.gmra.mrb[28].mxu1 %vm655_vm5, %v15834_v51  ;;  %v14159_v51 = vpack.c.bf16 %v10733_v53, %v10732_v41  ;;  %v10772_v41 = vld [vmem:[%s17868_s2 + $0x530] sm:$0xff]  ;;  %v10773_v53 = vld [vmem:[%s17868_s2 + $0x538] sm:$0xff] }
 0x2cb   : > { %12761 = vmatprep.mubr.msk.f32.mxu1 %vm655_vm5, %v15838_v3  ;;  %14150 = vmatpush3.bf16.msra.mxu1 %v14147_v14  ;;  %v10746_v3 = vld [vmem:[%s17868_s2 + $0x4c0] sm:$0xff]  ;;  %v10768_v14 = vld [vmem:[%s17868_s2 + $0x510] sm:$0xff] }
 0x2cc   : > { %14152 = vmatprep.subr.bf16.mxu1 %v14151_v5  ;;  %v14183_v62 = vpack.c.bf16 %v10769_v55, %v10768_v14  ;;  %v10813_v14 = vld [vmem:[%s17868_s2 + $0x5b8] sm:$0xff]  ;;  %v10826_v55 = vld [vmem:[%s17868_s2 + $0x5c0] sm:$0xff] }
 0x2ce   : > { %12762 = vmatmul.mubr.msk.f32.gmra.mrb[30].mxu1 %vm655_vm5, %v15848_v13  ;;  %v14163_v13 = vpack.c.bf16 %v10747_v57, %v10746_v3  ;;  %v14191_v3 = vpack.c.bf16 %v10773_v53, %v10772_v41  ;;  %v4615_v57 = vld [vmem:[#allocation2 + $0x50] sm:$0xff] }
 0x2cf   : > { %12764 = vmatprep.mubr.msk.f32.mxu1 %vm655_vm5, %v15852_v16  ;;  %14154 = vmatpush3.bf16.msra.mxu1 %v14151_v5  ;;  %v17905_v16 = vld [vmem:[#allocation10_spill] sm:$0xff]  ;;  %v10771_v5 = vld [vmem:[%s17868_s2 + $0x528] sm:$0xff] }
 0x2d0   : > { %14156 = vmatprep.subr.bf16.mxu1 %v14155_v46  ;;  %v14187_v29 = vpack.c.bf16 %v10771_v5, %v10770_v1  ;;  %v5193_v5 = vld [vmem:[#allocation2 + $0x3a] sm:$0xff]  ;;  %v5195_v53 = vld [vmem:[#allocation2 + $0x4a] sm:$0xff] }
 0x2d2   : > { %12765 = vmatmul.mubr.msk.f32.gmra.mrb[32].mxu1 %vm655_vm5, %v17903_v54  ;;  %v10786_v54 = vld [vmem:[%s17868_s2 + $0x540] sm:$0xff] }
 0x2d3   : > { %12767 = vmatprep.mubr.msk.f32.mxu1 %vm655_vm5, %v17904_v17  ;;  %14158 = vmatpush3.bf16.msra.mxu1 %v14155_v46  ;;  %v4613_v46 = vld [vmem:[#allocation2 + $0x40] sm:$0xff]  ;;  %v10787_v17 = vld [vmem:[%s17868_s2 + $0x548] sm:$0xff] }
 0x2d4   : > { %14160 = vmatprep.subr.bf16.mxu1 %v14159_v51 }
 0x2d6   : > { %12768 = vmatmul.mubr.msk.f32.gmra.mrb[34].mxu1 %vm655_vm5, %v17905_v16  ;;  %v14195_v16 = vpack.c.bf16 %v10787_v17, %v10786_v54  ;;  %v5197_v17 = vld [vmem:[#allocation2 + $0x5a] sm:$0xff] }
 0x2d7   : > { %12770 = vmatprep.mubr.msk.f32.mxu1 %vm655_vm5, %v17906_v33  ;;  %14162 = vmatpush3.bf16.msra.mxu1 %v14159_v51  ;;  %v4614_v51 = vld [vmem:[#allocation2 + $0x48] sm:$0xff]  ;;  %v10867_v33 = vld [vmem:[%s17869_s3 + $0x20] sm:$0xff] }
 0x2d8   : > { %14164 = vmatprep.subr.bf16.mxu1 %v14163_v13 }
 0x2da   : > { %12771 = vmatmul.mubr.msk.f32.gmra.mrb[36].mxu1 %vm655_vm5, %v4231_v45  ;;  %v10868_v45 = vld [vmem:[%s17869_s3 + $0x28] sm:$0xff] }
 0x2db   : > { %12773 = vmatprep.mubr.msk.f32.mxu1 %vm655_vm5, %v4232_v38  ;;  %v10869_v38 = vld [vmem:[%s17869_s3 + $0x30] sm:$0xff] }
 0x2dc   : > { %v14263_v18 = vpack.c.bf16 %v10870_v26, %v10869_v38  ;;  %v5202_v38 = vld [vmem:[#allocation2 + $0x82] sm:$0xff] }
 0x2de   : > { %12774 = vmatmul.mubr.msk.f32.gmra.mrb[38].mxu1 %vm655_vm5, %v4233_v21  ;;  %v14260_v21 = vpack.c.bf16 %v10868_v45, %v10867_v33  ;;  %v5201_v45 = vld [vmem:[#allocation2 + $0x7a] sm:$0xff] }
 0x2df   : > { %12792 = vmatprep.mubr.msk.f32.mxu1 %vm655_vm5, %v15887_v22  ;;  %v10752_v22 = vld [vmem:[%s17868_s2 + $0x4f0] sm:$0xff] }
 0x2e0   : > { %14261 = vmatpush3.bf16.msra.mxu0 %v14260_v21  ;;  %v5203_v21 = vld [vmem:[#allocation2 + $0x8a] sm:$0xff] }
 0x2e1   : > { %14262 = vmatprep.subr.bf16.mxu0 %v17913_v15 }
 0x2e2   : > { %12793 = vmatmul.mubr.msk.f32.vlgmr.msra.gmra.mrb[28].mxu1 %vm655_vm5, %v15897_v35  ;;  %v14175_v35 = vpack.c.bf16 %v10753_v36, %v10752_v22  ;;  %v10790_v36 = vld [vmem:[%s17868_s2 + $0x560] sm:$0xff] }
 0x2e3   : > { %12795 = vmatprep.mubr.msk.f32.mxu1 %vm655_vm5, %v17907_v60  ;;  %14166 = vmatpush3.bf16.msra.mxu1 %v14163_v13  ;;  %v4616_v13 = vld [vmem:[#allocation2 + $0x58] sm:$0xff]  ;;  %v10788_v60 = vld [vmem:[%s17868_s2 + $0x550] sm:$0xff] }
 0x2e4   : > { %14168 = vmatprep.subr.bf16.mxu1 %v14167_v52  ;;  %14264 = vmatpush3.bf16.msra.mxu0 %v14263_v18  ;;  %v5387_v18 = vld [vmem:[#allocation2 + $0x3b] sm:$0xff] }
 0x2e5   : > { %14265 = vmatprep.subr.bf16.mxu0 %v17913_v15 }
 0x2e6   : > { %12796 = vmatmul.mubr.msk.f32.gmra.mrb[30].mxu1 %vm655_vm5, %v15911_v6  ;;  %v14179_v6 = vpack.c.bf16 %v10767_v2, %v10766_v40  ;;  %v10792_v40 = vld [vmem:[%s17868_s2 + $0x570] sm:$0xff]  ;;  %v10793_v2 = vld [vmem:[%s17868_s2 + $0x578] sm:$0xff] }
 0x2e7   : > { %12798 = vmatprep.mubr.msk.f32.mxu1 %vm655_vm5, %v17908_v37  ;;  %14170 = vmatpush3.bf16.msra.mxu1 %v14167_v52  ;;  %v4620_v52 = vld [vmem:[#allocation2 + $0x78] sm:$0xff]  ;;  %v10791_v37 = vld [vmem:[%s17868_s2 + $0x568] sm:$0xff] }
 0x2e8   : > { %14172 = vmatprep.subr.bf16.mxu1 %v14171_v34 }
 0x2ea   : > { %12799 = vmatmul.mubr.msk.f32.gmra.mrb[32].mxu1 %vm655_vm5, %v17909_v61  ;;  %v14207_v61 = vpack.c.bf16 %v10793_v2, %v10792_v40  ;;  %v5391_v2 = vld [vmem:[#allocation2 + $0x5b] sm:$0xff] }
 0x2eb   : > { %12801 = vmatprep.mubr.msk.f32.mxu1 %vm655_vm5, %v17910_v39  ;;  %14174 = vmatpush3.bf16.msra.mxu1 %v14171_v34  ;;  %v10789_v34 = vld [vmem:[%s17868_s2 + $0x558] sm:$0xff]  ;;  %v10806_v39 = vld [vmem:[%s17868_s2 + $0x580] sm:$0xff] }
 0x2ec   : > { %14176 = vmatprep.subr.bf16.mxu1 %v14175_v35  ;;  %v14199_v22 = vpack.c.bf16 %v10789_v34, %v10788_v60  ;;  %v5388_v60 = vld [vmem:[#allocation2 + $0x43] sm:$0xff] }
 0x2ee   : > { %12802 = vmatmul.mubr.msk.f32.gmra.mrb[34].mxu1 %vm655_vm5, %v17911_v30 }
 0x2ef   : > { %12804 = vmatprep.mubr.msk.f32.mxu1 %vm655_vm5, %v17912_v27  ;;  %14178 = vmatpush3.bf16.msra.mxu1 %v14175_v35  ;;  %v14203_v35 = vpack.c.bf16 %v10791_v37, %v10790_v36  ;;  %v4815_v27 = vld [vmem:[#allocation2 + $0x88] sm:$0xff]  ;;  %v10852_v36 = vld [vmem:[%s17868_s2 + $0x630] sm:$0xff]  ;;  %v10853_v37 = vld [vmem:[%s17868_s2 + $0x638] sm:$0xff] }
 0x2f0   : > { %14180 = vmatprep.subr.bf16.mxu1 %v14179_v6  ;;  %v14255_v40 = vpack.c.bf16 %v10853_v37, %v10852_v36  ;;  %v10890_v37 = vld [vmem:[%s17869_s3 + $0x60] sm:$0xff] }
 0x2f2   : > { %12805 = vmatmul.mubr.msk.f32.gmra.mrb[36].mxu1 %vm655_vm5, %v4425_v43  ;;  %v10809_v43 = vld [vmem:[%s17868_s2 + $0x598] sm:$0xff] }
 0x2f3   : > { %12807 = vmatprep.mubr.msk.f32.mxu1 %vm655_vm5, %v4426_v47  ;;  %v10811_v47 = vld [vmem:[%s17868_s2 + $0x5a8] sm:$0xff] }
 0x2f6   : > { %12808 = vmatmul.mubr.msk.f32.gmra.mrb[38].mxu1 %vm655_vm5, %v4427_v42 }
 0x2f7   : > { %12826 = vmatprep.mubr.msk.f32.mxu1 %vm655_vm5, %v4610_v44  ;;  %v10827_v44 = vld [vmem:[%s17868_s2 + $0x5c8] sm:$0xff] }
 0x2fa   : > { %12827 = vmatmul.mubr.msk.f32.vlgmr.msra.gmra.mrb[28].mxu1 %vm655_vm5, %v4611_v63 }
 0x2fb   : > { %12829 = vmatprep.mubr.msk.f32.mxu1 %vm655_vm5, %v4612_v10  ;;  %14182 = vmatpush3.bf16.msra.mxu1 %v14179_v6  ;;  %v10807_v6 = vld [vmem:[%s17868_s2 + $0x588] sm:$0xff] }
 0x2fc   : > { %14184 = vmatprep.subr.bf16.mxu1 %v14183_v62  ;;  %v14211_v30 = vpack.c.bf16 %v10807_v6, %v10806_v39  ;;  %v5396_v39 = vld [vmem:[#allocation2 + $0x83] sm:$0xff]  ;;  %v5397_v6 = vld [vmem:[#allocation2 + $0x8b] sm:$0xff] }
 0x2fe   : > { %12830 = vmatmul.mubr.msk.f32.gmra.mrb[30].mxu1 %vm655_vm5, %v4613_v46 }
 0x2ff   : > { %12832 = vmatprep.mubr.msk.f32.mxu1 %vm655_vm5, %v4614_v51  ;;  %14186 = vmatpush3.bf16.msra.mxu1 %v14183_v62  ;;  %v5008_v62 = vld [vmem:[#allocation2 + $0x81] sm:$0xff] }
 0x300   : > { %14188 = vmatprep.subr.bf16.mxu1 %v14187_v29 }
 0x302   : > { %12833 = vmatmul.mubr.msk.f32.gmra.mrb[32].mxu1 %vm655_vm5, %v4615_v57 }
 0x303   : > { %12835 = vmatprep.mubr.msk.f32.mxu1 %vm655_vm5, %v4616_v13  ;;  %14190 = vmatpush3.bf16.msra.mxu1 %v14187_v29  ;;  %v10831_v29 = vld [vmem:[%s17868_s2 + $0x5e8] sm:$0xff] }
 0x304   : > { %14192 = vmatprep.subr.bf16.mxu1 %v14191_v3 }
 0x306   : > { %12836 = vmatmul.mubr.msk.f32.gmra.mrb[34].mxu1 %vm655_vm5, %v15979_v8 }
 0x307   : > { %12838 = vmatprep.mubr.msk.f32.mxu1 %vm655_vm5, %v15983_v9  ;;  %14194 = vmatpush3.bf16.msra.mxu1 %v14191_v3  ;;  %v10833_v3 = vld [vmem:[%s17868_s2 + $0x5f8] sm:$0xff] }
 0x308   : > { %14196 = vmatprep.subr.bf16.mxu1 %v14195_v16 }
 0x30a   : > { %12839 = vmatmul.mubr.msk.f32.gmra.mrb[36].mxu1 %vm655_vm5, %v16033_v25 }
 0x30b   : > { %12841 = vmatprep.mubr.msk.f32.mxu1 %vm655_vm5, %v4620_v52 }
 0x30e   : > { %12842 = vmatmul.mubr.msk.f32.gmra.mrb[38].mxu1 %vm655_vm5, %v4621_v31 }
 0x30f   : > { %12860 = vmatprep.mubr.msk.f32.mxu1 %vm655_vm5, %v4611_v63  ;;  %v5009_v63 = vld [vmem:[#allocation2 + $0x89] sm:$0xff] }
 0x312   : > { %12861 = vmatmul.mubr.msk.f32.vlgmr.msra.gmra.mrb[28].mxu1 %vm655_vm5, %v4612_v10  ;;  %v10830_v10 = vld [vmem:[%s17868_s2 + $0x5e0] sm:$0xff] }
 0x313   : > { %12863 = vmatprep.mubr.msk.f32.mxu1 %vm655_vm5, %v4613_v46  ;;  %14198 = vmatpush3.bf16.msra.mxu1 %v14195_v16  ;;  %v5194_v46 = vld [vmem:[#allocation2 + $0x42] sm:$0xff]  ;;  %v14235_v41 = vpack.c.bf16 %v10831_v29, %v10830_v10 }
 0x314   : > { %14200 = vmatprep.subr.bf16.mxu1 %v14199_v22  ;;  %v10847_v16 = vld [vmem:[%s17868_s2 + $0x608] sm:$0xff] }
 0x316   : > { %12864 = vmatmul.mubr.msk.f32.gmra.mrb[30].mxu1 %vm655_vm5, %v4614_v51  ;;  %v10832_v51 = vld [vmem:[%s17868_s2 + $0x5f0] sm:$0xff] }
 0x317   : > { %12866 = vmatprep.mubr.msk.f32.mxu1 %vm655_vm5, %v4615_v57  ;;  %14202 = vmatpush3.bf16.msra.mxu1 %v14199_v22  ;;  %v5196_v57 = vld [vmem:[#allocation2 + $0x52] sm:$0xff]  ;;  %v14239_v54 = vpack.c.bf16 %v10833_v3, %v10832_v51 }
 0x318   : > { %14204 = vmatprep.subr.bf16.mxu1 %v14203_v35  ;;  %v5389_v22 = vld [vmem:[#allocation2 + $0x4b] sm:$0xff] }
 0x31a   : > { %12867 = vmatmul.mubr.msk.f32.gmra.mrb[32].mxu1 %vm655_vm5, %v4616_v13  ;;  %v10846_v13 = vld [vmem:[%s17868_s2 + $0x600] sm:$0xff] }
 0x31b   : > { %12869 = vmatprep.mubr.msk.f32.mxu1 %vm655_vm5, %v15979_v8  ;;  %14206 = vmatpush3.bf16.msra.mxu1 %v14203_v35  ;;  %v10808_v8 = vld [vmem:[%s17868_s2 + $0x590] sm:$0xff]  ;;  %v14243_v33 = vpack.c.bf16 %v10847_v16, %v10846_v13 }
 0x31c   : > { %14208 = vmatprep.subr.bf16.mxu1 %v14207_v61  ;;  %v5390_v35 = vld [vmem:[#allocation2 + $0x53] sm:$0xff] }
 0x31e   : > { %12870 = vmatmul.mubr.msk.f32.gmra.mrb[34].mxu1 %vm655_vm5, %v15983_v9  ;;  %v14215_v9 = vpack.c.bf16 %v10809_v43, %v10808_v8  ;;  %v5585_v8 = vld [vmem:[#allocation2 + $0x5c] sm:$0xff]  ;;  %v5586_v43 = vld [vmem:[#allocation2 + $0x64] sm:$0xff] }
 0x31f   : > { %12872 = vmatprep.mubr.msk.f32.mxu1 %vm655_vm5, %v16033_v25  ;;  %14210 = vmatpush3.bf16.msra.mxu1 %v14207_v61  ;;  %v10810_v25 = vld [vmem:[%s17868_s2 + $0x5a0] sm:$0xff] }
 0x320   : > { %14212 = vmatprep.subr.bf16.mxu1 %v14211_v30  ;;  %v14219_v42 = vpack.c.bf16 %v10811_v47, %v10810_v25  ;;  %v5395_v61 = vld [vmem:[#allocation2 + $0x7b] sm:$0xff]  ;;  %v5591_v25 = vld [vmem:[#allocation2 + $0x8c] sm:$0xff]  ;;  %v17914_v47 = vmov 0.0  }
 0x322   : > { %12873 = vmatmul.mubr.msk.f32.gmra.mrb[36].mxu1 %vm655_vm5, %v4620_v52  ;;  %v10850_v52 = vld [vmem:[%s17868_s2 + $0x620] sm:$0xff] }
 0x323   : > { %12875 = vmatprep.mubr.msk.f32.mxu1 %vm655_vm5, %v4621_v31  ;;  %v10851_v31 = vld [vmem:[%s17868_s2 + $0x628] sm:$0xff] }
 0x324   : > { %v14251_v34 = vpack.c.bf16 %v10851_v31, %v10850_v52  ;;  %v10884_v52 = vld [vmem:[%s17869_s3 + $0x58] sm:$0xff] }
 0x326   : > { %12876 = vmatmul.mubr.msk.f32.gmra.mrb[38].mxu1 %vm655_vm5, %v4815_v27  ;;  %v5584_v27 = vld [vmem:[#allocation2 + $0x54] sm:$0xff] }
 0x327   : > { %12894 = vmatprep.mubr.msk.f32.mxu1 %vm655_vm5, %v16052_v11  ;;  %v10812_v11 = vld [vmem:[%s17868_s2 + $0x5b0] sm:$0xff] }
 0x32a   : > { %12895 = vmatmul.mubr.msk.f32.vlgmr.msra.gmra.mrb[28].mxu1 %vm655_vm5, %v16062_v20  ;;  %v14223_v20 = vpack.c.bf16 %v10813_v14, %v10812_v11 }
 0x32b   : > { %12897 = vmatprep.mubr.msk.f32.mxu1 %vm655_vm5, %v16066_v23  ;;  %14214 = vmatpush3.bf16.msra.mxu1 %v14211_v30  ;;  %v5003_v23 = vld [vmem:[#allocation2 + $0x59] sm:$0xff] }
 0x32c   : > { %14216 = vmatprep.subr.bf16.mxu1 %v14215_v9  ;;  %v5581_v30 = vld [vmem:[#allocation2 + $0x3c] sm:$0xff] }
 0x32e   : > { %12898 = vmatmul.mubr.msk.f32.gmra.mrb[30].mxu1 %vm655_vm5, %v16076_v28  ;;  %v14227_v28 = vpack.c.bf16 %v10827_v44, %v10826_v55  ;;  %v5809_v44 = vld [vmem:[%s17869_s3] sm:$0xff] }
 0x32f   : > { %12900 = vmatprep.mubr.msk.f32.mxu1 %vm655_vm5, %v16080_v50  ;;  %14218 = vmatpush3.bf16.msra.mxu1 %v14215_v9  ;;  %v5007_v50 = vld [vmem:[#allocation2 + $0x79] sm:$0xff]  ;;  %v5590_v9 = vld [vmem:[#allocation2 + $0x84] sm:$0xff] }
 0x330   : > { %14220 = vmatprep.subr.bf16.mxu1 %v14219_v42 }
 0x332   : > { %12901 = vmatmul.mubr.msk.f32.gmra.mrb[32].mxu1 %vm655_vm5, %v5003_v23 }
 0x333   : > { %12903 = vmatprep.mubr.msk.f32.mxu1 %vm655_vm5, %v16086_v32  ;;  %14222 = vmatpush3.bf16.msra.mxu1 %v14219_v42  ;;  %v10828_v32 = vld [vmem:[%s17868_s2 + $0x5d0] sm:$0xff]  ;;  %v10866_v42 = vld [vmem:[%s17872_s6 + $0x1] ss:$0 sm:$0xff] }
 0x334   : > { %14224 = vmatprep.subr.bf16.mxu1 %v14223_v20 }
 0x336   : > { %12904 = vmatmul.mubr.msk.f32.gmra.mrb[34].mxu1 %vm655_vm5, %v16090_v4  ;;  %v10829_v4 = vld [vmem:[%s17868_s2 + $0x5d8] sm:$0xff] }
 0x337   : > { %12906 = vmatprep.mubr.msk.f32.mxu1 %vm655_vm5, %v16094_v7  ;;  %14226 = vmatpush3.bf16.msra.mxu1 %v14223_v20  ;;  %v5192_v7 = vld [vmem:[#allocation2 + $0x32] sm:$0xff]  ;;  %v14231_v1 = vpack.c.bf16 %v10829_v4, %v10828_v32 }
 0x338   : > { %14228 = vmatprep.subr.bf16.mxu1 %v14227_v28 }
 0x33a   : > { %12907 = vmatmul.mubr.msk.f32.gmra.mrb[36].mxu1 %vm655_vm5, %v5007_v50 }
 0x33b   : > { %12909 = vmatprep.mubr.msk.f32.mxu1 %vm655_vm5, %v5008_v62 }
 0x33e   : > { %12910 = vmatmul.mubr.msk.f32.gmra.mrb[38].mxu1 %vm655_vm5, %v5009_v63 }
 0x33f   : > { %12928 = vmatprep.mubr.msk.f32.mxu1 %vm655_vm5, %v5192_v7  ;;  %v5811_v7 = vld [vmem:[%s17869_s3 + $0x10] sm:$0xff] }
 0x342   : > { %12929 = vmatmul.mubr.msk.f32.vlgmr.msra.gmra.mrb[28].mxu1 %vm655_vm5, %v5193_v5 }
 0x343   : > { %12931 = vmatprep.mubr.msk.f32.mxu1 %vm655_vm5, %v5194_v46  ;;  %14230 = vmatpush3.bf16.msra.mxu1 %v14227_v28  ;;  %v5810_v28 = vld [vmem:[%s17869_s3 + $0x8] sm:$0xff] }
 0x344   : > { %14232 = vmatprep.subr.bf16.mxu1 %v14231_v1  ;;  %v14266_v32 = vpack.c.bf16 %v5810_v28, %v5809_v44  ;;  %v10910_v28 = vld [vmem:[%s17869_s3 + $0xb0] sm:$0xff] }
 0x346   : > { %12932 = vmatmul.mubr.msk.f32.gmra.mrb[30].mxu1 %vm655_vm5, %v5195_v53 }
 0x347   : > { %12934 = vmatprep.mubr.msk.f32.mxu1 %vm655_vm5, %v5196_v57  ;;  %14234 = vmatpush3.bf16.msra.mxu1 %v14231_v1  ;;  %v5812_v1 = vld [vmem:[%s17869_s3 + $0x18] sm:$0xff] }
 0x348   : > { %14236 = vmatprep.subr.bf16.mxu1 %v14235_v41 }
 0x34a   : > { %12935 = vmatmul.mubr.msk.f32.gmra.mrb[32].mxu1 %vm655_vm5, %v5197_v17 }
 0x34b   : > { %12937 = vmatprep.mubr.msk.f32.mxu1 %vm655_vm5, %v16140_v48  ;;  %14238 = vmatpush3.bf16.msra.mxu1 %v14235_v41  ;;  %v10848_v48 = vld [vmem:[%s17868_s2 + $0x610] sm:$0xff]  ;;  %v14269_v41 = vpack.c.bf16 %v5812_v1, %v5811_v7  ;;  %v10917_v1 = vld [vmem:[%s17869_s3 + $0xc0] sm:$0xff] }
 0x34c   : > { %14240 = vmatprep.subr.bf16.mxu1 %v14239_v54 }
 0x34e   : > { %12938 = vmatmul.mubr.msk.f32.gmra.mrb[34].mxu1 %vm655_vm5, %v16144_v49  ;;  %v10849_v49 = vld [vmem:[%s17868_s2 + $0x618] sm:$0xff] }
 0x34f   : > { %12940 = vmatprep.mubr.msk.f32.mxu1 %vm655_vm5, %v16148_v19  ;;  %14242 = vmatpush3.bf16.msra.mxu1 %v14239_v54  ;;  %v5386_v19 = vld [vmem:[#allocation2 + $0x33] sm:$0xff]  ;;  %v14247_v26 = vpack.c.bf16 %v10849_v49, %v10848_v48  ;;  %v10881_v48 = vld [vmem:[%s17869_s3 + $0x40] sm:$0xff]  ;;  %v10882_v49 = vld [vmem:[%s17869_s3 + $0x48] sm:$0xff] }
 0x350   : > { %14244 = vmatprep.subr.bf16.mxu1 %v14243_v33 }
 0x352   : > { %12941 = vmatmul.mubr.msk.f32.gmra.mrb[36].mxu1 %vm655_vm5, %v5201_v45 }
 0x353   : > { %12943 = vmatprep.mubr.msk.f32.mxu1 %vm655_vm5, %v5202_v38 }
 0x356   : > { %12944 = vmatmul.mubr.msk.f32.gmra.mrb[38].mxu1 %vm655_vm5, %v5203_v21 }
 0x357   : > { %12962 = vmatprep.mubr.msk.f32.mxu1 %vm655_vm5, %v5386_v19 }
 0x35a   : > { %12963 = vmatmul.mubr.msk.f32.vlgmr.msra.gmra.mrb[28].mxu1 %vm655_vm5, %v5387_v18  ;;  %v10883_v18 = vld [vmem:[%s17869_s3 + $0x50] sm:$0xff] }
 0x35b   : > { %12965 = vmatprep.mubr.msk.f32.mxu1 %vm655_vm5, %v5388_v60  ;;  %14246 = vmatpush3.bf16.msra.mxu1 %v14243_v33  ;;  %v14275_v60 = vpack.c.bf16 %v10884_v52, %v10883_v18 }
 0x35c   : > { %14248 = vmatprep.subr.bf16.mxu1 %v14247_v26 }
 0x35e   : > { %12966 = vmatmul.mubr.msk.f32.gmra.mrb[30].mxu1 %vm655_vm5, %v5389_v22 }
 0x35f   : > { %12968 = vmatprep.mubr.msk.f32.mxu1 %vm655_vm5, %v5390_v35  ;;  %14250 = vmatpush3.bf16.msra.mxu1 %v14247_v26  ;;  %v14272_v26 = vpack.c.bf16 %v10882_v49, %v10881_v48  ;;  %v10891_v35 = vld [vmem:[%s17869_s3 + $0x68] sm:$0xff]  ;;  %v10935_v49 = vld [vmem:[%s17869_s3 + $0x100] sm:$0xff] }
 0x360   : > { %14252 = vmatprep.subr.bf16.mxu1 %v14251_v34 }
 0x362   : > { %12969 = vmatmul.mubr.msk.f32.gmra.mrb[32].mxu1 %vm655_vm5, %v5391_v2  ;;  %v14278_v2 = vpack.c.bf16 %v10891_v35, %v10890_v37 }
 0x363   : > { %12971 = vmatprep.mubr.msk.f32.mxu1 %vm655_vm5, %v16194_v56  ;;  %14254 = vmatpush3.bf16.msra.mxu1 %v14251_v34  ;;  %v5580_v56 = vld [vmem:[#allocation2 + $0x34] sm:$0xff] }
 0x364   : > { %14256 = vmatprep.subr.bf16.mxu1 %v14255_v40 }
 0x366   : > { %12972 = vmatmul.mubr.msk.f32.gmra.mrb[34].mxu1 %vm655_vm5, %v16198_v58  ;;  %v5582_v58 = vld [vmem:[#allocation2 + $0x44] sm:$0xff] }
 0x367   : > { %12974 = vmatprep.mubr.msk.f32.mxu1 %vm655_vm5, %v16202_v59  ;;  %14258 = vmatpush3.bf16.msra.mxu1 %v14255_v40  ;;  %v5583_v59 = vld [vmem:[#allocation2 + $0x4c] sm:$0xff] }
 0x368   : > { %14457 = vmatprep.subr.bf16.mxu1 %v17913_v15 }
 0x36a   : > { %12975 = vmatmul.mubr.msk.f32.gmra.mrb[36].mxu1 %vm655_vm5, %v5395_v61  ;;  %v10892_v61 = vld [vmem:[%s17869_s3 + $0x70] sm:$0xff] }
 0x36b   : > { %12977 = vmatprep.mubr.msk.f32.mxu1 %vm655_vm5, %v5396_v39  ;;  %v10893_v39 = vld [vmem:[%s17869_s3 + $0x78] sm:$0xff] }
 0x36e   : > { %12978 = vmatmul.mubr.msk.f32.gmra.mrb[38].mxu1 %vm655_vm5, %v5397_v6 }
 0x36f   : > { %12996 = vmatprep.mubr.msk.f32.mxu1 %vm655_vm5, %v5580_v56  ;;  %v14281_v56 = vpack.c.bf16 %v10893_v39, %v10892_v61  ;;  %v10944_v39 = vld [vmem:[%s17869_s3 + $0x120] sm:$0xff] }
 0x372   : > { %12997 = vmatmul.mubr.msk.f32.vlgmr.msra.gmra.mrb[28].mxu1 %vm655_vm5, %v5581_v30 }
 0x373   : > { %12999 = vmatprep.mubr.msk.f32.mxu1 %vm655_vm5, %v5582_v58 }
 0x376   : > { %13000 = vmatmul.mubr.msk.f32.gmra.mrb[30].mxu1 %vm655_vm5, %v5583_v59 }
 0x377   : > { %13002 = vmatprep.mubr.msk.f32.mxu1 %vm655_vm5, %v5584_v27  ;;  %v10899_v27 = vld [vmem:[%s17869_s3 + $0x80] sm:$0xff] }
 0x37a   : > { %13003 = vmatmul.mubr.msk.f32.gmra.mrb[32].mxu1 %vm655_vm5, %v5585_v8  ;;  %v10900_v8 = vld [vmem:[%s17869_s3 + $0x88] sm:$0xff] }
 0x37b   : > { %13005 = vmatprep.mubr.msk.f32.mxu1 %vm655_vm5, %v5586_v43 }
 0x37e   : > { %13006 = vmatmul.mubr.msk.f32.gmra.mrb[34].mxu1 %vm655_vm5, %v16250_v0 }
 0x37f   : > { %13008 = vmatprep.mubr.msk.f32.mxu1 %vm655_vm5, %v16254_v24 }
 0x382   : > { %13009 = vmatmul.mubr.msk.f32.gmra.mrb[36].mxu1 %vm655_vm5, %v16304_v12 }
 0x383   : > { %13011 = vmatprep.mubr.msk.f32.mxu1 %vm655_vm5, %v5590_v9  ;;  %v14284_v9 = vpack.c.bf16 %v10900_v8, %v10899_v27  ;;  %v10947_v27 = vld [vmem:[%s17869_s3 + $0x138] sm:$0xff] }
 0x386   : > { %13012 = vmatmul.mubr.msk.f32.gmra.mrb[38].mxu1 %vm655_vm5, %v5591_v25  ;;  %v10901_v25 = vld [vmem:[%s17869_s3 + $0x90] sm:$0xff] }
 0x387   : > { %13733 = vmatprep.mubr.msk.f32.mxu1 %vm14911_vm4, %v17914_v47 }
 0x445   : > { %v12998_v0 = vpop.f32.mrb[28].mxu1 }
 0x446   : > { %v5780_v11 = vadd.f32 %v12998_v0, %v10866_v42  ;;  %v5703_v24 = vpop.f32.mrb[29].mxu1 }
 0x447   : > { %v5779_v14 = vadd.f32 %v10866_v42, %v5703_v24 }
 0x448   : > { %5793 = vst.msk [vmem:[#allocation3 + $0x8] sm:$0xff] %vm5791_vm6, %v5780_v11 }
 0x449   : > { %5792 = vst.msk [vmem:[#allocation3] sm:$0xff] %vm5791_vm6, %v5779_v14  ;;  %v13001_v12 = vpop.f32.mrb[30].mxu1 }
 0x44a   : > { %v5782_v20 = vadd.f32 %v13001_v12, %v10866_v42  ;;  %v5713_v23 = vpop.f32.mrb[31].mxu1 }
 0x44b   : > { %v5781_v55 = vadd.f32 %v10866_v42, %v5713_v23  ;;  %v10909_v23 = vld [vmem:[%s17869_s3 + $0xa8] sm:$0xff] }
 0x44c   : > { %5795 = vst.msk [vmem:[#allocation3 + $0x18] sm:$0xff] %vm5791_vm6, %v5782_v20  ;;  %v10908_v20 = vld [vmem:[%s17869_s3 + $0xa0] sm:$0xff] }
 0x44d   : > { %5794 = vst.msk [vmem:[#allocation3 + $0x10] sm:$0xff] %vm5791_vm6, %v5781_v55  ;;  %v13004_v50 = vpop.f32.mrb[32].mxu1  ;;  %v14290_v44 = vpack.c.bf16 %v10909_v23, %v10908_v20  ;;  %v10955_v23 = vld [vmem:[%s17869_s3 + $0x150] sm:$0xff] }
 0x44e   : > { %v5784_v62 = vadd.f32 %v13004_v50, %v10866_v42  ;;  %v5723_v63 = vpop.f32.mrb[33].mxu1  ;;  %v10911_v50 = vld [vmem:[%s17869_s3 + $0xb8] sm:$0xff] }
 0x44f   : > { %v5783_v4 = vadd.f32 %v10866_v42, %v5723_v63  ;;  %v5805_v34 = vld [vmem:[#allocation3 + $0x8] sm:$0xff]  ;;  %v14293_v63 = vpack.c.bf16 %v10911_v50, %v10910_v28 }
 0x450   : > { %5797 = vst.msk [vmem:[#allocation3 + $0x28] sm:$0xff] %vm5791_vm6, %v5784_v62  ;;  %v5813_v5 = vld [vmem:[#allocation3 + $0x1] sm:$0xff] }
 0x451   : > { %5796 = vst.msk [vmem:[#allocation3 + $0x20] sm:$0xff] %vm5791_vm6, %v5783_v4  ;;  %v13007_v10 = vpop.f32.mrb[34].mxu1  ;;  %13023 = vmatmul.mubr.msk.f32.vlgmr.msra.gmra.mrb[38].mxu0 %vm5791_vm6, %v5813_v5  ;;  %v5804_v31 = vld [vmem:[#allocation3] sm:$0xff]  ;;  %v10918_v5 = vld [vmem:[%s17869_s3 + $0xc8] sm:$0xff]  ;;  %v10962_v50 = vld [vmem:[%s17869_s3 + $0x160] sm:$0xff] }
 0x452   : > { %v5786_v29 = vadd.f32 %v13007_v10, %v10866_v42  ;;  %v5733_v46 = vpop.f32.mrb[35].mxu1  ;;  %14267 = vmatpush3.bf16.msra.mxu0 %v14266_v32  ;;  %13025 = vmatprep.mubr.msk.f32.mxu0 %vm14911_vm4, %v17914_v47  ;;  %v6033_v6 = vld [vmem:[#allocation3 + $0x2] sm:$0xff] }
 0x453   : > { %v5785_v53 = vadd.f32 %v10866_v42, %v5733_v46  ;;  %14268 = vmatprep.subr.bf16.mxu0 %v17913_v15  ;;  %v16745_v36 = vld [vmem:[#allocation3 + $0x18] sm:$0xff]  ;;  %v6153_v0 = vld [vmem:[#allocation3 + $0x3] sm:$0xff] }
 0x454   : > { %5799 = vst.msk [vmem:[#allocation3 + $0x38] sm:$0xff] %vm5791_vm6, %v5786_v29  ;;  %v5814_v51 = vld [vmem:[#allocation3 + $0x9] sm:$0xff]  ;;  %v5815_v13 = vld [vmem:[#allocation3 + $0x11] sm:$0xff]  ;;  %v14296_v29 = vpack.c.bf16 %v10918_v5, %v10917_v1  ;;  %v10965_v1 = vld [vmem:[%s17869_s3 + $0x178] sm:$0xff] }
 0x455   : > { %5798 = vst.msk [vmem:[#allocation3 + $0x30] sm:$0xff] %vm5791_vm6, %v5785_v53  ;;  %v13010_v3 = vpop.f32.mrb[36].mxu1  ;;  %13026 = vmatmul.mubr.msk.f32.gmra.mrb[40].mxu0 %vm5791_vm6, %v5814_v51  ;;  %v16739_v22 = vld [vmem:[#allocation3 + $0x10] sm:$0xff]  ;;  %v6273_v62 = vld [vmem:[#allocation3 + $0x4] sm:$0xff]  ;;  %v10919_v46 = vld [vmem:[%s17869_s3 + $0xd0] sm:$0xff] }
 0x456   : > { %v5788_v57 = vadd.f32 %v13010_v3, %v10866_v42  ;;  %v5743_v54 = vpop.f32.mrb[37].mxu1  ;;  %13028 = vmatprep.mubr.msk.f32.mxu0 %vm14911_vm4, %v17914_v47  ;;  %14270 = vmatpush3.bf16.msra.mxu0 %v14269_v41  ;;  %v6034_v30 = vld [vmem:[#allocation3 + $0xa] sm:$0xff]  ;;  %v6035_v58 = vld [vmem:[#allocation3 + $0x12] sm:$0xff]  ;;  %v10920_v41 = vld [vmem:[%s17869_s3 + $0xd8] sm:$0xff] }
 0x457   : > { %v5787_v17 = vadd.f32 %v10866_v42, %v5743_v54  ;;  %14271 = vmatprep.subr.bf16.mxu0 %v17913_v15  ;;  %v6154_v24 = vld [vmem:[#allocation3 + $0xb] sm:$0xff]  ;;  %v6155_v14 = vld [vmem:[#allocation3 + $0x13] sm:$0xff]  ;;  %v14299_v53 = vpack.c.bf16 %v10920_v41, %v10919_v46 }
 0x458   : > { %5801 = vst.msk [vmem:[#allocation3 + $0x48] sm:$0xff] %vm5791_vm6, %v5788_v57  ;;  %v16706_v21 = vld [vmem:[#allocation3 + $0x19] sm:$0xff]  ;;  %v16719_v19 = vld [vmem:[#allocation3 + $0x21] sm:$0xff]  ;;  %v6274_v32 = vld [vmem:[#allocation3 + $0xc] sm:$0xff] }
 0x459   : > { %5800 = vst.msk [vmem:[#allocation3 + $0x40] sm:$0xff] %vm5791_vm6, %v5787_v17  ;;  %v13013_v16 = vpop.f32.mrb[38].mxu1  ;;  %13029 = vmatmul.mubr.msk.f32.gmra.mrb[42].mxu0 %vm5791_vm6, %v5815_v13  ;;  %v16757_v40 = vld [vmem:[#allocation3 + $0x20] sm:$0xff]  ;;  %v6275_v4 = vld [vmem:[#allocation3 + $0x14] sm:$0xff]  ;;  %v10926_v51 = vld [vmem:[%s17869_s3 + $0xe0] sm:$0xff] }
 0x45a   : > { %v5790_v33 = vadd.f32 %v13013_v16, %v10866_v42  ;;  %v5753_v45 = vpop.f32.mrb[39].mxu1  ;;  %13031 = vmatprep.mubr.msk.f32.mxu0 %vm14911_vm4, %v17914_v47  ;;  %v16780_v59 = vld [vmem:[#allocation3 + $0x1a] sm:$0xff]  ;;  %v16792_v43 = vld [vmem:[#allocation3 + $0x22] sm:$0xff]  ;;  %v10927_v3 = vld [vmem:[%s17869_s3 + $0xe8] sm:$0xff] }
 0x45b   : > { %v5789_v38 = vadd.f32 %v10866_v42, %v5753_v45  ;;  %v10902_v42 = vld [vmem:[%s17869_s3 + $0x98] sm:$0xff]  ;;  %v14302_v54 = vpack.c.bf16 %v10927_v3, %v10926_v51  ;;  %v10928_v17 = vld [vmem:[%s17869_s3 + $0xf0] sm:$0xff]  ;;  %v6513_v16 = vld [vmem:[#allocation3 + $0xd] sm:$0xff] }
 0x45c   : > { %5803 = vst.msk [vmem:[#allocation3 + $0x58] sm:$0xff] %vm5791_vm6, %v5790_v33  ;;  %v14287_v11 = vpack.c.bf16 %v10902_v42, %v10901_v25  ;;  %v16815_v12 = vld [vmem:[#allocation3 + $0x1b] sm:$0xff]  ;;  %v16827_v55 = vld [vmem:[#allocation3 + $0x23] sm:$0xff]  ;;  %v16896_v57 = vld [vmem:[#allocation3 + $0x2c] sm:$0xff] }
 0x45d   : > { %5802 = vst.msk [vmem:[#allocation3 + $0x50] sm:$0xff] %vm5791_vm6, %v5789_v38  ;;  %13032 = vmatmul.mubr.msk.f32.gmra.mrb[44].mxu0 %vm5791_vm6, %v16706_v21  ;;  %v16850_v7 = vld [vmem:[#allocation3 + $0x1c] sm:$0xff]  ;;  %v16862_v10 = vld [vmem:[#allocation3 + $0x24] sm:$0xff]  ;;  %v16931_v18 = vld [vmem:[#allocation3 + $0x2d] sm:$0xff] }
 0x45e   : > { %13034 = vmatprep.mubr.msk.f32.mxu0 %vm14911_vm4, %v17914_v47  ;;  %v10929_v13 = vld [vmem:[%s17869_s3 + $0xf8] sm:$0xff]  ;;  %v6514_v45 = vld [vmem:[#allocation3 + $0x15] sm:$0xff] }
 0x45f   : > { %v14305_v33 = vpack.c.bf16 %v10929_v13, %v10928_v17  ;;  %v6515_v38 = vld [vmem:[#allocation3 + $0x1d] sm:$0xff]  ;;  %v16919_v48 = vld [vmem:[#allocation3 + $0x25] sm:$0xff]  ;;  %v6753_v8 = vld [vmem:[#allocation3 + $0xf] sm:$0xff] }
 0x460   : > { %v6634_v35 = vld [vmem:[#allocation3 + $0x16] sm:$0xff]  ;;  %v16954_v61 = vld [vmem:[#allocation3 + $0x26] sm:$0xff] }
 0x461   : > { %13035 = vmatmul.mubr.msk.f32.gmra.mrb[46].mxu0 %vm5791_vm6, %v16719_v19  ;;  %v6754_v25 = vld [vmem:[#allocation3 + $0x17] sm:$0xff]  ;;  %v6755_v42 = vld [vmem:[#allocation3 + $0x1f] sm:$0xff] }
 0x462   : > { %13045 = vmatprep.mubr.msk.f32.mxu0 %vm14911_vm4, %v17914_v47  ;;  %v10972_v46 = vld [vmem:[%s17869_s3 + $0x188] sm:$0xff]  ;;  %v10974_v17 = vld [vmem:[%s17869_s3 + $0x198] sm:$0xff] }
 0x465   : > { %13046 = vmatmul.mubr.msk.f32.vlgmr.msra.gmra.mrb[48].mxu0 %vm5791_vm6, %v5804_v31  ;;  %v10937_v31 = vld [vmem:[%s17869_s3 + $0x110] sm:$0xff] }
 0x466   : > { %14273 = vmatpush3.bf16.msra.mxu0 %v14272_v26  ;;  %13048 = vmatprep.mubr.msk.f32.mxu0 %vm14911_vm4, %v17914_v47  ;;  %v10936_v26 = vld [vmem:[%s17869_s3 + $0x108] sm:$0xff] }
 0x467   : > { %14274 = vmatprep.subr.bf16.mxu0 %v17913_v15  ;;  %v14308_v52 = vpack.c.bf16 %v10936_v26, %v10935_v49 }
 0x469   : > { %13049 = vmatmul.mubr.msk.f32.gmra.mrb[50].mxu0 %vm5791_vm6, %v5805_v34  ;;  %v6633_v34 = vld [vmem:[#allocation3 + $0xe] sm:$0xff] }
 0x46a   : > { %13051 = vmatprep.mubr.msk.f32.mxu0 %vm14911_vm4, %v17914_v47  ;;  %14276 = vmatpush3.bf16.msra.mxu0 %v14275_v60  ;;  %v10938_v60 = vld [vmem:[%s17869_s3 + $0x118] sm:$0xff] }
 0x46b   : > { %14277 = vmatprep.subr.bf16.mxu0 %v17913_v15  ;;  %v14311_v37 = vpack.c.bf16 %v10938_v60, %v10937_v31  ;;  %v17100_v31 = vld [vmem:[#allocation3 + $0x31] sm:$0xff] }
 0x46d   : > { %13052 = vmatmul.mubr.msk.f32.gmra.mrb[52].mxu0 %vm5791_vm6, %v16739_v22 }
 0x46e   : > { %13054 = vmatprep.mubr.msk.f32.mxu0 %vm14911_vm4, %v17914_v47 }
 0x471   : > { %13055 = vmatmul.mubr.msk.f32.gmra.mrb[54].mxu0 %vm5791_vm6, %v16745_v36 }
 0x472   : > { %13057 = vmatprep.mubr.msk.f32.mxu0 %vm14911_vm4, %v17914_v47 }
 0x475   : > { %13058 = vmatmul.mubr.msk.f32.gmra.mrb[56].mxu0 %vm5791_vm6, %v16757_v40 }
 0x476   : > { %13068 = vmatprep.mubr.msk.f32.mxu0 %vm14911_vm4, %v17914_v47 }
 0x479   : > { %13069 = vmatmul.mubr.msk.f32.vlgmr.msra.gmra.mrb[58].mxu0 %vm5791_vm6, %v6033_v6  ;;  %v10945_v6 = vld [vmem:[%s17869_s3 + $0x128] sm:$0xff] }
 0x47a   : > { %14279 = vmatpush3.bf16.msra.mxu0 %v14278_v2  ;;  %13071 = vmatprep.mubr.msk.f32.mxu0 %vm14911_vm4, %v17914_v47  ;;  %v6635_v2 = vld [vmem:[#allocation3 + $0x1e] sm:$0xff] }
 0x47b   : > { %14280 = vmatprep.subr.bf16.mxu0 %v17913_v15 }
 0x47d   : > { %13072 = vmatmul.mubr.msk.f32.gmra.mrb[60].mxu0 %vm5791_vm6, %v6034_v30  ;;  %v14314_v30 = vpack.c.bf16 %v10945_v6, %v10944_v39 }
 0x47e   : > { %13074 = vmatprep.mubr.msk.f32.mxu0 %vm14911_vm4, %v17914_v47  ;;  %14282 = vmatpush3.bf16.msra.mxu0 %v14281_v56  ;;  %v16966_v56 = vld [vmem:[#allocation3 + $0x2e] sm:$0xff] }
 0x47f   : > { %14283 = vmatprep.subr.bf16.mxu0 %v17913_v15 }
 0x481   : > { %13075 = vmatmul.mubr.msk.f32.gmra.mrb[62].mxu0 %vm5791_vm6, %v6035_v58  ;;  %v10946_v58 = vld [vmem:[%s17869_s3 + $0x130] sm:$0xff] }
 0x482   : > { %13077 = vmatprep.mubr.msk.f32.mxu0 %vm14911_vm4, %v17914_v47 }
 0x485   : > { %13078 = vmatmul.mubr.msk.f32.gmra.mrb[64].mxu0 %vm5791_vm6, %v16780_v59 }
 0x486   : > { %13080 = vmatprep.mubr.msk.f32.mxu0 %vm14911_vm4, %v17914_v47 }
 0x489   : > { %13081 = vmatmul.mubr.msk.f32.gmra.mrb[66].mxu0 %vm5791_vm6, %v16792_v43 }
 0x48a   : > { %13091 = vmatprep.mubr.msk.f32.mxu0 %vm14911_vm4, %v17914_v47 }
 0x48d   : > { %13092 = vmatmul.mubr.msk.f32.vlgmr.msra.gmra.mrb[68].mxu0 %vm5791_vm6, %v6153_v0  ;;  %v16989_v0 = vld [vmem:[#allocation3 + $0x27] sm:$0xff] }
 0x48e   : > { %14285 = vmatpush3.bf16.msra.mxu0 %v14284_v9  ;;  %13094 = vmatprep.mubr.msk.f32.mxu0 %vm14911_vm4, %v17914_v47  ;;  %v14317_v9 = vpack.c.bf16 %v10947_v27, %v10946_v58  ;;  %v10982_v58 = vld [vmem:[%s17869_s3 + $0x1b0] sm:$0xff]  ;;  %v10983_v27 = vld [vmem:[%s17869_s3 + $0x1b8] sm:$0xff] }
 0x48f   : > { %14286 = vmatprep.subr.bf16.mxu0 %v17913_v15 }
 0x491   : > { %13095 = vmatmul.mubr.msk.f32.gmra.mrb[70].mxu0 %vm5791_vm6, %v6154_v24  ;;  %v10954_v24 = vld [vmem:[%s17869_s3 + $0x148] sm:$0xff] }
 0x492   : > { %13097 = vmatprep.mubr.msk.f32.mxu0 %vm14911_vm4, %v17914_v47  ;;  %14288 = vmatpush3.bf16.msra.mxu0 %v14287_v11  ;;  %v10953_v11 = vld [vmem:[%s17869_s3 + $0x140] sm:$0xff] }
 0x493   : > { %14289 = vmatprep.subr.bf16.mxu0 %v17913_v15  ;;  %v14320_v20 = vpack.c.bf16 %v10954_v24, %v10953_v11 }
 0x495   : > { %13098 = vmatmul.mubr.msk.f32.gmra.mrb[72].mxu0 %vm5791_vm6, %v6155_v14  ;;  %v17001_v14 = vld [vmem:[#allocation3 + $0x2f] sm:$0xff] }
 0x496   : > { %13100 = vmatprep.mubr.msk.f32.mxu0 %vm14911_vm4, %v17914_v47 }
 0x499   : > { %13101 = vmatmul.mubr.msk.f32.gmra.mrb[74].mxu0 %vm5791_vm6, %v16815_v12 }
 0x49a   : > { %13103 = vmatprep.mubr.msk.f32.mxu0 %vm14911_vm4, %v17914_v47 }
 0x49d   : > { %13104 = vmatmul.mubr.msk.f32.gmra.mrb[76].mxu0 %vm5791_vm6, %v16827_v55 }
 0x49e   : > { %13114 = vmatprep.mubr.msk.f32.mxu0 %vm14911_vm4, %v17914_v47 }
 0x4a1   : > { %13115 = vmatmul.mubr.msk.f32.vlgmr.msra.gmra.mrb[78].mxu0 %vm5791_vm6, %v6273_v62  ;;  %v10963_v62 = vld [vmem:[%s17869_s3 + $0x168] sm:$0xff] }
 0x4a2   : > { %14291 = vmatpush3.bf16.msra.mxu0 %v14290_v44  ;;  %13117 = vmatprep.mubr.msk.f32.mxu0 %vm14911_vm4, %v17914_v47  ;;  %v10956_v44 = vld [vmem:[%s17869_s3 + $0x158] sm:$0xff] }
 0x4a3   : > { %14292 = vmatprep.subr.bf16.mxu0 %v17913_v15  ;;  %v14323_v28 = vpack.c.bf16 %v10956_v44, %v10955_v23 }
 0x4a5   : > { %13118 = vmatmul.mubr.msk.f32.gmra.mrb[80].mxu0 %vm5791_vm6, %v6274_v32 }
 0x4a6   : > { %13120 = vmatprep.mubr.msk.f32.mxu0 %vm14911_vm4, %v17914_v47  ;;  %14294 = vmatpush3.bf16.msra.mxu0 %v14293_v63  ;;  %v17039_v63 = vld [vmem:[#allocation3 + $0x30] sm:$0xff] }
 0x4a7   : > { %14295 = vmatprep.subr.bf16.mxu0 %v17913_v15 }
 0x4a9   : > { %13121 = vmatmul.mubr.msk.f32.gmra.mrb[82].mxu0 %vm5791_vm6, %v6275_v4 }
 0x4aa   : > { %13123 = vmatprep.mubr.msk.f32.mxu0 %vm14911_vm4, %v17914_v47 }
 0x4ad   : > { %13124 = vmatmul.mubr.msk.f32.gmra.mrb[84].mxu0 %vm5791_vm6, %v16850_v7 }
 0x4ae   : > { %13126 = vmatprep.mubr.msk.f32.mxu0 %vm14911_vm4, %v17914_v47 }
 0x4b1   : > { %13127 = vmatmul.mubr.msk.f32.gmra.mrb[86].mxu0 %vm5791_vm6, %v16862_v10 }
 0x4b2   : > { %13137 = vmatprep.mubr.msk.f32.mxu0 %vm14911_vm4, %v17914_v47 }
 0x4b5   : > { %13138 = vmatmul.mubr.msk.f32.vlgmr.msra.gmra.mrb[88].mxu0 %vm5791_vm6, %v6274_v32  ;;  %v14326_v32 = vpack.c.bf16 %v10963_v62, %v10962_v50  ;;  %v17137_v50 = vld [vmem:[#allocation3 + $0x32] sm:$0xff] }
 0x4b6   : > { %14297 = vmatpush3.bf16.msra.mxu0 %v14296_v29  ;;  %13140 = vmatprep.mubr.msk.f32.mxu0 %vm14911_vm4, %v17914_v47 }
 0x4b7   : > { %14298 = vmatprep.subr.bf16.mxu0 %v17913_v15 }
 0x4b9   : > { %13141 = vmatmul.mubr.msk.f32.gmra.mrb[90].mxu0 %vm5791_vm6, %v6275_v4  ;;  %v10964_v4 = vld [vmem:[%s17869_s3 + $0x170] sm:$0xff] }
 0x4ba   : > { %13143 = vmatprep.mubr.msk.f32.mxu0 %vm14911_vm4, %v17914_v47  ;;  %14300 = vmatpush3.bf16.msra.mxu0 %v14299_v53  ;;  %v14329_v5 = vpack.c.bf16 %v10965_v1, %v10964_v4  ;;  %v17075_v53 = vld [vmem:[#allocation3 + $0x38] sm:$0xff]  ;;  %v10990_v4 = vld [vmem:[%s17869_s3 + $0x1c8] sm:$0xff] }
 0x4bb   : > { %14301 = vmatprep.subr.bf16.mxu0 %v17913_v15 }
 0x4bd   : > { %13144 = vmatmul.mubr.msk.f32.gmra.mrb[92].mxu0 %vm5791_vm6, %v16850_v7 }
 0x4be   : > { %13146 = vmatprep.mubr.msk.f32.mxu0 %vm14911_vm4, %v17914_v47 }
 0x4c1   : > { %13147 = vmatmul.mubr.msk.f32.gmra.mrb[94].mxu0 %vm5791_vm6, %v16862_v10 }
 0x4c2   : > { %13149 = vmatprep.mubr.msk.f32.mxu0 %vm14911_vm4, %v17914_v47 }
 0x4c5   : > { %13150 = vmatmul.mubr.msk.f32.gmra.mrb[96].mxu0 %vm5791_vm6, %v16896_v57 }
 0x4c6   : > { %13160 = vmatprep.mubr.msk.f32.mxu0 %vm14911_vm4, %v17914_v47 }
 0x4c9   : > { %13161 = vmatmul.mubr.msk.f32.vlgmr.msra.gmra.mrb[98].mxu0 %vm5791_vm6, %v6513_v16 }
 0x4ca   : > { %14303 = vmatpush3.bf16.msra.mxu0 %v14302_v54  ;;  %13163 = vmatprep.mubr.msk.f32.mxu0 %vm14911_vm4, %v17914_v47  ;;  %v10973_v54 = vld [vmem:[%s17869_s3 + $0x190] sm:$0xff] }
 0x4cb   : > { %14304 = vmatprep.subr.bf16.mxu0 %v17913_v15 }
 0x4cd   : > { %13164 = vmatmul.mubr.msk.f32.gmra.mrb[100].mxu0 %vm5791_vm6, %v6514_v45 }
 0x4ce   : > { %13166 = vmatprep.mubr.msk.f32.mxu0 %vm14911_vm4, %v17914_v47  ;;  %14306 = vmatpush3.bf16.msra.mxu0 %v14305_v33  ;;  %v14335_v33 = vpack.c.bf16 %v10974_v17, %v10973_v54 }
 0x4cf   : > { %14307 = vmatprep.subr.bf16.mxu0 %v17913_v15 }
 0x4d1   : > { %13167 = vmatmul.mubr.msk.f32.gmra.mrb[102].mxu0 %vm5791_vm6, %v6515_v38 }
 0x4d2   : > { %13169 = vmatprep.mubr.msk.f32.mxu0 %vm14911_vm4, %v17914_v47 }
 0x4d5   : > { %13170 = vmatmul.mubr.msk.f32.gmra.mrb[104].mxu0 %vm5791_vm6, %v16919_v48 }
 0x4d6   : > { %13172 = vmatprep.mubr.msk.f32.mxu0 %vm14911_vm4, %v17914_v47 }
 0x4d9   : > { %13173 = vmatmul.mubr.msk.f32.gmra.mrb[106].mxu0 %vm5791_vm6, %v16931_v18 }
 0x4da   : > { %13183 = vmatprep.mubr.msk.f32.mxu0 %vm14911_vm4, %v17914_v47 }
 0x4dd   : > { %13184 = vmatmul.mubr.msk.f32.vlgmr.msra.gmra.mrb[108].mxu0 %vm5791_vm6, %v6633_v34 }
 0x4de   : > { %14309 = vmatpush3.bf16.msra.mxu0 %v14308_v52  ;;  %13186 = vmatprep.mubr.msk.f32.mxu0 %vm14911_vm4, %v17914_v47 }
 0x4df   : > { %14310 = vmatprep.subr.bf16.mxu0 %v17913_v15 }
 0x4e1   : > { %13187 = vmatmul.mubr.msk.f32.gmra.mrb[110].mxu0 %vm5791_vm6, %v6634_v35 }
 0x4e2   : > { %13189 = vmatprep.mubr.msk.f32.mxu0 %vm14911_vm4, %v17914_v47  ;;  %14312 = vmatpush3.bf16.msra.mxu0 %v14311_v37  ;;  %v10981_v37 = vld [vmem:[%s17869_s3 + $0x1a8] sm:$0xff] }
 0x4e3   : > { %14313 = vmatprep.subr.bf16.mxu0 %v17913_v15 }
 0x4e5   : > { %13190 = vmatmul.mubr.msk.f32.gmra.mrb[112].mxu0 %vm5791_vm6, %v6635_v2  ;;  %v17112_v2 = vld [vmem:[#allocation3 + $0x39] sm:$0xff] }
 0x4e6   : > { %13192 = vmatprep.mubr.msk.f32.mxu0 %vm14911_vm4, %v17914_v47 }
 0x4e9   : > { %13193 = vmatmul.mubr.msk.f32.gmra.mrb[114].mxu0 %vm5791_vm6, %v16954_v61 }
 0x4ea   : > { %13195 = vmatprep.mubr.msk.f32.mxu0 %vm14911_vm4, %v17914_v47 }
 0x4ed   : > { %13196 = vmatmul.mubr.msk.f32.gmra.mrb[116].mxu0 %vm5791_vm6, %v16966_v56 }
 0x4ee   : > { %13206 = vmatprep.mubr.msk.f32.mxu0 %vm14911_vm4, %v17914_v47 }
 0x4f1   : > { %13207 = vmatmul.mubr.msk.f32.vlgmr.msra.gmra.mrb[118].mxu0 %vm5791_vm6, %v6753_v8 }
 0x4f2   : > { %14315 = vmatpush3.bf16.msra.mxu0 %v14314_v30  ;;  %13209 = vmatprep.mubr.msk.f32.mxu0 %vm14911_vm4, %v17914_v47 }
 0x4f3   : > { %14316 = vmatprep.subr.bf16.mxu0 %v17913_v15 }
 0x4f5   : > { %13210 = vmatmul.mubr.msk.f32.gmra.mrb[120].mxu0 %vm5791_vm6, %v6754_v25  ;;  %v14341_v25 = vpack.c.bf16 %v10983_v27, %v10982_v58 }
 0x4f6   : > { %13212 = vmatprep.mubr.msk.f32.mxu0 %vm14911_vm4, %v17914_v47  ;;  %14318 = vmatpush3.bf16.msra.mxu0 %v14317_v9 }
 0x4f7   : > { %14319 = vmatprep.subr.bf16.mxu0 %v17913_v15 }
 0x4f9   : > { %13213 = vmatmul.mubr.msk.f32.gmra.mrb[122].mxu0 %vm5791_vm6, %v6755_v42 }
 0x4fa   : > { %13215 = vmatprep.mubr.msk.f32.mxu0 %vm14911_vm4, %v17914_v47 }
 0x4fd   : > { %13216 = vmatmul.mubr.msk.f32.gmra.mrb[124].mxu0 %vm5791_vm6, %v16989_v0 }
 0x4fe   : > { %13218 = vmatprep.mubr.msk.f32.mxu0 %vm14911_vm4, %v17914_v47 }
 0x501   : > { %13219 = vmatmul.mubr.msk.f32.gmra.mrb[126].mxu0 %vm5791_vm6, %v17001_v14 }
 0x502   : > { %13229 = vmatprep.mubr.msk.f32.mxu0 %vm14911_vm4, %v17914_v47 }
 0x505   : > { %13230 = vmatmul.mubr.msk.f32.vlgmr.msra.gmra.mrb[128].mxu0 %vm5791_vm6, %v16739_v22  ;;  %v17027_v22 = vld [vmem:[#allocation3 + $0x28] sm:$0xff] }
 0x506   : > { %14321 = vmatpush3.bf16.msra.mxu0 %v14320_v20  ;;  %13232 = vmatprep.mubr.msk.f32.mxu0 %vm14911_vm4, %v17914_v47  ;;  %v7235_v20 = vld [vmem:[#allocation3 + $0x2a] sm:$0xff] }
 0x507   : > { %14322 = vmatprep.subr.bf16.mxu0 %v17913_v15 }
 0x509   : > { %13233 = vmatmul.mubr.msk.f32.gmra.mrb[130].mxu0 %vm5791_vm6, %v16745_v36 }
 0x50a   : > { %13235 = vmatprep.mubr.msk.f32.mxu0 %vm14911_vm4, %v17914_v47  ;;  %14324 = vmatpush3.bf16.msra.mxu0 %v14323_v28 }
 0x50b   : > { %14325 = vmatprep.subr.bf16.mxu0 %v17913_v15 }
 0x50d   : > { %13236 = vmatmul.mubr.msk.f32.gmra.mrb[132].mxu0 %vm5791_vm6, %v16757_v40 }
 0x50e   : > { %13238 = vmatprep.mubr.msk.f32.mxu0 %vm14911_vm4, %v17914_v47 }
 0x511   : > { %13239 = vmatmul.mubr.msk.f32.gmra.mrb[134].mxu0 %vm5791_vm6, %v17027_v22 }
 0x512   : > { %13241 = vmatprep.mubr.msk.f32.mxu0 %vm14911_vm4, %v17914_v47 }
 0x515   : > { %13242 = vmatmul.mubr.msk.f32.gmra.mrb[136].mxu0 %vm5791_vm6, %v17039_v63 }
 0x516   : > { %13252 = vmatprep.mubr.msk.f32.mxu0 %vm14911_vm4, %v17914_v47 }
 0x519   : > { %13253 = vmatmul.mubr.msk.f32.vlgmr.msra.gmra.mrb[138].mxu0 %vm5791_vm6, %v16745_v36 }
 0x51a   : > { %14327 = vmatpush3.bf16.msra.mxu0 %v14326_v32  ;;  %13255 = vmatprep.mubr.msk.f32.mxu0 %vm14911_vm4, %v17914_v47  ;;  %v10989_v32 = vld [vmem:[%s17869_s3 + $0x1c0] sm:$0xff] }
 0x51b   : > { %14328 = vmatprep.subr.bf16.mxu0 %v17913_v15 }
 0x51d   : > { %13256 = vmatmul.mubr.msk.f32.gmra.mrb[140].mxu0 %vm5791_vm6, %v16757_v40  ;;  %v10971_v40 = vld [vmem:[%s17869_s3 + $0x180] sm:$0xff] }
 0x51e   : > { %13258 = vmatprep.mubr.msk.f32.mxu0 %vm14911_vm4, %v17914_v47  ;;  %14330 = vmatpush3.bf16.msra.mxu0 %v14329_v5  ;;  %v14332_v3 = vpack.c.bf16 %v10972_v46, %v10971_v40  ;;  %v17149_v5 = vld [vmem:[#allocation3 + $0x3a] sm:$0xff]  ;;  %v14344_v40 = vpack.c.bf16 %v10990_v4, %v10989_v32 }
 0x51f   : > { %14331 = vmatprep.subr.bf16.mxu0 %v17913_v15  ;;  %v10991_v46 = vld [vmem:[%s17869_s3 + $0x1d0] sm:$0xff] }
 0x520   : > { %v17224_v32 = vld [vmem:[#allocation3 + $0x3c] sm:$0xff] }
 0x521   : > { %13259 = vmatmul.mubr.msk.f32.gmra.mrb[142].mxu0 %vm5791_vm6, %v17027_v22 }
 0x522   : > { %13261 = vmatprep.mubr.msk.f32.mxu0 %vm14911_vm4, %v17914_v47 }
 0x524   : > { %v5904_v36 = vpop.f32.mrb[38].mxu0 }
 0x525   : > { %v13024_v29 = vpop.f32.mrb[39].mxu0  ;;  %13262 = vmatmul.mubr.msk.f32.gmra.mrb[144].mxu0 %vm5791_vm6, %v17039_v63 }
 0x526   : > { %13264 = vmatprep.mubr.msk.f32.mxu0 %vm14911_vm4, %v17914_v47 }
 0x528   : > { %v5909_v41 = vpop.f32.mrb[40].mxu0 }
 0x529   : > { %v13027_v51 = vpop.f32.mrb[41].mxu0  ;;  %13265 = vmatmul.mubr.msk.f32.gmra.mrb[146].mxu0 %vm5791_vm6, %v17075_v53 }
 0x52a   : > { %13275 = vmatprep.mubr.msk.f32.mxu0 %vm14911_vm4, %v17914_v47 }
 0x52c   : > { %v5914_v13 = vpop.f32.mrb[42].mxu0 }
 0x52d   : > { %v13030_v16 = vpop.f32.mrb[43].mxu0  ;;  %13276 = vmatmul.mubr.msk.f32.vlgmr.msra.gmra.mrb[148].mxu0 %vm5791_vm6, %v16706_v21  ;;  %v7115_v21 = vld [vmem:[#allocation3 + $0x29] sm:$0xff] }
 0x52e   : > { %14333 = vmatpush3.bf16.msra.mxu0 %v14332_v3  ;;  %13278 = vmatprep.mubr.msk.f32.mxu0 %vm14911_vm4, %v17914_v47 }
 0x52f   : > { %14334 = vmatprep.subr.bf16.mxu0 %v17913_v15 }
 0x530   : > { %v5919_v45 = vpop.f32.mrb[44].mxu0 }
 0x531   : > { %v13033_v38 = vpop.f32.mrb[45].mxu0  ;;  %13279 = vmatmul.mubr.msk.f32.gmra.mrb[150].mxu0 %vm5791_vm6, %v16719_v19  ;;  %v10980_v19 = vld [vmem:[%s17869_s3 + $0x1a0] sm:$0xff] }
 0x532   : > { %13281 = vmatprep.mubr.msk.f32.mxu0 %vm14911_vm4, %v17914_v47  ;;  %14336 = vmatpush3.bf16.msra.mxu0 %v14335_v33  ;;  %v14338_v30 = vpack.c.bf16 %v10981_v37, %v10980_v19  ;;  %v7355_v33 = vld [vmem:[#allocation3 + $0x2b] sm:$0xff]  ;;  %v17186_v19 = vld [vmem:[#allocation3 + $0x3b] sm:$0xff] }
 0x533   : > { %14337 = vmatprep.subr.bf16.mxu0 %v17913_v15 }
 0x534   : > { %v5924_v49 = vpop.f32.mrb[46].mxu0 }
 0x535   : > { %v13036_v26 = vpop.f32.mrb[47].mxu0  ;;  %13282 = vmatmul.mubr.msk.f32.gmra.mrb[152].mxu0 %vm5791_vm6, %v7115_v21  ;;  %v17174_v21 = vld [vmem:[#allocation3 + $0x33] sm:$0xff] }
 0x536   : > { %13284 = vmatprep.mubr.msk.f32.mxu0 %vm14911_vm4, %v17914_v47 }
 0x538   : > { %v6009_v52 = vpop.f32.mrb[48].mxu0 }
 0x539   : > { %v6010_v60 = vadd.f32 %v6009_v52, %v5904_v36  ;;  %v13047_v34 = vpop.f32.mrb[49].mxu0  ;;  %13285 = vmatmul.mubr.msk.f32.gmra.mrb[154].mxu0 %vm5791_vm6, %v17100_v31  ;;  %v10998_v52 = vld [vmem:[%s17869_s3 + $0x1e0] sm:$0xff] }
 0x53a   : > { %13287 = vmatprep.mubr.msk.f32.mxu0 %vm14911_vm4, %v17914_v47 }
 0x53c   : > { %v6014_v35 = vpop.f32.mrb[50].mxu0 }
 0x53d   : > { %v6015_v39 = vadd.f32 %v6014_v35, %v5909_v41  ;;  %v13050_v6 = vpop.f32.mrb[51].mxu0  ;;  %13288 = vmatmul.mubr.msk.f32.gmra.mrb[156].mxu0 %vm5791_vm6, %v17112_v2  ;;  %v10992_v41 = vld [vmem:[%s17869_s3 + $0x1d8] sm:$0xff] }
 0x53e   : > { %13298 = vmatprep.mubr.msk.f32.mxu0 %vm14911_vm4, %v17914_v47  ;;  %v14347_v54 = vpack.c.bf16 %v10992_v41, %v10991_v46  ;;  %v11000_v6 = vld [vmem:[%s17869_s3 + $0x1f0] sm:$0xff] }
 0x540   : > { %v6019_v8 = vpop.f32.mrb[52].mxu0 }
 0x541   : > { %v13053_v9 = vpop.f32.mrb[53].mxu0  ;;  %13299 = vmatmul.mubr.msk.f32.vlgmr.msra.gmra.mrb[158].mxu0 %vm5791_vm6, %v16780_v59 }
 0x542   : > { %14339 = vmatpush3.bf16.msra.mxu0 %v14338_v30  ;;  %13301 = vmatprep.mubr.msk.f32.mxu0 %vm14911_vm4, %v17914_v47  ;;  %v11001_v30 = vld [vmem:[%s17869_s3 + $0x1f8] sm:$0xff] }
 0x543   : > { %14340 = vmatprep.subr.bf16.mxu0 %v17913_v15  ;;  %v14353_v8 = vpack.c.bf16 %v11001_v30, %v11000_v6 }
 0x544   : > { %v6024_v42 = vpop.f32.mrb[54].mxu0 }
 0x545   : > { %v6025_v11 = vadd.f32 %v6024_v42, %v5919_v45  ;;  %v13056_v24 = vpop.f32.mrb[55].mxu0  ;;  %13302 = vmatmul.mubr.msk.f32.gmra.mrb[160].mxu0 %vm5791_vm6, %v16792_v43 }
 0x546   : > { %13304 = vmatprep.mubr.msk.f32.mxu0 %vm14911_vm4, %v17914_v47  ;;  %14342 = vmatpush3.bf16.msra.mxu0 %v14341_v25 }
 0x547   : > { %14343 = vmatprep.subr.bf16.mxu0 %v17913_v15 }
 0x548   : > { %v6029_v59 = vpop.f32.mrb[56].mxu0 }
 0x549   : > { %v13059_v23 = vpop.f32.mrb[57].mxu0  ;;  %13305 = vmatmul.mubr.msk.f32.gmra.mrb[162].mxu0 %vm5791_vm6, %v7235_v20  ;;  %v6030_v44 = vadd.f32 %v6029_v59, %v5924_v49  ;;  %v17212_v20 = vld [vmem:[#allocation3 + $0x34] sm:$0xff] }
 0x54a   : > { %13307 = vmatprep.mubr.msk.f32.mxu0 %vm14911_vm4, %v17914_v47 }
 0x54c   : > { %v6124_v28 = vpop.f32.mrb[58].mxu0 }
 0x54d   : > { %v13070_v62 = vpop.f32.mrb[59].mxu0  ;;  %13308 = vmatmul.mubr.msk.f32.gmra.mrb[164].mxu0 %vm5791_vm6, %v17137_v50  ;;  %v6148_v43 = vadd.f32 %v6124_v28, %v6010_v60  ;;  %v10999_v60 = vld [vmem:[%s17869_s3 + $0x1e8] sm:$0xff]  ;;  %v11007_v28 = vld [vmem:[%s17869_s3 + $0x200] sm:$0xff] }
 0x54e   : > { %13310 = vmatprep.mubr.msk.f32.mxu0 %vm14911_vm4, %v17914_v47  ;;  %v11008_v62 = vld [vmem:[%s17869_s3 + $0x208] sm:$0xff] }
 0x550   : > { %v6129_v1 = vpop.f32.mrb[60].mxu0 }
 0x551   : > { %v13073_v36 = vpop.f32.mrb[61].mxu0  ;;  %13311 = vmatmul.mubr.msk.f32.gmra.mrb[166].mxu0 %vm5791_vm6, %v17149_v5  ;;  %v6149_v29 = vadd.f32 %v6129_v1, %v6015_v39  ;;  %v14350_v39 = vpack.c.bf16 %v10999_v60, %v10998_v52 }
 0x552   : > { %13321 = vmatprep.mubr.msk.f32.mxu0 %vm14911_vm4, %v17914_v47  ;;  %v14356_v36 = vpack.c.bf16 %v11008_v62, %v11007_v28 }
 0x554   : > { %v6134_v51 = vpop.f32.mrb[62].mxu0 }
 0x555   : > { %v13076_v3 = vpop.f32.mrb[63].mxu0  ;;  %13322 = vmatmul.mubr.msk.f32.vlgmr.msra.gmra.mrb[168].mxu0 %vm5791_vm6, %v16815_v12 }
 0x556   : > { %14345 = vmatpush3.bf16.msra.mxu0 %v14344_v40  ;;  %13324 = vmatprep.mubr.msk.f32.mxu0 %vm14911_vm4, %v17914_v47  ;;  %v11010_v40 = vld [vmem:[%s17869_s3 + $0x218] sm:$0xff] }
 0x557   : > { %14346 = vmatprep.subr.bf16.mxu0 %v17913_v15 }
 0x558   : > { %v6139_v17 = vpop.f32.mrb[64].mxu0 }
 0x559   : > { %v13079_v13 = vpop.f32.mrb[65].mxu0  ;;  %13325 = vmatmul.mubr.msk.f32.gmra.mrb[170].mxu0 %vm5791_vm6, %v16827_v55  ;;  %v6151_v16 = vadd.f32 %v6139_v17, %v6025_v11 }
 0x55a   : > { %13327 = vmatprep.mubr.msk.f32.mxu0 %vm14911_vm4, %v17914_v47  ;;  %14348 = vmatpush3.bf16.msra.mxu0 %v14347_v54 }
 0x55b   : > { %14349 = vmatprep.subr.bf16.mxu0 %v17913_v15 }
 0x55c   : > { %v6144_v12 = vpop.f32.mrb[66].mxu0 }
 0x55d   : > { %v6152_v45 = vadd.f32 %v6144_v12, %v6030_v44  ;;  %v13082_v38 = vpop.f32.mrb[67].mxu0  ;;  %13328 = vmatmul.mubr.msk.f32.gmra.mrb[172].mxu0 %vm5791_vm6, %v7355_v33 }
 0x55e   : > { %13330 = vmatprep.mubr.msk.f32.mxu0 %vm14911_vm4, %v17914_v47  ;;  %v11017_v38 = vld [vmem:[%s17869_s3 + $0x228] sm:$0xff] }
 0x560   : > { %v6244_v49 = vpop.f32.mrb[68].mxu0 }
 0x561   : > { %v6268_v55 = vadd.f32 %v6244_v49, %v6148_v43  ;;  %v13093_v26 = vpop.f32.mrb[69].mxu0  ;;  %13331 = vmatmul.mubr.msk.f32.gmra.mrb[174].mxu0 %vm5791_vm6, %v17174_v21 }
 0x562   : > { %13333 = vmatprep.mubr.msk.f32.mxu0 %vm14911_vm4, %v17914_v47 }
 0x564   : > { %v6249_v34 = vpop.f32.mrb[70].mxu0 }
 0x565   : > { %v6269_v37 = vadd.f32 %v6249_v34, %v6149_v29  ;;  %v13096_v35 = vpop.f32.mrb[71].mxu0  ;;  %13334 = vmatmul.mubr.msk.f32.gmra.mrb[176].mxu0 %vm5791_vm6, %v17186_v19  ;;  %v11009_v29 = vld [vmem:[%s17869_s3 + $0x210] sm:$0xff] }
 0x566   : > { %13344 = vmatprep.mubr.msk.f32.mxu0 %vm14911_vm4, %v17914_v47  ;;  %v14359_v51 = vpack.c.bf16 %v11010_v40, %v11009_v29  ;;  %v11018_v34 = vld [vmem:[%s17869_s3 + $0x230] sm:$0xff] }
 0x568   : > { %v6254_v58 = vpop.f32.mrb[72].mxu0 }
 0x569   : > { %v13099_v27 = vpop.f32.mrb[73].mxu0  ;;  %13345 = vmatmul.mubr.msk.f32.vlgmr.msra.gmra.mrb[178].mxu0 %vm5791_vm6, %v16850_v7 }
 0x56a   : > { %14351 = vmatpush3.bf16.msra.mxu0 %v14350_v39  ;;  %13347 = vmatprep.mubr.msk.f32.mxu0 %vm14911_vm4, %v17914_v47 }
 0x56b   : > { %14352 = vmatprep.subr.bf16.mxu0 %v17913_v15 }
 0x56c   : > { %v6259_v9 = vpop.f32.mrb[74].mxu0 }
 0x56d   : > { %v6271_v25 = vadd.f32 %v6259_v9, %v6151_v16  ;;  %v13102_v42 = vpop.f32.mrb[75].mxu0  ;;  %13348 = vmatmul.mubr.msk.f32.gmra.mrb[180].mxu0 %vm5791_vm6, %v16862_v10 }
 0x56e   : > { %13350 = vmatprep.mubr.msk.f32.mxu0 %vm14911_vm4, %v17914_v47  ;;  %14354 = vmatpush3.bf16.msra.mxu0 %v14353_v8  ;;  %v7715_v8 = vld [vmem:[#allocation3 + $0x35] sm:$0xff] }
 0x56f   : > { %14355 = vmatprep.subr.bf16.mxu0 %v17913_v15 }
 0x570   : > { %v6264_v7 = vpop.f32.mrb[76].mxu0 }
 0x571   : > { %v6272_v11 = vadd.f32 %v6264_v7, %v6152_v45  ;;  %v13105_v24 = vpop.f32.mrb[77].mxu0  ;;  %13351 = vmatmul.mubr.msk.f32.gmra.mrb[182].mxu0 %vm5791_vm6, %v16896_v57  ;;  %v7716_v7 = vld [vmem:[#allocation3 + $0x3d] sm:$0xff] }
 0x572   : > { %13353 = vmatprep.mubr.msk.f32.mxu0 %vm14911_vm4, %v17914_v47 }
 0x574   : > { %v6364_v59 = vpop.f32.mrb[78].mxu0 }
 0x575   : > { %v6388_v23 = vadd.f32 %v6364_v59, %v6268_v55  ;;  %v13116_v44 = vpop.f32.mrb[79].mxu0  ;;  %13354 = vmatmul.mubr.msk.f32.gmra.mrb[184].mxu0 %vm5791_vm6, %v17212_v20  ;;  %v17260_v55 = vld [vmem:[#allocation3 + $0x44] sm:$0xff]  ;;  %v11026_v59 = vld [vmem:[%s17869_s3 + $0x248] sm:$0xff] }
 0x576   : > { %13356 = vmatprep.mubr.msk.f32.mxu0 %vm14911_vm4, %v17914_v47  ;;  %v7717_v44 = vld [vmem:[#allocation3 + $0x45] sm:$0xff] }
 0x578   : > { %v6369_v43 = vpop.f32.mrb[80].mxu0 }
 0x579   : > { %v6389_v4 = vadd.f32 %v6369_v43, %v6269_v37  ;;  %v13119_v1 = vpop.f32.mrb[81].mxu0  ;;  %13357 = vmatmul.mubr.msk.f32.gmra.mrb[186].mxu0 %vm5791_vm6, %v17224_v32  ;;  %v11019_v37 = vld [vmem:[%s17869_s3 + $0x238] sm:$0xff] }
 0x57a   : > { %13367 = vmatprep.mubr.msk.f32.mxu0 %vm14911_vm4, %v17914_v47  ;;  %v14365_v6 = vpack.c.bf16 %v11019_v37, %v11018_v34  ;;  %v11028_v1 = vld [vmem:[%s17869_s3 + $0x258] sm:$0xff] }
 0x57c   : > { %v6374_v46 = vpop.f32.mrb[82].mxu0 }
 0x57d   : > { %v13122_v41 = vpop.f32.mrb[83].mxu0  ;;  %13368 = vmatmul.mubr.msk.f32.vlgmr.msra.gmra.mrb[188].mxu0 %vm5791_vm6, %v16862_v10 }
 0x57e   : > { %14357 = vmatpush3.bf16.msra.mxu0 %v14356_v36  ;;  %13370 = vmatprep.mubr.msk.f32.mxu0 %vm14911_vm4, %v17914_v47 }
 0x57f   : > { %14358 = vmatprep.subr.bf16.mxu0 %v17913_v15 }
 0x580   : > { %v6379_v3 = vpop.f32.mrb[84].mxu0 }
 0x581   : > { %v6391_v54 = vadd.f32 %v6379_v3, %v6271_v25  ;;  %v13125_v17 = vpop.f32.mrb[85].mxu0  ;;  %13371 = vmatmul.mubr.msk.f32.gmra.mrb[190].mxu0 %vm5791_vm6, %v16896_v57  ;;  %v11016_v57 = vld [vmem:[%s17869_s3 + $0x220] sm:$0xff]  ;;  %v7835_v3 = vld [vmem:[#allocation3 + $0x36] sm:$0xff] }
 0x582   : > { %13373 = vmatprep.mubr.msk.f32.mxu0 %vm14911_vm4, %v17914_v47  ;;  %14360 = vmatpush3.bf16.msra.mxu0 %v14359_v51  ;;  %v14362_v60 = vpack.c.bf16 %v11017_v38, %v11016_v57  ;;  %v7837_v57 = vld [vmem:[#allocation3 + $0x46] sm:$0xff] }
 0x583   : > { %14361 = vmatprep.subr.bf16.mxu0 %v17913_v15 }
 0x584   : > { %v6384_v10 = vpop.f32.mrb[86].mxu0 }
 0x585   : > { %v6392_v13 = vadd.f32 %v6384_v10, %v6272_v11  ;;  %v13128_v16 = vpop.f32.mrb[87].mxu0  ;;  %13374 = vmatmul.mubr.msk.f32.gmra.mrb[192].mxu0 %vm5791_vm6, %v17212_v20 }
 0x586   : > { %13376 = vmatprep.mubr.msk.f32.mxu0 %vm14911_vm4, %v17914_v47 }
 0x588   : > { %v6484_v12 = vpop.f32.mrb[88].mxu0 }
 0x589   : > { %v6508_v33 = vadd.f32 %v6484_v12, %v6388_v23  ;;  %v13139_v45 = vpop.f32.mrb[89].mxu0  ;;  %13377 = vmatmul.mubr.msk.f32.gmra.mrb[194].mxu0 %vm5791_vm6, %v17224_v32 }
 0x58a   : > { %13379 = vmatprep.mubr.msk.f32.mxu0 %vm14911_vm4, %v17914_v47 }
 0x58c   : > { %v6489_v49 = vpop.f32.mrb[90].mxu0 }
 0x58d   : > { %v6509_v26 = vadd.f32 %v6489_v49, %v6389_v4  ;;  %v13142_v52 = vpop.f32.mrb[91].mxu0  ;;  %13380 = vmatmul.mubr.msk.f32.gmra.mrb[196].mxu0 %vm5791_vm6, %v17260_v55  ;;  %v11027_v4 = vld [vmem:[%s17869_s3 + $0x250] sm:$0xff] }
 0x58e   : > { %13390 = vmatprep.mubr.msk.f32.mxu0 %vm14911_vm4, %v17914_v47  ;;  %v14371_v40 = vpack.c.bf16 %v11028_v1, %v11027_v4  ;;  %v11036_v52 = vld [vmem:[%s17869_s3 + $0x270] sm:$0xff] }
 0x590   : > { %v6494_v35 = vpop.f32.mrb[92].mxu0 }
 0x591   : > { %v13145_v39 = vpop.f32.mrb[93].mxu0  ;;  %13391 = vmatmul.mubr.msk.f32.vlgmr.msra.gmra.mrb[198].mxu0 %vm5791_vm6, %v16919_v48 }
 0x592   : > { %14363 = vmatpush3.bf16.msra.mxu0 %v14362_v60  ;;  %13393 = vmatprep.mubr.msk.f32.mxu0 %vm14911_vm4, %v17914_v47  ;;  %v11037_v60 = vld [vmem:[%s17869_s3 + $0x278] sm:$0xff] }
 0x593   : > { %14364 = vmatprep.subr.bf16.mxu0 %v17913_v15  ;;  %v14377_v35 = vpack.c.bf16 %v11037_v60, %v11036_v52 }
 0x594   : > { %v6499_v30 = vpop.f32.mrb[94].mxu0 }
 0x595   : > { %v6511_v58 = vadd.f32 %v6499_v30, %v6391_v54  ;;  %v13148_v27 = vpop.f32.mrb[95].mxu0  ;;  %13394 = vmatmul.mubr.msk.f32.gmra.mrb[200].mxu0 %vm5791_vm6, %v16931_v18  ;;  %v11025_v18 = vld [vmem:[%s17869_s3 + $0x240] sm:$0xff] }
 0x596   : > { %13396 = vmatprep.mubr.msk.f32.mxu0 %vm14911_vm4, %v17914_v47  ;;  %14366 = vmatpush3.bf16.msra.mxu0 %v14365_v6  ;;  %v14368_v43 = vpack.c.bf16 %v11026_v59, %v11025_v18 }
 0x597   : > { %14367 = vmatprep.subr.bf16.mxu0 %v17913_v15 }
 0x598   : > { %v6504_v48 = vpop.f32.mrb[96].mxu0 }
 0x599   : > { %v6512_v9 = vadd.f32 %v6504_v48, %v6392_v13  ;;  %v13151_v25 = vpop.f32.mrb[97].mxu0  ;;  %13397 = vmatmul.mubr.msk.f32.gmra.mrb[202].mxu0 %vm5791_vm6, %v7715_v8  ;;  %v7836_v13 = vld [vmem:[#allocation3 + $0x3e] sm:$0xff] }
 0x59a   : > { %13399 = vmatprep.mubr.msk.f32.mxu0 %vm14911_vm4, %v17914_v47 }
 0x59c   : > { %v6604_v42 = vpop.f32.mrb[98].mxu0 }
 0x59d   : > { %v6628_v11 = vadd.f32 %v6604_v42, %v6508_v33  ;;  %v13162_v24 = vpop.f32.mrb[99].mxu0  ;;  %13400 = vmatmul.mubr.msk.f32.gmra.mrb[204].mxu0 %vm5791_vm6, %v7716_v7  ;;  %v11035_v33 = vld [vmem:[%s17869_s3 + $0x268] sm:$0xff] }
 0x59e   : > { %13402 = vmatprep.mubr.msk.f32.mxu0 %vm14911_vm4, %v17914_v47  ;;  %v11044_v7 = vld [vmem:[%s17869_s3 + $0x288] sm:$0xff]  ;;  %v7957_v24 = vld [vmem:[#allocation3 + $0x47] sm:$0xff] }
 0x5a0   : > { %v6609_v23 = vpop.f32.mrb[100].mxu0 }
 0x5a1   : > { %v6629_v28 = vadd.f32 %v6609_v23, %v6509_v26  ;;  %v13165_v62 = vpop.f32.mrb[101].mxu0  ;;  %13403 = vmatmul.mubr.msk.f32.gmra.mrb[206].mxu0 %vm5791_vm6, %v7717_v44  ;;  %v11045_v44 = vld [vmem:[%s17869_s3 + $0x290] sm:$0xff] }
 0x5a2   : > { %13413 = vmatprep.mubr.msk.f32.mxu0 %vm14911_vm4, %v17914_v47 }
 0x5a4   : > { %v6614_v36 = vpop.f32.mrb[102].mxu0 }
 0x5a5   : > { %v13168_v29 = vpop.f32.mrb[103].mxu0  ;;  %13414 = vmatmul.mubr.msk.f32.vlgmr.msra.gmra.mrb[208].mxu0 %vm5791_vm6, %v16954_v61 }
 0x5a6   : > { %14369 = vmatpush3.bf16.msra.mxu0 %v14368_v43  ;;  %13416 = vmatprep.mubr.msk.f32.mxu0 %vm14911_vm4, %v17914_v47 }
 0x5a7   : > { %14370 = vmatprep.subr.bf16.mxu0 %v17913_v15 }
 0x5a8   : > { %v6619_v46 = vpop.f32.mrb[104].mxu0 }
 0x5a9   : > { %v6631_v41 = vadd.f32 %v6619_v46, %v6511_v58  ;;  %v13171_v51 = vpop.f32.mrb[105].mxu0  ;;  %13417 = vmatmul.mubr.msk.f32.gmra.mrb[210].mxu0 %vm5791_vm6, %v16966_v56  ;;  %v11034_v56 = vld [vmem:[%s17869_s3 + $0x260] sm:$0xff]  ;;  %v7955_v58 = vld [vmem:[#allocation3 + $0x37] sm:$0xff] }
 0x5aa   : > { %13419 = vmatprep.mubr.msk.f32.mxu0 %vm14911_vm4, %v17914_v47  ;;  %14372 = vmatpush3.bf16.msra.mxu0 %v14371_v40  ;;  %v14374_v26 = vpack.c.bf16 %v11035_v33, %v11034_v56  ;;  %v8076_v51 = vld [vmem:[#allocation3 + $0x40] sm:$0xff]  ;;  %v11054_v33 = vld [vmem:[%s17869_s3 + $0x2b0] sm:$0xff] }
 0x5ab   : > { %14373 = vmatprep.subr.bf16.mxu0 %v17913_v15 }
 0x5ac   : > { %v6624_v61 = vpop.f32.mrb[106].mxu0 }
 0x5ad   : > { %v6632_v54 = vadd.f32 %v6624_v61, %v6512_v9  ;;  %v13174_v17 = vpop.f32.mrb[107].mxu0  ;;  %13420 = vmatmul.mubr.msk.f32.gmra.mrb[212].mxu0 %vm5791_vm6, %v7835_v3  ;;  %v7956_v9 = vld [vmem:[#allocation3 + $0x3f] sm:$0xff] }
 0x5ae   : > { %13422 = vmatprep.mubr.msk.f32.mxu0 %vm14911_vm4, %v17914_v47  ;;  %v11053_v17 = vld [vmem:[%s17869_s3 + $0x2a8] sm:$0xff] }
 0x5b0   : > { %v6724_v10 = vpop.f32.mrb[108].mxu0 }
 0x5b1   : > { %v6748_v16 = vadd.f32 %v6724_v10, %v6628_v11  ;;  %v13185_v12 = vpop.f32.mrb[109].mxu0  ;;  %13423 = vmatmul.mubr.msk.f32.gmra.mrb[214].mxu0 %vm5791_vm6, %v7836_v13  ;;  %v8077_v13 = vld [vmem:[#allocation3 + $0x48] sm:$0xff] }
 0x5b2   : > { %13425 = vmatprep.mubr.msk.f32.mxu0 %vm14911_vm4, %v17914_v47 }
 0x5b4   : > { %v6729_v45 = vpop.f32.mrb[110].mxu0 }
 0x5b5   : > { %v6749_v38 = vadd.f32 %v6729_v45, %v6629_v28  ;;  %v13188_v49 = vpop.f32.mrb[111].mxu0  ;;  %13426 = vmatmul.mubr.msk.f32.gmra.mrb[216].mxu0 %vm5791_vm6, %v7837_v57  ;;  %v11046_v28 = vld [vmem:[%s17869_s3 + $0x298] sm:$0xff] }
 0x5b6   : > { %13436 = vmatprep.mubr.msk.f32.mxu0 %vm14911_vm4, %v17914_v47  ;;  %v14383_v4 = vpack.c.bf16 %v11046_v28, %v11045_v44  ;;  %v11055_v45 = vld [vmem:[%s17869_s3 + $0x2b8] sm:$0xff] }
 0x5b7   : > { %v14389_v49 = vpack.c.bf16 %v11055_v45, %v11054_v33  ;;  %v8436_v45 = vld [vmem:[#allocation3 + $0x4a] sm:$0xff] }
 0x5b8   : > { %v6734_v34 = vpop.f32.mrb[112].mxu0 }
 0x5b9   : > { %v13191_v37 = vpop.f32.mrb[113].mxu0  ;;  %13437 = vmatmul.mubr.msk.f32.vlgmr.msra.gmra.mrb[218].mxu0 %vm5791_vm6, %v16989_v0 }
 0x5ba   : > { %14375 = vmatpush3.bf16.msra.mxu0 %v14374_v26  ;;  %13439 = vmatprep.mubr.msk.f32.mxu0 %vm14911_vm4, %v17914_v47 }
 0x5bb   : > { %14376 = vmatprep.subr.bf16.mxu0 %v17913_v15 }
 0x5bc   : > { %v6739_v39 = vpop.f32.mrb[114].mxu0 }
 0x5bd   : > { %v6751_v6 = vadd.f32 %v6739_v39, %v6631_v41  ;;  %v13194_v30 = vpop.f32.mrb[115].mxu0  ;;  %13440 = vmatmul.mubr.msk.f32.gmra.mrb[220].mxu0 %vm5791_vm6, %v17001_v14  ;;  %v11043_v14 = vld [vmem:[%s17869_s3 + $0x280] sm:$0xff] }
 0x5be   : > { %13442 = vmatprep.mubr.msk.f32.mxu0 %vm14911_vm4, %v17914_v47  ;;  %14378 = vmatpush3.bf16.msra.mxu0 %v14377_v35  ;;  %v14380_v23 = vpack.c.bf16 %v11044_v7, %v11043_v14  ;;  %v11062_v30 = vld [vmem:[%s17869_s3 + $0x2c8] sm:$0xff] }
 0x5bf   : > { %14379 = vmatprep.subr.bf16.mxu0 %v17913_v15 }
 0x5c0   : > { %v6744_v0 = vpop.f32.mrb[116].mxu0 }
 0x5c1   : > { %v6752_v27 = vadd.f32 %v6744_v0, %v6632_v54  ;;  %v13197_v48 = vpop.f32.mrb[117].mxu0  ;;  %13443 = vmatmul.mubr.msk.f32.gmra.mrb[222].mxu0 %vm5791_vm6, %v7955_v58  ;;  %v11052_v54 = vld [vmem:[%s17869_s3 + $0x2a0] sm:$0xff]  ;;  %v8197_v58 = vld [vmem:[#allocation3 + $0x50] sm:$0xff] }
 0x5c2   : > { %13445 = vmatprep.mubr.msk.f32.mxu0 %vm14911_vm4, %v17914_v47  ;;  %v14386_v56 = vpack.c.bf16 %v11053_v17, %v11052_v54 }
 0x5c4   : > { %v6844_v8 = vpop.f32.mrb[118].mxu0 }
 0x5c5   : > { %v6868_v25 = vadd.f32 %v6844_v8, %v6748_v16  ;;  %v13208_v42 = vpop.f32.mrb[119].mxu0  ;;  %13446 = vmatmul.mubr.msk.f32.gmra.mrb[224].mxu0 %vm5791_vm6, %v7956_v9  ;;  %v11063_v9 = vld [vmem:[%s17869_s3 + $0x2d0] sm:$0xff] }
 0x5c6   : > { %13448 = vmatprep.mubr.msk.f32.mxu0 %vm14911_vm4, %v17914_v47 }
 0x5c8   : > { %v6849_v11 = vpop.f32.mrb[120].mxu0 }
 0x5c9   : > { %v6869_v18 = vadd.f32 %v6849_v11, %v6749_v38  ;;  %v13211_v59 = vpop.f32.mrb[121].mxu0  ;;  %13449 = vmatmul.mubr.msk.f32.gmra.mrb[226].mxu0 %vm5791_vm6, %v7957_v24 }
 0x5ca   : > { %13459 = vmatprep.mubr.msk.f32.mxu0 %vm14911_vm4, %v17914_v47  ;;  %v8315_v59 = vld [vmem:[#allocation3 + $0x41] sm:$0xff] }
 0x5cc   : > { %v6854_v62 = vpop.f32.mrb[122].mxu0 }
 0x5cd   : > { %v13214_v43 = vpop.f32.mrb[123].mxu0  ;;  %13460 = vmatmul.mubr.msk.f32.vlgmr.msra.gmra.mrb[228].mxu0 %vm5791_vm6, %v17027_v22  ;;  %v8316_v62 = vld [vmem:[#allocation3 + $0x49] sm:$0xff] }
 0x5ce   : > { %14381 = vmatpush3.bf16.msra.mxu0 %v14380_v23  ;;  %13462 = vmatprep.mubr.msk.f32.mxu0 %vm14911_vm4, %v17914_v47 }
 0x5cf   : > { %14382 = vmatprep.subr.bf16.mxu0 %v17913_v15 }
 0x5d0   : > { %v6859_v1 = vpop.f32.mrb[124].mxu0 }
 0x5d1   : > { %v6871_v36 = vadd.f32 %v6859_v1, %v6751_v6  ;;  %v13217_v29 = vpop.f32.mrb[125].mxu0  ;;  %13463 = vmatmul.mubr.msk.f32.gmra.mrb[230].mxu0 %vm5791_vm6, %v17039_v63  ;;  %v11071_v1 = vld [vmem:[%s17869_s3 + $0x2e8] sm:$0xff] }
 0x5d2   : > { %13465 = vmatprep.mubr.msk.f32.mxu0 %vm14911_vm4, %v17914_v47  ;;  %14384 = vmatpush3.bf16.msra.mxu0 %v14383_v4  ;;  %v8317_v29 = vld [vmem:[#allocation3 + $0x51] sm:$0xff] }
 0x5d3   : > { %14385 = vmatprep.subr.bf16.mxu0 %v17913_v15 }
 0x5d4   : > { %v6864_v22 = vpop.f32.mrb[126].mxu0 }
 0x5d5   : > { %v6872_v40 = vadd.f32 %v6864_v22, %v6752_v27  ;;  %v13220_v46 = vpop.f32.mrb[127].mxu0  ;;  %13466 = vmatmul.mubr.msk.f32.gmra.mrb[232].mxu0 %vm5791_vm6, %v17075_v53 }
 0x5d6   : > { %13468 = vmatprep.mubr.msk.f32.mxu0 %vm14911_vm4, %v17914_v47 }
 0x5d8   : > { %v6964_v41 = vpop.f32.mrb[128].mxu0 }
 0x5d9   : > { %v6988_v61 = vadd.f32 %v6964_v41, %v6868_v25  ;;  %v13231_v3 = vpop.f32.mrb[129].mxu0  ;;  %13469 = vmatmul.mubr.msk.f32.gmra.mrb[234].mxu0 %vm5791_vm6, %v8076_v51  ;;  %v11064_v25 = vld [vmem:[%s17869_s3 + $0x2d8] sm:$0xff]  ;;  %v11072_v41 = vld [vmem:[%s17869_s3 + $0x2f0] sm:$0xff] }
 0x5da   : > { %13471 = vmatprep.mubr.msk.f32.mxu0 %vm14911_vm4, %v17914_v47  ;;  %v14395_v7 = vpack.c.bf16 %v11064_v25, %v11063_v9  ;;  %v8556_v25 = vld [vmem:[#allocation3 + $0x4b] sm:$0xff] }
 0x5dc   : > { %v6969_v10 = vpop.f32.mrb[130].mxu0 }
 0x5dd   : > { %v6989_v16 = vadd.f32 %v6969_v10, %v6869_v18  ;;  %v13234_v12 = vpop.f32.mrb[131].mxu0  ;;  %13472 = vmatmul.mubr.msk.f32.gmra.mrb[236].mxu0 %vm5791_vm6, %v8077_v13 }
 0x5de   : > { %13482 = vmatprep.mubr.msk.f32.mxu0 %vm14911_vm4, %v17914_v47 }
 0x5e0   : > { %v6974_v57 = vpop.f32.mrb[132].mxu0 }
 0x5e1   : > { %v13237_v38 = vpop.f32.mrb[133].mxu0  ;;  %13483 = vmatmul.mubr.msk.f32.vlgmr.msra.gmra.mrb[238].mxu0 %vm5791_vm6, %v17039_v63 }
 0x5e2   : > { %14387 = vmatpush3.bf16.msra.mxu0 %v14386_v56  ;;  %13485 = vmatprep.mubr.msk.f32.mxu0 %vm14911_vm4, %v17914_v47 }
 0x5e3   : > { %14388 = vmatprep.subr.bf16.mxu0 %v17913_v15 }
 0x5e4   : > { %v6979_v26 = vpop.f32.mrb[134].mxu0 }
 0x5e5   : > { %v6991_v52 = vadd.f32 %v6979_v26, %v6871_v36  ;;  %v13240_v60 = vpop.f32.mrb[135].mxu0  ;;  %13486 = vmatmul.mubr.msk.f32.gmra.mrb[240].mxu0 %vm5791_vm6, %v17075_v53  ;;  %v11061_v53 = vld [vmem:[%s17869_s3 + $0x2c0] sm:$0xff] }
 0x5e6   : > { %13488 = vmatprep.mubr.msk.f32.mxu0 %vm14911_vm4, %v17914_v47  ;;  %14390 = vmatpush3.bf16.msra.mxu0 %v14389_v49  ;;  %v14392_v8 = vpack.c.bf16 %v11062_v30, %v11061_v53  ;;  %v11080_v49 = vld [vmem:[%s17869_s3 + $0x308] sm:$0xff] }
 0x5e7   : > { %14391 = vmatprep.subr.bf16.mxu0 %v17913_v15 }
 0x5e8   : > { %v6984_v63 = vpop.f32.mrb[136].mxu0 }
 0x5e9   : > { %v6992_v34 = vadd.f32 %v6984_v63, %v6872_v40  ;;  %v13243_v37 = vpop.f32.mrb[137].mxu0  ;;  %13489 = vmatmul.mubr.msk.f32.gmra.mrb[242].mxu0 %vm5791_vm6, %v8076_v51  ;;  %v11073_v51 = vld [vmem:[%s17869_s3 + $0x2f8] sm:$0xff] }
 0x5ea   : > { %13491 = vmatprep.mubr.msk.f32.mxu0 %vm14911_vm4, %v17914_v47  ;;  %v14401_v54 = vpack.c.bf16 %v11073_v51, %v11072_v41  ;;  %v11081_v37 = vld [vmem:[%s17869_s3 + $0x310] sm:$0xff] }
 0x5ec   : > { %v7084_v35 = vpop.f32.mrb[138].mxu0 }
 0x5ed   : > { %v7108_v39 = vadd.f32 %v7084_v35, %v6988_v61  ;;  %v13254_v6 = vpop.f32.mrb[139].mxu0  ;;  %13492 = vmatmul.mubr.msk.f32.gmra.mrb[244].mxu0 %vm5791_vm6, %v8077_v13  ;;  %v11082_v35 = vld [vmem:[%s17869_s3 + $0x318] sm:$0xff] }
 0x5ee   : > { %13494 = vmatprep.mubr.msk.f32.mxu0 %vm14911_vm4, %v17914_v47  ;;  %v14407_v53 = vpack.c.bf16 %v11082_v35, %v11081_v37 }
 0x5f0   : > { %v7089_v0 = vpop.f32.mrb[140].mxu0 }
 0x5f1   : > { %v7109_v27 = vadd.f32 %v7089_v0, %v6989_v16  ;;  %v13257_v48 = vpop.f32.mrb[141].mxu0  ;;  %13495 = vmatmul.mubr.msk.f32.gmra.mrb[246].mxu0 %vm5791_vm6, %v8197_v58  ;;  %v8435_v16 = vld [vmem:[#allocation3 + $0x42] sm:$0xff] }
 0x5f2   : > { %13505 = vmatprep.mubr.msk.f32.mxu0 %vm14911_vm4, %v17914_v47 }
 0x5f4   : > { %v7094_v42 = vpop.f32.mrb[142].mxu0 }
 0x5f5   : > { %v13260_v14 = vpop.f32.mrb[143].mxu0  ;;  %13506 = vmatmul.mubr.msk.f32.vlgmr.msra.gmra.mrb[248].mxu0 %vm5791_vm6, %v17100_v31 }
 0x5f6   : > { %14393 = vmatpush3.bf16.msra.mxu0 %v14392_v8  ;;  %13508 = vmatprep.mubr.msk.f32.mxu0 %vm14911_vm4, %v17914_v47 }
 0x5f7   : > { %14394 = vmatprep.subr.bf16.mxu0 %v17913_v15 }
 0x5f8   : > { %v7099_v11 = vpop.f32.mrb[144].mxu0 }
 0x5f9   : > { %v7111_v24 = vadd.f32 %v7099_v11, %v6991_v52  ;;  %v13263_v18 = vpop.f32.mrb[145].mxu0  ;;  %13509 = vmatmul.mubr.msk.f32.gmra.mrb[250].mxu0 %vm5791_vm6, %v17112_v2  ;;  %v11070_v2 = vld [vmem:[%s17869_s3 + $0x2e0] sm:$0xff]  ;;  %v8437_v52 = vld [vmem:[#allocation3 + $0x52] sm:$0xff] }
 0x5fa   : > { %13511 = vmatprep.mubr.msk.f32.mxu0 %vm14911_vm4, %v17914_v47  ;;  %14396 = vmatpush3.bf16.msra.mxu0 %v14395_v7  ;;  %v14398_v46 = vpack.c.bf16 %v11071_v1, %v11070_v2  ;;  %v8557_v7 = vld [vmem:[#allocation3 + $0x53] sm:$0xff] }
 0x5fb   : > { %14397 = vmatprep.subr.bf16.mxu0 %v17913_v15 }
 0x5fc   : > { %v7104_v31 = vpop.f32.mrb[146].mxu0 }
 0x5fd   : > { %v7112_v23 = vadd.f32 %v7104_v31, %v6992_v34  ;;  %v13266_v44 = vpop.f32.mrb[147].mxu0  ;;  %13512 = vmatmul.mubr.msk.f32.gmra.mrb[252].mxu0 %vm5791_vm6, %v8315_v59 }
 0x5fe   : > { %13514 = vmatprep.mubr.msk.f32.mxu0 %vm14911_vm4, %v17914_v47 }
 0x600   : > { %v7204_v28 = vpop.f32.mrb[148].mxu0 }
 0x601   : > { %v7228_v43 = vadd.f32 %v7204_v28, %v7108_v39  ;;  %v13277_v4 = vpop.f32.mrb[149].mxu0  ;;  %13515 = vmatmul.mubr.msk.f32.gmra.mrb[254].mxu0 %vm5791_vm6, %v8316_v62 }
 0x602   : > { %13517 = vmatprep.mubr.msk.f32.mxu0 %vm14911_vm4, %v17914_v47  ;;  %v8676_v4 = vld [vmem:[#allocation3 + $0x4c] sm:$0xff] }
 0x604   : > { %v7209_v36 = vpop.f32.mrb[150].mxu0 }
 0x605   : > { %v7229_v22 = vadd.f32 %v7209_v36, %v7109_v27  ;;  %v13280_v40 = vpop.f32.mrb[151].mxu0  ;;  %13518 = vmatmul.mubr.msk.f32.gmra.mrb[0].mxu0 %vm5791_vm6, %v8317_v29  ;;  %v8555_v27 = vld [vmem:[#allocation3 + $0x43] sm:$0xff]  ;;  %v8677_v36 = vld [vmem:[#allocation3 + $0x54] sm:$0xff] }
 0x606   : > { %13528 = vmatprep.mubr.msk.f32.mxu0 %vm14911_vm4, %v17914_v47 }
 0x608   : > { %v7214_v61 = vpop.f32.mrb[152].mxu0 }
 0x609   : > { %v13283_v3 = vpop.f32.mrb[153].mxu0  ;;  %13529 = vmatmul.mubr.msk.f32.vlgmr.msra.gmra.mrb[2].mxu0 %vm5791_vm6, %v17137_v50 }
 0x60a   : > { %14399 = vmatpush3.bf16.msra.mxu0 %v14398_v46  ;;  %13531 = vmatprep.mubr.msk.f32.mxu0 %vm14911_vm4, %v17914_v47 }
 0x60b   : > { %14400 = vmatprep.subr.bf16.mxu0 %v17913_v15 }
 0x60c   : > { %v7219_v17 = vpop.f32.mrb[154].mxu0 }
 0x60d   : > { %v7231_v10 = vadd.f32 %v7219_v17, %v7111_v24  ;;  %v13286_v13 = vpop.f32.mrb[155].mxu0  ;;  %13532 = vmatmul.mubr.msk.f32.gmra.mrb[4].mxu0 %vm5791_vm6, %v17149_v5  ;;  %v11079_v5 = vld [vmem:[%s17869_s3 + $0x300] sm:$0xff] }
 0x60e   : > { %13534 = vmatprep.mubr.msk.f32.mxu0 %vm14911_vm4, %v17914_v47  ;;  %14402 = vmatpush3.bf16.msra.mxu0 %v14401_v54  ;;  %v14404_v34 = vpack.c.bf16 %v11080_v49, %v11079_v5 }
 0x60f   : > { %14403 = vmatprep.subr.bf16.mxu0 %v17913_v15 }
 0x610   : > { %v7224_v50 = vpop.f32.mrb[156].mxu0 }
 0x611   : > { %v7232_v12 = vadd.f32 %v7224_v50, %v7112_v23  ;;  %v13289_v56 = vpop.f32.mrb[157].mxu0  ;;  %13535 = vmatmul.mubr.msk.f32.gmra.mrb[6].mxu0 %vm5791_vm6, %v8435_v16 }
 0x612   : > { %13537 = vmatprep.mubr.msk.f32.mxu0 %vm14911_vm4, %v17914_v47 }
 0x614   : > { %v7324_v33 = vpop.f32.mrb[158].mxu0 }
 0x615   : > { %v7348_v57 = vadd.f32 %v7324_v33, %v7228_v43  ;;  %v13300_v38 = vpop.f32.mrb[159].mxu0  ;;  %13538 = vmatmul.mubr.msk.f32.gmra.mrb[8].mxu0 %vm5791_vm6, %v8436_v45 }
 0x616   : > { %13540 = vmatprep.mubr.msk.f32.mxu0 %vm14911_vm4, %v17914_v47 }
 0x618   : > { %v7329_v26 = vpop.f32.mrb[160].mxu0 }
 0x619   : > { %v7349_v60 = vadd.f32 %v7329_v26, %v7229_v22  ;;  %v13303_v63 = vpop.f32.mrb[161].mxu0  ;;  %13541 = vmatmul.mubr.msk.f32.gmra.mrb[10].mxu0 %vm5791_vm6, %v8437_v52 }
 0x61a   : > { %13551 = vmatprep.mubr.msk.f32.mxu0 %vm14911_vm4, %v17914_v47 }
 0x61c   : > { %v7334_v39 = vpop.f32.mrb[162].mxu0 }
 0x61d   : > { %v13306_v6 = vpop.f32.mrb[163].mxu0  ;;  %13552 = vmatmul.mubr.msk.f32.vlgmr.msra.gmra.mrb[12].mxu0 %vm5791_vm6, %v17174_v21 }
 0x61e   : > { %14405 = vmatpush3.bf16.msra.mxu0 %v14404_v34  ;;  %13554 = vmatprep.mubr.msk.f32.mxu0 %vm14911_vm4, %v17914_v47 }
 0x61f   : > { %14406 = vmatprep.subr.bf16.mxu0 %v17913_v15 }
 0x620   : > { %v7339_v30 = vpop.f32.mrb[164].mxu0 }
 0x621   : > { %v7351_v0 = vadd.f32 %v7339_v30, %v7231_v10  ;;  %v13309_v58 = vpop.f32.mrb[165].mxu0  ;;  %13555 = vmatmul.mubr.msk.f32.gmra.mrb[14].mxu0 %vm5791_vm6, %v17186_v19 }
 0x622   : > { %13557 = vmatprep.mubr.msk.f32.mxu0 %vm14911_vm4, %v17914_v47  ;;  %14408 = vmatpush3.bf16.msra.mxu0 %v14407_v53 }
 0x623   : > { %14409 = vmatprep.subr.bf16.mxu0 %v17913_v15 }
 0x624   : > { %v7344_v21 = vpop.f32.mrb[166].mxu0 }
 0x625   : > { %v7352_v48 = vadd.f32 %v7344_v21, %v7232_v12  ;;  %v13312_v8 = vpop.f32.mrb[167].mxu0  ;;  %13558 = vmatmul.mubr.msk.f32.gmra.mrb[16].mxu0 %vm5791_vm6, %v8555_v27 }
 0x626   : > { %13560 = vmatprep.mubr.msk.f32.mxu0 %vm14911_vm4, %v17914_v47 }
 0x628   : > { %v7444_v9 = vpop.f32.mrb[168].mxu0 }
 0x629   : > { %v7468_v42 = vadd.f32 %v7444_v9, %v7348_v57  ;;  %v13323_v14 = vpop.f32.mrb[169].mxu0  ;;  %13561 = vmatmul.mubr.msk.f32.gmra.mrb[18].mxu0 %vm5791_vm6, %v8556_v25 }
 0x62a   : > { %13563 = vmatprep.mubr.msk.f32.mxu0 %vm14911_vm4, %v17914_v47 }
 0x62c   : > { %v7449_v19 = vpop.f32.mrb[170].mxu0 }
 0x62d   : > { %v7469_v11 = vadd.f32 %v7449_v19, %v7349_v60  ;;  %v13326_v24 = vpop.f32.mrb[171].mxu0  ;;  %13564 = vmatmul.mubr.msk.f32.gmra.mrb[20].mxu0 %vm5791_vm6, %v8557_v7  ;;  %v11089_v19 = vld [vmem:[%s17870_s4 + $0x10] sm:$0xff]  ;;  %v11090_v7 = vld [vmem:[%s17870_s4 + $0x18] sm:$0xff] }
 0x62e   : > { %13574 = vmatprep.mubr.msk.f32.mxu0 %vm14911_vm4, %v17914_v47 }
 0x630   : > { %v7454_v18 = vpop.f32.mrb[172].mxu0 }
 0x631   : > { %v13329_v31 = vpop.f32.mrb[173].mxu0  ;;  %13575 = vmatmul.mubr.msk.f32.vlgmr.msra.gmra.mrb[22].mxu0 %vm5791_vm6, %v17212_v20 }
 0x632   : > { %13577 = vmatprep.mubr.msk.f32.mxu0 %vm14911_vm4, %v17914_v47 }
 0x634   : > { %v7459_v59 = vpop.f32.mrb[174].mxu0 }
 0x635   : > { %v7471_v23 = vadd.f32 %v7459_v59, %v7351_v0  ;;  %v13332_v44 = vpop.f32.mrb[175].mxu0  ;;  %13578 = vmatmul.mubr.msk.f32.gmra.mrb[24].mxu0 %vm5791_vm6, %v17224_v32 }
 0x636   : > { %13580 = vmatprep.mubr.msk.f32.mxu0 %vm14911_vm4, %v17914_v47 }
 0x638   : > { %v7464_v28 = vpop.f32.mrb[176].mxu0 }
 0x639   : > { %v7472_v62 = vadd.f32 %v7464_v28, %v7352_v48  ;;  %v13335_v43 = vpop.f32.mrb[177].mxu0  ;;  %13581 = vmatmul.mubr.msk.f32.gmra.mrb[26].mxu0 %vm5791_vm6, %v17260_v55 }
 0x63a   : > { %13583 = vmatprep.mubr.msk.f32.mxu0 %vm14911_vm4, %v17914_v47 }
 0x63c   : > { %v7564_v20 = vpop.f32.mrb[178].mxu0 }
 0x63d   : > { %v7588_v2 = vadd.f32 %v7564_v20, %v7468_v42  ;;  %v13346_v1 = vpop.f32.mrb[179].mxu0  ;;  %13584 = vmatmul.mubr.msk.f32.gmra.mrb[28].mxu0 %vm5791_vm6, %v8676_v4 }
 0x63e   : > { %13586 = vmatprep.mubr.msk.f32.mxu0 %vm14911_vm4, %v17914_v47 }
 0x640   : > { %v7569_v32 = vpop.f32.mrb[180].mxu0 }
 0x641   : > { %v7589_v29 = vadd.f32 %v7569_v32, %v7469_v11  ;;  %v13349_v22 = vpop.f32.mrb[181].mxu0  ;;  %13587 = vmatmul.mubr.msk.f32.gmra.mrb[30].mxu0 %vm5791_vm6, %v8677_v36  ;;  %v14410_v11 = vpack.c.bf16 %v11090_v7, %v11089_v19 }
 0x642   : > { %13593 = vmatprep.mubr.msk.f32.mxu0 %vm14911_vm4, %v17914_v47 }
 0x643   : > { %14411 = vmatpush3.bf16.msra.mxu0 %v14410_v11 }
 0x644   : > { %v7574_v55 = vpop.f32.mrb[182].mxu0  ;;  %14412 = vmatprep.subr.bf16.mxu0 %v17913_v15 }
 0x645   : > { %v13352_v40 = vpop.f32.mrb[183].mxu0 }
 0x648   : > { %v7579_v46 = vpop.f32.mrb[184].mxu0 }
 0x649   : > { %v7591_v41 = vadd.f32 %v7579_v46, %v7471_v23  ;;  %v13355_v51 = vpop.f32.mrb[185].mxu0 }
 0x64c   : > { %v7584_v61 = vpop.f32.mrb[186].mxu0 }
 0x64d   : > { %v7592_v3 = vadd.f32 %v7584_v61, %v7472_v62  ;;  %v13358_v54 = vpop.f32.mrb[187].mxu0 }
 0x650   : > { %v7684_v17 = vpop.f32.mrb[188].mxu0 }
 0x651   : > { %v7708_v10 = vadd.f32 %v7684_v17, %v7588_v2  ;;  %v13369_v13 = vpop.f32.mrb[189].mxu0 }
 0x654   : > { %v7689_v50 = vpop.f32.mrb[190].mxu0 }
 0x655   : > { %v7709_v16 = vadd.f32 %v7689_v50, %v7589_v29  ;;  %v13372_v12 = vpop.f32.mrb[191].mxu0 }
 0x658   : > { %v7694_v56 = vpop.f32.mrb[192].mxu0 }
 0x659   : > { %v13375_v33 = vpop.f32.mrb[193].mxu0 }
 0x65c   : > { %v7699_v45 = vpop.f32.mrb[194].mxu0 }
 0x65d   : > { %v7711_v57 = vadd.f32 %v7699_v45, %v7591_v41  ;;  %v13378_v38 = vpop.f32.mrb[195].mxu0 }
 0x660   : > { %v7704_v5 = vpop.f32.mrb[196].mxu0 }
 0x661   : > { %v7712_v49 = vadd.f32 %v7704_v5, %v7592_v3  ;;  %v13381_v26 = vpop.f32.mrb[197].mxu0 }
 0x664   : > { %v7804_v52 = vpop.f32.mrb[198].mxu0 }
 0x665   : > { %v7828_v60 = vadd.f32 %v7804_v52, %v7708_v10  ;;  %v13392_v63 = vpop.f32.mrb[199].mxu0 }
 0x668   : > { %v7809_v34 = vpop.f32.mrb[200].mxu0 }
 0x669   : > { %v7829_v37 = vadd.f32 %v7809_v34, %v7709_v16  ;;  %v13395_v35 = vpop.f32.mrb[201].mxu0 }
 0x66c   : > { %v7814_v39 = vpop.f32.mrb[202].mxu0 }
 0x66d   : > { %v13398_v6 = vpop.f32.mrb[203].mxu0 }
 0x670   : > { %v7819_v53 = vpop.f32.mrb[204].mxu0 }
 0x671   : > { %v7831_v30 = vadd.f32 %v7819_v53, %v7711_v57  ;;  %v13401_v0 = vpop.f32.mrb[205].mxu0 }
 0x674   : > { %v7824_v58 = vpop.f32.mrb[206].mxu0 }
 0x675   : > { %v7832_v21 = vadd.f32 %v7824_v58, %v7712_v49  ;;  %v13404_v27 = vpop.f32.mrb[207].mxu0 }
 0x678   : > { %v7924_v48 = vpop.f32.mrb[208].mxu0 }
 0x679   : > { %v7948_v8 = vadd.f32 %v7924_v48, %v7828_v60  ;;  %v13415_v9 = vpop.f32.mrb[209].mxu0 }
 0x67c   : > { %v7929_v25 = vpop.f32.mrb[210].mxu0 }
 0x67d   : > { %v7949_v42 = vadd.f32 %v7929_v25, %v7829_v37  ;;  %v13418_v14 = vpop.f32.mrb[211].mxu0 }
 0x680   : > { %v7934_v24 = vpop.f32.mrb[212].mxu0 }
 0x681   : > { %v13421_v18 = vpop.f32.mrb[213].mxu0 }
 0x684   : > { %v7939_v31 = vpop.f32.mrb[214].mxu0 }
 0x685   : > { %v7951_v59 = vadd.f32 %v7939_v31, %v7831_v30  ;;  %v13424_v23 = vpop.f32.mrb[215].mxu0 }
 0x688   : > { %v7944_v44 = vpop.f32.mrb[216].mxu0 }
 0x689   : > { %v7952_v28 = vadd.f32 %v7944_v44, %v7832_v21  ;;  %v13427_v62 = vpop.f32.mrb[217].mxu0 }
 0x68c   : > { %v8044_v43 = vpop.f32.mrb[218].mxu0 }
 0x68d   : > { %v8068_v20 = vadd.f32 %v8044_v43, %v7948_v8  ;;  %v13438_v4 = vpop.f32.mrb[219].mxu0 }
 0x690   : > { %v8049_v2 = vpop.f32.mrb[220].mxu0 }
 0x691   : > { %v8069_v1 = vadd.f32 %v8049_v2, %v7949_v42  ;;  %v13441_v32 = vpop.f32.mrb[221].mxu0 }
 0x694   : > { %v8054_v36 = vpop.f32.mrb[222].mxu0 }
 0x695   : > { %v13444_v29 = vpop.f32.mrb[223].mxu0 }
 0x698   : > { %v8059_v22 = vpop.f32.mrb[224].mxu0 }
 0x699   : > { %v8071_v55 = vadd.f32 %v8059_v22, %v7951_v59  ;;  %v13447_v40 = vpop.f32.mrb[225].mxu0 }
 0x69c   : > { %v8064_v46 = vpop.f32.mrb[226].mxu0 }
 0x69d   : > { %v8072_v41 = vadd.f32 %v8064_v46, %v7952_v28  ;;  %v13450_v51 = vpop.f32.mrb[227].mxu0 }
 0x6a0   : > { %v8164_v61 = vpop.f32.mrb[228].mxu0 }
 0x6a1   : > { %v8188_v3 = vadd.f32 %v8164_v61, %v8068_v20  ;;  %v13461_v54 = vpop.f32.mrb[229].mxu0 }
 0x6a4   : > { %v8169_v17 = vpop.f32.mrb[230].mxu0 }
 0x6a5   : > { %v8189_v10 = vadd.f32 %v8169_v17, %v8069_v1  ;;  %v13464_v13 = vpop.f32.mrb[231].mxu0 }
 0x6a8   : > { %v8174_v50 = vpop.f32.mrb[232].mxu0 }
 0x6a9   : > { %v13467_v16 = vpop.f32.mrb[233].mxu0 }
 0x6ac   : > { %v8179_v12 = vpop.f32.mrb[234].mxu0 }
 0x6ad   : > { %v8191_v56 = vadd.f32 %v8179_v12, %v8071_v55  ;;  %v13470_v33 = vpop.f32.mrb[235].mxu0 }
 0x6b0   : > { %v8184_v45 = vpop.f32.mrb[236].mxu0 }
 0x6b1   : > { %v8192_v57 = vadd.f32 %v8184_v45, %v8072_v41  ;;  %v13473_v38 = vpop.f32.mrb[237].mxu0 }
 0x6b4   : > { %v8284_v5 = vpop.f32.mrb[238].mxu0 }
 0x6b5   : > { %v8308_v49 = vadd.f32 %v8284_v5, %v8188_v3  ;;  %v13484_v26 = vpop.f32.mrb[239].mxu0 }
 0x6b8   : > { %v8289_v52 = vpop.f32.mrb[240].mxu0 }
 0x6b9   : > { %v8309_v60 = vadd.f32 %v8289_v52, %v8189_v10  ;;  %v13487_v63 = vpop.f32.mrb[241].mxu0  ;;  %v8810_v52 = vld [vmem:[%s17870_s4] sm:$0xff] }
 0x6bc   : > { %v8294_v34 = vpop.f32.mrb[242].mxu0 }
 0x6bd   : > { %v13490_v37 = vpop.f32.mrb[243].mxu0 }
 0x6c0   : > { %v8299_v35 = vpop.f32.mrb[244].mxu0 }
 0x6c1   : > { %v8311_v39 = vadd.f32 %v8299_v35, %v8191_v56  ;;  %v13493_v6 = vpop.f32.mrb[245].mxu0  ;;  %v11088_v56 = vld [vmem:[%s17872_s6 + $0x2] ss:$0 sm:$0xff] }
 0x6c2   : > { %v11093_v35 = vld [vmem:[%s17870_s4 + $0x20] sm:$0xff] }
 0x6c4   : > { %v8304_v53 = vpop.f32.mrb[246].mxu0 }
 0x6c5   : > { %v8312_v30 = vadd.f32 %v8304_v53, %v8192_v57  ;;  %v13496_v0 = vpop.f32.mrb[247].mxu0 }
 0x6c8   : > { %v8404_v58 = vpop.f32.mrb[248].mxu0 }
 0x6c9   : > { %v8428_v21 = vadd.f32 %v8404_v58, %v8308_v49  ;;  %v13507_v27 = vpop.f32.mrb[249].mxu0 }
 0x6ca   : > { %v11096_v27 = vld [vmem:[%s17870_s4 + $0x30] sm:$0xff] }
 0x6cc   : > { %v8409_v48 = vpop.f32.mrb[250].mxu0 }
 0x6cd   : > { %v8429_v8 = vadd.f32 %v8409_v48, %v8309_v60  ;;  %v13510_v9 = vpop.f32.mrb[251].mxu0  ;;  %v8811_v60 = vld [vmem:[%s17870_s4 + $0x8] sm:$0xff]  ;;  %v11097_v48 = vld [vmem:[%s17870_s4 + $0x38] sm:$0xff] }
 0x6ce   : > { %v14413_v37 = vpack.c.bf16 %v8811_v60, %v8810_v52  ;;  %v11130_v52 = vld [vmem:[%s17870_s4 + $0xe8] sm:$0xff] }
 0x6d0   : > { %v8414_v25 = vpop.f32.mrb[252].mxu0 }
 0x6d1   : > { %v13513_v42 = vpop.f32.mrb[253].mxu0 }
 0x6d4   : > { %v8419_v14 = vpop.f32.mrb[254].mxu0 }
 0x6d5   : > { %v8431_v19 = vadd.f32 %v8419_v14, %v8311_v39  ;;  %v13516_v7 = vpop.f32.mrb[255].mxu0  ;;  %v11094_v39 = vld [vmem:[%s17870_s4 + $0x28] sm:$0xff]  ;;  %v14419_v14 = vpack.c.bf16 %v11097_v48, %v11096_v27  ;;  %v10063_v48 = vld [vmem:[%s17871_s5 + $0x40] sm:$0xff] }
 0x6d6   : > { %v14416_v58 = vpack.c.bf16 %v11094_v39, %v11093_v35  ;;  %v11099_v7 = vld [vmem:[%s17870_s4 + $0x40] sm:$0xff] }
 0x6d8   : > { %v8424_v11 = vpop.f32.mrb[0].mxu0 }
 0x6d9   : > { %v8432_v24 = vadd.f32 %v8424_v11, %v8312_v30  ;;  %v13519_v18 = vpop.f32.mrb[1].mxu0  ;;  %v11100_v11 = vld [vmem:[%s17870_s4 + $0x48] sm:$0xff] }
 0x6da   : > { %v14422_v18 = vpack.c.bf16 %v11100_v11, %v11099_v7  ;;  %v10068_v7 = vld [vmem:[%s17871_s5 + $0x90] sm:$0xff] }
 0x6dc   : > { %v8524_v31 = vpop.f32.mrb[2].mxu0 }
 0x6dd   : > { %v8548_v59 = vadd.f32 %v8524_v31, %v8428_v21  ;;  %v13530_v23 = vpop.f32.mrb[3].mxu0  ;;  %v11102_v31 = vld [vmem:[%s17870_s4 + $0x50] sm:$0xff] }
 0x6e0   : > { %v8529_v44 = vpop.f32.mrb[4].mxu0 }
 0x6e1   : > { %v8549_v28 = vadd.f32 %v8529_v44, %v8429_v8  ;;  %v13533_v62 = vpop.f32.mrb[5].mxu0 }
 0x6e2   : > { %v11106_v62 = vld [vmem:[%s17870_s4 + $0x68] sm:$0xff] }
 0x6e4   : > { %v8534_v43 = vpop.f32.mrb[6].mxu0 }
 0x6e5   : > { %v13536_v20 = vpop.f32.mrb[7].mxu0 }
 0x6e8   : > { %v8539_v4 = vpop.f32.mrb[8].mxu0 }
 0x6e9   : > { %v8551_v2 = vadd.f32 %v8539_v4, %v8431_v19  ;;  %v13539_v1 = vpop.f32.mrb[9].mxu0  ;;  %v11108_v4 = vld [vmem:[%s17870_s4 + $0x70] sm:$0xff] }
 0x6ec   : > { %v8544_v32 = vpop.f32.mrb[10].mxu0 }
 0x6ed   : > { %v8552_v36 = vadd.f32 %v8544_v32, %v8432_v24  ;;  %v13542_v29 = vpop.f32.mrb[11].mxu0 }
 0x6ee   : > { %v11112_v29 = vld [vmem:[%s17870_s4 + $0x88] sm:$0xff] }
 0x6f0   : > { %v8644_v22 = vpop.f32.mrb[12].mxu0 }
 0x6f1   : > { %v8668_v55 = vadd.f32 %v8644_v22, %v8548_v59  ;;  %v13553_v40 = vpop.f32.mrb[13].mxu0  ;;  %v11103_v59 = vld [vmem:[%s17870_s4 + $0x58] sm:$0xff] }
 0x6f2   : > { %v14425_v44 = vpack.c.bf16 %v11103_v59, %v11102_v31  ;;  %v11114_v40 = vld [vmem:[%s17870_s4 + $0x90] sm:$0xff]  ;;  %v10071_v59 = vld [vmem:[%s17871_s5 + $0xc0] sm:$0xff] }
 0x6f4   : > { %v8649_v46 = vpop.f32.mrb[14].mxu0 }
 0x6f5   : > { %v8669_v41 = vadd.f32 %v8649_v46, %v8549_v28  ;;  %v13556_v51 = vpop.f32.mrb[15].mxu0  ;;  %v11105_v28 = vld [vmem:[%s17870_s4 + $0x60] sm:$0xff]  ;;  %v11115_v46 = vld [vmem:[%s17870_s4 + $0x98] sm:$0xff] }
 0x6f6   : > { %v14428_v20 = vpack.c.bf16 %v11106_v62, %v11105_v28  ;;  %v14437_v51 = vpack.c.bf16 %v11115_v46, %v11114_v40  ;;  %v10074_v62 = vld [vmem:[%s17871_s5 + $0xf0] sm:$0xff]  ;;  %v10081_v40 = vld [vmem:[%s17871_s5 + $0x68] sm:$0xff]  ;;  %v10082_v46 = vld [vmem:[%s17871_s5 + $0x78] sm:$0xff] }
 0x6f8   : > { %v8654_v61 = vpop.f32.mrb[16].mxu0 }
 0x6f9   : > { %v13559_v3 = vpop.f32.mrb[17].mxu0  ;;  %v11117_v61 = vld [vmem:[%s17870_s4 + $0xa0] sm:$0xff] }
 0x6fa   : > { %v11118_v3 = vld [vmem:[%s17870_s4 + $0xa8] sm:$0xff] }
 0x6fc   : > { %v8659_v54 = vpop.f32.mrb[18].mxu0 }
 0x6fd   : > { %v8671_v17 = vadd.f32 %v8659_v54, %v8551_v2  ;;  %v13562_v10 = vpop.f32.mrb[19].mxu0  ;;  %v11109_v2 = vld [vmem:[%s17870_s4 + $0x78] sm:$0xff] }
 0x6fe   : > { %v14431_v32 = vpack.c.bf16 %v11109_v2, %v11108_v4  ;;  %v11120_v10 = vld [vmem:[%s17870_s4 + $0xb0] sm:$0xff]  ;;  %v10076_v4 = vld [vmem:[%s17871_s5 + $0x18] sm:$0xff]  ;;  %v10077_v2 = vld [vmem:[%s17871_s5 + $0x28] sm:$0xff] }
 0x700   : > { %v8664_v13 = vpop.f32.mrb[20].mxu0 }
 0x701   : > { %v8672_v50 = vadd.f32 %v8664_v13, %v8552_v36  ;;  %v13565_v16 = vpop.f32.mrb[21].mxu0  ;;  %v11111_v36 = vld [vmem:[%s17870_s4 + $0x80] sm:$0xff]  ;;  %v11121_v13 = vld [vmem:[%s17870_s4 + $0xb8] sm:$0xff] }
 0x702   : > { %v14443_v16 = vpack.c.bf16 %v11121_v13, %v11120_v10  ;;  %v10087_v13 = vld [vmem:[%s17871_s5 + $0xc8] sm:$0xff] }
 0x704   : > { %v8764_v12 = vpop.f32.mrb[22].mxu0 }
 0x705   : > { %v8788_v33 = vadd.f32 %v8764_v12, %v8668_v55  ;;  %v13576_v45 = vpop.f32.mrb[23].mxu0  ;;  %v14434_v55 = vpack.c.bf16 %v11112_v29, %v11111_v36  ;;  %v11123_v12 = vld [vmem:[%s17870_s4 + $0xc0] sm:$0xff]  ;;  %v10079_v29 = vld [vmem:[%s17871_s5 + $0x48] sm:$0xff] }
 0x707   : > { %v8798_v57 = vadd.f32 %v11088_v56, %v8788_v33 }
 0x708   : > { %v8769_v38 = vpop.f32.mrb[24].mxu0 }
 0x709   : > { %8804 = vst.msk [vmem:[#allocation4] sm:$0xff] %vm8803_vm7, %v8798_v57  ;;  %v8789_v5 = vadd.f32 %v8769_v38, %v8669_v41  ;;  %v13579_v49 = vpop.f32.mrb[25].mxu0  ;;  %v11126_v57 = vld [vmem:[%s17870_s4 + $0xd0] sm:$0xff]  ;;  %v11127_v38 = vld [vmem:[%s17870_s4 + $0xd8] sm:$0xff] }
 0x70a   : > { %v14449_v49 = vpack.c.bf16 %v11127_v38, %v11126_v57 }
 0x70b   : > { %v8799_v26 = vadd.f32 %v11088_v56, %v8789_v5 }
 0x70c   : > { %v8774_v63 = vpop.f32.mrb[26].mxu0 }
 0x70d   : > { %8805 = vst.msk [vmem:[#allocation4 + $0x8] sm:$0xff] %vm8803_vm7, %v8799_v26  ;;  %v13582_v34 = vpop.f32.mrb[27].mxu0  ;;  %v11129_v26 = vld [vmem:[%s17870_s4 + $0xe0] sm:$0xff] }
 0x70e   : > { %v14452_v63 = vpack.c.bf16 %v11130_v52, %v11129_v26  ;;  %v11132_v34 = vld [vmem:[%s17870_s4 + $0xf0] sm:$0xff] }
 0x710   : > { %v8779_v6 = vpop.f32.mrb[28].mxu0  ;;  %v8812_v53 = vld [vmem:[#allocation4 + $0x1] sm:$0x1]  ;;  %v8809_v9 = vld [vmem:[#allocation4] sm:$0x1] }
 0x711   : > { %v8791_v30 = vadd.f32 %v8779_v6, %v8671_v17  ;;  %v13585_v0 = vpop.f32.mrb[29].mxu0  ;;  %13594 = vmatmul.mubr.msk.f32.vlgmr.msra.gmra.mrb[32].mxu0 %vm8803_vm7, %v8812_v53  ;;  %v8962_v24 = vld [vmem:[#allocation4 + $0x2] sm:$0x1]  ;;  %v9040_v23 = vld [vmem:[#allocation4 + $0x3] sm:$0x1]  ;;  %v14440_v17 = vpack.c.bf16 %v11118_v3, %v11117_v61 }
 0x712   : > { %14414 = vmatpush3.bf16.msra.mxu0 %v14413_v37  ;;  %13600 = vmatprep.mubr.msk.f32.mxu0 %vm14911_vm4, %v17914_v47  ;;  %v11133_v37 = vld [vmem:[%s17870_s4 + $0xf8] sm:$0xff]  ;;  %v10060_v0 = vld [vmem:[%s17871_s5 + $0x10] sm:$0xff] }
 0x713   : > { %v8801_v21 = vadd.f32 %v11088_v56, %v8791_v30  ;;  %14415 = vmatprep.subr.bf16.mxu0 %v17913_v15  ;;  %v14455_v39 = vpack.c.bf16 %v11133_v37, %v11132_v34  ;;  %v10059_v30 = vld [vmem:[%s17871_s5] sm:$0xff]  ;;  %v10084_v61 = vld [vmem:[%s17871_s5 + $0x98] sm:$0xff] }
 0x714   : > { %v8784_v8 = vpop.f32.mrb[30].mxu0  ;;  %v9118_v43 = vld [vmem:[#allocation4 + $0xc] sm:$0x1]  ;;  %v9196_v1 = vld [vmem:[#allocation4 + $0xd] sm:$0x1] }
 0x715   : > { %8807 = vst.msk [vmem:[#allocation4 + $0x18] sm:$0xff] %vm8803_vm7, %v8801_v21  ;;  %v8792_v25 = vadd.f32 %v8784_v8, %v8672_v50  ;;  %v13588_v42 = vpop.f32.mrb[31].mxu0  ;;  %13601 = vmatmul.mubr.msk.f32.vlgmr.msra.gmra.mrb[34].mxu0 %vm8803_vm7, %v8809_v9  ;;  %v9274_v22 = vld [vmem:[#allocation4 + $0xe] sm:$0x1]  ;;  %v9352_v41 = vld [vmem:[#allocation4 + $0xf] sm:$0x1] }
 0x716   : > { %14417 = vmatpush3.bf16.msra.mxu0 %v14416_v58  ;;  %13607 = vmatprep.mubr.msk.f32.mxu0 %vm14911_vm4, %v17914_v47  ;;  %v14458_v58 = vpack.c.bf16 %v10060_v0, %v10059_v30  ;;  %v10061_v21 = vld [vmem:[%s17871_s5 + $0x20] sm:$0xff]  ;;  %v10064_v8 = vld [vmem:[%s17871_s5 + $0x50] sm:$0xff] }
 0x717   : > { %v8802_v19 = vadd.f32 %v11088_v56, %v8792_v25  ;;  %14418 = vmatprep.subr.bf16.mxu0 %v17913_v15  ;;  %v11124_v56 = vld [vmem:[%s17870_s4 + $0xc8] sm:$0xff]  ;;  %v14464_v9 = vpack.c.bf16 %v10064_v8, %v10063_v48  ;;  %v10065_v25 = vld [vmem:[%s17871_s5 + $0x60] sm:$0xff]  ;;  %v10066_v42 = vld [vmem:[%s17871_s5 + $0x70] sm:$0xff] }
 0x718   : > { %v14446_v45 = vpack.c.bf16 %v11124_v56, %v11123_v12  ;;  %14459 = vmatpush3.bf16.msra.mxu1 %v14458_v58 }
 0x719   : > { %8808 = vst.msk [vmem:[#allocation4 + $0x20] sm:$0xff] %vm8803_vm7, %v8802_v19  ;;  %13608 = vmatmul.mubr.msk.f32.vlgmr.msra.gmra.mrb[36].mxu0 %vm8803_vm7, %v8962_v24  ;;  %14460 = vmatprep.subr.bf16.mxu1 %v17913_v15  ;;  %v10067_v19 = vld [vmem:[%s17871_s5 + $0x80] sm:$0xff] }
 0x71a   : > { %14420 = vmatpush3.bf16.msra.mxu0 %v14419_v14  ;;  %13614 = vmatprep.mubr.msk.f32.mxu0 %vm14911_vm4, %v17914_v47  ;;  %v14467_v14 = vpack.c.bf16 %v10066_v42, %v10065_v25  ;;  %v14470_v11 = vpack.c.bf16 %v10068_v7, %v10067_v19  ;;  %v10069_v24 = vld [vmem:[%s17871_s5 + $0xa0] sm:$0xff] }
 0x71b   : > { %14421 = vmatprep.subr.bf16.mxu0 %v17913_v15 }
 0x71c   : > { %v9430_v54 = vld [vmem:[#allocation4 + $0x18] sm:$0x1]  ;;  %v9508_v50 = vld [vmem:[#allocation4 + $0x19] sm:$0x1]  ;;  %v9586_v33 = vld [vmem:[#allocation4 + $0x1a] sm:$0x1] }
 0x71d   : > { %13615 = vmatmul.mubr.msk.f32.vlgmr.msra.gmra.mrb[38].mxu0 %vm8803_vm7, %v9040_v23  ;;  %v9664_v5 = vld [vmem:[#allocation4 + $0x1b] sm:$0x1] }
 0x71e   : > { %14423 = vmatpush3.bf16.msra.mxu0 %v14422_v18  ;;  %13621 = vmatprep.mubr.msk.f32.mxu0 %vm14911_vm4, %v17914_v47  ;;  %v10070_v18 = vld [vmem:[%s17871_s5 + $0xb0] sm:$0xff] }
 0x71f   : > { %14424 = vmatprep.subr.bf16.mxu0 %v17913_v15  ;;  %v14473_v31 = vpack.c.bf16 %v10070_v18, %v10069_v24  ;;  %v10072_v23 = vld [vmem:[%s17871_s5 + $0xd0] sm:$0xff] }
 0x720   : > { %v9742_v60 = vld [vmem:[#allocation4 + $0x24] sm:$0x1]  ;;  %v9820_v35 = vld [vmem:[#allocation4 + $0x25] sm:$0x1]  ;;  %v9898_v6 = vld [vmem:[#allocation4 + $0x26] sm:$0x1]  ;;  %v14476_v28 = vpack.c.bf16 %v10072_v23, %v10071_v59 }
 0x721   : > { %13622 = vmatmul.mubr.msk.f32.vlgmr.msra.gmra.mrb[40].mxu0 %vm8803_vm7, %v9118_v43  ;;  %v9976_v53 = vld [vmem:[#allocation4 + $0x27] sm:$0x1] }
 0x722   : > { %14426 = vmatpush3.bf16.msra.mxu0 %v14425_v44  ;;  %13628 = vmatprep.mubr.msk.f32.mxu0 %vm14911_vm4, %v17914_v47  ;;  %v10073_v44 = vld [vmem:[%s17871_s5 + $0xe0] sm:$0xff] }
 0x723   : > { %14427 = vmatprep.subr.bf16.mxu0 %v17913_v15  ;;  %v14479_v43 = vpack.c.bf16 %v10074_v62, %v10073_v44 }
 0x725   : > { %13629 = vmatmul.mubr.msk.f32.vlgmr.msra.gmra.mrb[42].mxu0 %vm8803_vm7, %v9196_v1 }
 0x726   : > { %14429 = vmatpush3.bf16.msra.mxu0 %v14428_v20  ;;  %13635 = vmatprep.mubr.msk.f32.mxu0 %vm14911_vm4, %v17914_v47  ;;  %v10075_v20 = vld [vmem:[%s17871_s5 + $0x8] sm:$0xff] }
 0x727   : > { %14430 = vmatprep.subr.bf16.mxu0 %v17913_v15  ;;  %v14482_v1 = vpack.c.bf16 %v10076_v4, %v10075_v20 }
 0x729   : > { %13636 = vmatmul.mubr.msk.f32.vlgmr.msra.gmra.mrb[44].mxu0 %vm8803_vm7, %v9274_v22  ;;  %v10080_v22 = vld [vmem:[%s17871_s5 + $0x58] sm:$0xff] }
 0x72a   : > { %14432 = vmatpush3.bf16.msra.mxu0 %v14431_v32  ;;  %13642 = vmatprep.mubr.msk.f32.mxu0 %vm14911_vm4, %v17914_v47  ;;  %v10078_v32 = vld [vmem:[%s17871_s5 + $0x38] sm:$0xff] }
 0x72b   : > { %14433 = vmatprep.subr.bf16.mxu0 %v17913_v15  ;;  %v14485_v36 = vpack.c.bf16 %v10078_v32, %v10077_v2  ;;  %v10054_v2 = vld [vmem:[%s17872_s6 + $0x3] sm:$0x1] }
 0x72d   : > { %13643 = vmatmul.mubr.msk.f32.vlgmr.msra.gmra.mrb[46].mxu0 %vm8803_vm7, %v9352_v41  ;;  %v14491_v41 = vpack.c.bf16 %v10082_v46, %v10081_v40  ;;  %v10090_v40 = vld [vmem:[%s17871_s5 + $0xf8] sm:$0xff] }
 0x72e   : > { %14435 = vmatpush3.bf16.msra.mxu0 %v14434_v55  ;;  %13649 = vmatprep.mubr.msk.f32.mxu0 %vm14911_vm4, %v17914_v47  ;;  %v14488_v55 = vpack.c.bf16 %v10080_v22, %v10079_v29 }
 0x72f   : > { %14436 = vmatprep.subr.bf16.mxu0 %v17913_v15 }
 0x731   : > { %13650 = vmatmul.mubr.msk.f32.vlgmr.msra.gmra.mrb[48].mxu0 %vm8803_vm7, %v9430_v54  ;;  %v10085_v54 = vld [vmem:[%s17871_s5 + $0xa8] sm:$0xff] }
 0x732   : > { %14438 = vmatpush3.bf16.msra.mxu0 %v14437_v51  ;;  %13656 = vmatprep.mubr.msk.f32.mxu0 %vm14911_vm4, %v17914_v47  ;;  %v10083_v51 = vld [vmem:[%s17871_s5 + $0x88] sm:$0xff] }
 0x733   : > { %14439 = vmatprep.subr.bf16.mxu0 %v17913_v15  ;;  %v14494_v3 = vpack.c.bf16 %v10084_v61, %v10083_v51 }
 0x735   : > { %13657 = vmatmul.mubr.msk.f32.vlgmr.msra.gmra.mrb[50].mxu0 %vm8803_vm7, %v9508_v50  ;;  %v10088_v50 = vld [vmem:[%s17871_s5 + $0xd8] sm:$0xff] }
 0x736   : > { %14441 = vmatpush3.bf16.msra.mxu0 %v14440_v17  ;;  %13663 = vmatprep.mubr.msk.f32.mxu0 %vm14911_vm4, %v17914_v47  ;;  %v10086_v17 = vld [vmem:[%s17871_s5 + $0xb8] sm:$0xff] }
 0x737   : > { %14442 = vmatprep.subr.bf16.mxu0 %v17913_v15  ;;  %v14497_v10 = vpack.c.bf16 %v10086_v17, %v10085_v54 }
 0x739   : > { %13664 = vmatmul.mubr.msk.f32.vlgmr.msra.gmra.mrb[52].mxu0 %vm8803_vm7, %v9586_v33 }
 0x73a   : > { %14444 = vmatpush3.bf16.msra.mxu0 %v14443_v16  ;;  %13670 = vmatprep.mubr.msk.f32.mxu0 %vm14911_vm4, %v17914_v47  ;;  %v14500_v16 = vpack.c.bf16 %v10088_v50, %v10087_v13 }
 0x73b   : > { %14445 = vmatprep.subr.bf16.mxu0 %v17913_v15 }
 0x73d   : > { %13671 = vmatmul.mubr.msk.f32.vlgmr.msra.gmra.mrb[54].mxu0 %vm8803_vm7, %v9664_v5 }
 0x73e   : > { %14447 = vmatpush3.bf16.msra.mxu0 %v14446_v45  ;;  %13677 = vmatprep.mubr.msk.f32.mxu0 %vm14911_vm4, %v17914_v47 }
 0x73f   : > { %14448 = vmatprep.subr.bf16.mxu0 %v17913_v15 }
 0x741   : > { %13678 = vmatmul.mubr.msk.f32.vlgmr.msra.gmra.mrb[56].mxu0 %vm8803_vm7, %v9742_v60 }
 0x742   : > { %14450 = vmatpush3.bf16.msra.mxu0 %v14449_v49  ;;  %13684 = vmatprep.mubr.msk.f32.mxu0 %vm14911_vm4, %v17914_v47 }
 0x743   : > { %14451 = vmatprep.subr.bf16.mxu0 %v17913_v15 }
 0x745   : > { %13685 = vmatmul.mubr.msk.f32.vlgmr.msra.gmra.mrb[58].mxu0 %vm8803_vm7, %v9820_v35 }
 0x746   : > { %14453 = vmatpush3.bf16.msra.mxu0 %v14452_v63  ;;  %13691 = vmatprep.mubr.msk.f32.mxu0 %vm14911_vm4, %v17914_v47 }
 0x747   : > { %14454 = vmatprep.subr.bf16.mxu0 %v17913_v15 }
 0x749   : > { %13692 = vmatmul.mubr.msk.f32.vlgmr.msra.gmra.mrb[60].mxu0 %vm8803_vm7, %v9898_v6 }
 0x74a   : > { %14456 = vmatpush3.bf16.msra.mxu0 %v14455_v39  ;;  %13698 = vmatprep.mubr.msk.f32.mxu0 %vm14911_vm4, %v17914_v47 }
 0x74b   : > { %14481 = vmatprep.subr.bf16.mxu0 %v17913_v15 }
 0x74d   : > { %13699 = vmatmul.mubr.msk.f32.vlgmr.msra.gmra.mrb[62].mxu0 %vm8803_vm7, %v9976_v53 }
 0x74e   : > { %13768 = vmatprep.mubr.msk.f32.mxu0 %vm14911_vm4, %v17914_v47  ;;  %v10062_v47 = vld [vmem:[%s17871_s5 + $0x30] sm:$0xff]  ;;  %14483 = vmatpush3.bf16.msra.mxu0 %v14482_v1 }
 0x74f   : > { %v14461_v27 = vpack.c.bf16 %v10062_v47, %v10061_v21  ;;  %14484 = vmatprep.subr.bf16.mxu0 %v17913_v15 }
 0x751   : > { %14462 = vmatpush3.bf16.msra.mxu1 %v14461_v27 }
 0x752   : > { %14463 = vmatprep.subr.bf16.mxu1 %v17913_v15  ;;  %14486 = vmatpush3.bf16.msra.mxu0 %v14485_v36 }
 0x753   : > { %14487 = vmatprep.subr.bf16.mxu0 %v17913_v15 }
 0x755   : > { %14465 = vmatpush3.bf16.msra.mxu1 %v14464_v9 }
 0x756   : > { %14466 = vmatprep.subr.bf16.mxu1 %v17913_v15  ;;  %14489 = vmatpush3.bf16.msra.mxu0 %v14488_v55  ;;  %v10089_v55 = vld [vmem:[%s17871_s5 + $0xe8] sm:$0xff] }
 0x757   : > { %14490 = vmatprep.subr.bf16.mxu0 %v17913_v15  ;;  %v14503_v46 = vpack.c.bf16 %v10090_v40, %v10089_v55 }
 0x759   : > { %14468 = vmatpush3.bf16.msra.mxu1 %v14467_v14 }
 0x75a   : > { %14469 = vmatprep.subr.bf16.mxu1 %v17913_v15  ;;  %14492 = vmatpush3.bf16.msra.mxu0 %v14491_v41  ;;  %v10091_v41 = vld [vmem:[%s17872_s6 + $0x4] sm:$0x1] }
 0x75b   : > { %14493 = vmatprep.subr.bf16.mxu0 %v17913_v15 }
 0x75d   : > { %14471 = vmatpush3.bf16.msra.mxu1 %v14470_v11 }
 0x75e   : > { %14472 = vmatprep.subr.bf16.mxu1 %v17913_v15  ;;  %14495 = vmatpush3.bf16.msra.mxu0 %v14494_v3 }
 0x75f   : > { %14496 = vmatprep.subr.bf16.mxu0 %v17913_v15 }
 0x761   : > { %14474 = vmatpush3.bf16.msra.mxu1 %v14473_v31 }
 0x762   : > { %14475 = vmatprep.subr.bf16.mxu1 %v17913_v15  ;;  %14498 = vmatpush3.bf16.msra.mxu0 %v14497_v10  ;;  %v10165_v10 = vld [vmem:[%s17872_s6 + $0x5] sm:$0x1] }
 0x763   : > { %14499 = vmatprep.subr.bf16.mxu0 %v17913_v15 }
 0x765   : > { %14477 = vmatpush3.bf16.msra.mxu1 %v14476_v28 }
 0x766   : > { %14478 = vmatprep.subr.bf16.mxu1 %v17913_v15  ;;  %14501 = vmatpush3.bf16.msra.mxu0 %v14500_v16 }
 0x767   : > { %14502 = vmatprep.subr.bf16.mxu0 %v17913_v15 }
 0x769   : > { %14480 = vmatpush3.bf16.msra.mxu1 %v14479_v43 }
 0x76a   : > { %14504 = vmatpush3.bf16.msra.mxu0 %v14503_v46 }
 0x7e4   : > { %v8885_v12 = vpop.f32.mrb[32].mxu0 }
 0x7e5   : > { %v13595_v56 = vpop.f32.mrb[33].mxu0 }
 0x7e8   : > { %v8958_v33 = vpop.f32.mrb[34].mxu0 }
 0x7e9   : > { %v8959_v45 = vadd.f32 %v8958_v33, %v8885_v12  ;;  %v13602_v57 = vpop.f32.mrb[35].mxu0 }
 0x7ec   : > { %v9035_v38 = vpop.f32.mrb[36].mxu0 }
 0x7ed   : > { %v9039_v5 = vadd.f32 %v9035_v38, %v8959_v45  ;;  %v13609_v49 = vpop.f32.mrb[37].mxu0 }
 0x7ee   : > { %v11135_v49 = vld [vmem:[%s316_s17] ss:$0 sm:$0xff] }
 0x7f0   : > { %v9113_v26 = vpop.f32.mrb[38].mxu0 }
 0x7f1   : > { %v9117_v52 = vadd.f32 %v9113_v26, %v9039_v5  ;;  %v13616_v60 = vpop.f32.mrb[39].mxu0 }
 0x7f4   : > { %v9191_v63 = vpop.f32.mrb[40].mxu0 }
 0x7f5   : > { %v9195_v34 = vadd.f32 %v9191_v63, %v9117_v52  ;;  %v13623_v37 = vpop.f32.mrb[41].mxu0 }
 0x7f8   : > { %v9269_v35 = vpop.f32.mrb[42].mxu0 }
 0x7f9   : > { %v9273_v39 = vadd.f32 %v9269_v35, %v9195_v34  ;;  %v13630_v6 = vpop.f32.mrb[43].mxu0 }
 0x7fc   : > { %v9347_v53 = vpop.f32.mrb[44].mxu0 }
 0x7fd   : > { %v9351_v30 = vadd.f32 %v9347_v53, %v9273_v39  ;;  %v13637_v15 = vpop.f32.mrb[45].mxu0 }
 0x800   : > { %v9425_v0 = vpop.f32.mrb[46].mxu0 }
 0x801   : > { %v9429_v58 = vadd.f32 %v9425_v0, %v9351_v30  ;;  %v13644_v21 = vpop.f32.mrb[47].mxu0 }
 0x804   : > { %v9503_v47 = vpop.f32.mrb[48].mxu0 }
 0x805   : > { %v9507_v27 = vadd.f32 %v9503_v47, %v9429_v58  ;;  %v13651_v48 = vpop.f32.mrb[49].mxu0 }
 0x808   : > { %v9581_v8 = vpop.f32.mrb[50].mxu0 }
 0x809   : > { %v9585_v9 = vadd.f32 %v9581_v8, %v9507_v27  ;;  %v13658_v25 = vpop.f32.mrb[51].mxu0 }
 0x80c   : > { %v9659_v42 = vpop.f32.mrb[52].mxu0 }
 0x80d   : > { %v9663_v14 = vadd.f32 %v9659_v42, %v9585_v9  ;;  %v13665_v19 = vpop.f32.mrb[53].mxu0 }
 0x810   : > { %v9737_v7 = vpop.f32.mrb[54].mxu0 }
 0x811   : > { %v9741_v11 = vadd.f32 %v9737_v7, %v9663_v14  ;;  %v13672_v24 = vpop.f32.mrb[55].mxu0 }
 0x814   : > { %v9815_v18 = vpop.f32.mrb[56].mxu0 }
 0x815   : > { %v9819_v31 = vadd.f32 %v9815_v18, %v9741_v11  ;;  %v13679_v59 = vpop.f32.mrb[57].mxu0 }
 0x818   : > { %v9893_v23 = vpop.f32.mrb[58].mxu0 }
 0x819   : > { %v9897_v44 = vadd.f32 %v9893_v23, %v9819_v31  ;;  %v13686_v28 = vpop.f32.mrb[59].mxu0 }
 0x81c   : > { %v9971_v62 = vpop.f32.mrb[60].mxu0 }
 0x81d   : > { %v9975_v43 = vadd.f32 %v9971_v62, %v9897_v44  ;;  %v13693_v20 = vpop.f32.mrb[61].mxu0 }
 0x820   : > { %v10049_v4 = vpop.f32.mrb[62].mxu0 }
 0x821   : > { %v10053_v1 = vadd.f32 %v10049_v4, %v9975_v43  ;;  %v13700_v32 = vpop.f32.mrb[63].mxu0 }
 0x823   : > { %v10055_v36 = vadd.f32 %v10054_v2, %v10053_v1 }
 0x825   : > { %vm10056_vm8 = vcmp.gt.f32.partialorder %v10055_v36, 0.0  ;;  %v10057_v29 = vmul.f32 0.01, %v10055_v36 }
 0x827   : > { %v10058_v22 = vsel %vm10056_vm8, %v10055_v36, %v10057_v29 }
 0x828   : > { %13734 = vmatmul.mubr.f32.vlgmr.msra.gmra.mrb[40].mxu1 %v10058_v22 }
 0x8fb   : > { %v10158_v51 = vpop.f32.mrb[40].mxu1 }
 0x8fc   : > { %v10159_v61 = vadd.f32 %v10158_v51, %v10091_v41  ;;  %v13735_v3 = vpop.f32.mrb[41].mxu1 }
 0x8fe   : > { %vm10162_vm9 = vcmp.gt.f32.partialorder %v10159_v61, 0.0  ;;  %v10163_v54 = vmul.f32 0.01, %v10159_v61 }
 0x900   : > { %v10164_v17 = vsel %vm10162_vm9, %v10159_v61, %v10163_v54 }
 0x901   : > { %13769 = vmatmul.mubr.f32.vlgmr.msra.gmra.mrb[64].mxu0 %v10164_v17 }
 0x9d4   : > { %v10232_v13 = vpop.f32.mrb[64].mxu0 }
 0x9d5   : > { %v10233_v50 = vadd.f32 %v10232_v13, %v10165_v10  ;;  %v13770_v16 = vpop.f32.mrb[65].mxu0 }
 0x9d7   : > { %v10238_v12 = vsel %vm10237_vm10, %v10233_v50, -inf }
 0x9d8   : > { %10239 = vmax.xlane.f32.xlu0 %v10238_v12 }
 0xa65   : > { %v10240_v56 = vpop.xlane.xlu0 %10239 }
 0xa66   : > { %v10241_v33 = vsub.f32 %v10233_v50, %v10240_v56 }
 0xa68   : > { %v10242_v45 = vmul.f32 1.442695, %v10241_v33 }
 0xa6a   : > { %14839 = vpow2.f32 %v10242_v45 }
 0xa74   : > { %v14840_v57 = vpop.eup %14839 }
 0xa75   : > { %10245 = vrot.lane.b32.xlu0 %v14840_v57, %s14913_s23 }
 0xae7   : > { %v10246_v38 = vpop.permute.xlu0 %10245 }
 0xae8   : > { %v10249_v5 = vsel %vm10248_vm11, %v10246_v38, 0.0 }
 0xae9   : > { %10250 = vadd.xlane.f32.xlu1 %v10249_v5 }
 0xafa   : > { %10260 = vrot.lane.b32.xlu1 %v11135_v49, %s14914_s13 }
 0xb76   : > { %v10251_v26 = vpop.xlane.xlu1 %10250 }
 0xb77   : > { %14841 = vrcp.f32 %v10251_v26 }
 0xb78   : > { %14843 = vtanh.f32 %v10233_v50 }
 0xb7a   : > { %v10261_v60 = vpop.permute.xlu1 %10260 }
 0xb81   : > { %v14842_v52 = vpop.eup %14841 }
 0xb82   : > { %v10253_v63 = vmul.f32 %v14842_v52, %v14840_v57  ;;  %v14844_v37 = vpop.eup %14843 }
 0xb84   : > { %v10263_v34 = vmul.f32 %v10261_v60, %v10253_v63 }
 0xb86   : > { %10265 = vrot.lane.b32.xlu1 %v10263_v34, %s14913_s23  ;;  %s14845_s23 = scalar_lea.vmem %s17825_s21, 16 }
 0xb87   : > { %p14846_p11 = scmp.ne.s32.totalorder %s17825_s21, %s14845_s23  ;;  %p14853_p1 = scmp.lt.s32.totalorder %s14851_s12, %s14845_s23 }
 0xb89   : > { %p14847_p12 = pnand %p14846_p11, %p14999_p5  ;;  %p14854_p2 = por %p14853_p1, %p14852_p0 }
 0xb8b   : > { %p14848_p13 = pneg %p14847_p12 }
 0xb8d   : > { %p14855_p3 = pnand %p14854_p2, %p14848_p13 }
 0xbf8   : > { %v10266_v35 = vpop.permute.xlu1 %10265 }
 0xbf9   : > { %v10268_v39 = vadd.f32 %v14844_v37, %v10266_v35 }
 0xbfb   : > { %10269 = vst.msk [vmem:[%s308_s20] sm:$0x1] %vm10248_vm11, %v10268_v39 }
 0xbfc   : > { %14858 = shalt.err (!%p14855_p3)
}
 0xbfd   : > { %s14859_s17 = scalar_lea.hbm %s17823_s25, 16  ;;  %s14863_s19 = scalar_lea.hbm %s17874_s8, 32 }
 0xbfe   : > { %p14860_p4 = scmp.ne.s32.totalorder %s17823_s25, %s14859_s17  ;;  %p14864_p9 = scmp.lt.u32.totalorder %s17823_s25, %s17874_s8 }
 0xbff   : > { %p14865_p10 = scmp.lt.u32.totalorder %s14863_s19, %s14859_s17  ;;  %p14867_p12 = scmp.lt.u32.totalorder %s14859_s17, %s17823_s25 }
 0xc00   : > { %p14861_p7 = pnand %p14860_p4, %p14999_p5 }
 0xc01   : > { %p14866_p11 = por %p14865_p10, %p14864_p9 }
 0xc02   : > { %p14862_p8 = pneg %p14861_p7 }
 0xc03   : > { %p14868_p13 = por %p14867_p12, %p14866_p11 }
 0xc05   : > { %p14869_p0 = pnand %p14868_p13, %p14862_p8 }
 0xc07   : > { %14872 = shalt.err (!%p14869_p0)
}
 0xc08   : > { %14794 = dma.vmem_to_hbm [thread:$0]  (%p14999_p5), %s17825_s21, 16, %s17823_s25, %s10271_s26  }
 0xc09 PF: > { %p14800_p1 = scmp.ge.s32.totalorder %s14907_s30, 2  ;;  %s10295_s24 = sand.u32 1, %s14895_s27  }
 0xc0a   : > { %s10296_s23 = scalar_lea.sflag [#allocation6], %s10295_s24 }
 0xc0b   : > { %p14797_p2 = pnand %p14800_p1, %p15003_p6 }
 0xc0d   : > { %14890 = dma.done.wait (!%p14797_p2), %s10296_s23, 16  }
 0xc0e   : > { %14892 = vsyncadd (!%p14797_p2), %s10296_s23, 4294967280  ;;  %p18_p3 = scmp.ge.s32.totalorder %s14986_s11, 4   ;;  %s17915_s27 = smov %s14899_s28 }
 0xc0f   : > { %s17916_s28 = smov %s14903_s29  ;;  %s17917_s29 = smov %s14997_s14 }
 0xc10   : > { %s17918_s30 = smov %s14986_s11  ;;  %20 = sbr.rel (!%p18_p3) target bundleno = 3 (0x3), region = 153 }
 0xc17   :  { %10300 = vsyncpa [#allocation6], 1 }
 0xc18   :  { %10302 = vsyncpa [#allocation6 + $0x1], 1 }

</bundles_post_ra>
